<compile_context>
chip_gen: v7x
topology: tpu7x:2x2x1
jax: 0.10.0
libtpu: 0.0.40
codegen_flags: <defaults>
</compile_context>

<pallas_src>
import numpy as np

import jax
import jax.numpy as jnp
from jax.experimental import pallas as pl
from jax.experimental.pallas import tpu as pltpu


# ---------------------------------------------------------------------------
# Fused Pallas kernel: whole forward pass in one grid step
# ---------------------------------------------------------------------------

def _fused_forward_kernel(p1_ref, w1_ref, b1f_ref, g_ref, w2_ref, b2f_ref,
                          fw1_ref, fb1_ref, fw2_ref, fb2_ref, o_ref):
    f32 = jnp.float32
    # Locally-connected layer 1 (block-diagonal dense) + ReLU.
    y1 = jnp.dot(p1_ref[...], w1_ref[...], preferred_element_type=f32)
    y1 = jnp.maximum(y1 + b1f_ref[...], 0.0)
    # Layer-2 patch extraction entirely in VMEM via a 0/1 gather matmul.
    p2 = jnp.dot(y1, g_ref[...], preferred_element_type=f32)
    # Locally-connected layer 2 (block-diagonal dense) + ReLU.
    y2 = jnp.dot(p2, w2_ref[...], preferred_element_type=f32)
    y2 = jnp.maximum(y2 + b2f_ref[...], 0.0)
    # FC1 (+ReLU) with rows pre-permuted to consume Y2's (location, channel)
    # column order (== torch flatten order after the permutation).
    h = jnp.dot(y2, fw1_ref[...], preferred_element_type=f32)
    h = jnp.maximum(h + fb1_ref[...], 0.0)
    # FC2 (no activation).
    out = jnp.dot(h, fw2_ref[...], preferred_element_type=f32) + fb2_ref[...]
    o_ref[...] = out.astype(o_ref.dtype)


def _full_spec(a):
    nd = a.ndim
    return pl.BlockSpec(a.shape, lambda i, _nd=nd: (0,) * _nd)


def local_net_forward(x, fused, *, conv_size, conv_stride,
                      conv_matrix_dim_list, **_unused):
    """x: [B, C0, H, W] NCHW -> logits [B, n_out] via one pallas_call."""
    B = x.shape[0]
    D1 = conv_matrix_dim_list[0]
    # Layer-1 patch matrix [B, L1*F1] (single strided gather, ~14 KB).
    p1 = extract_patch_matrix(x, D1, conv_size, conv_stride)

    operands = (p1, fused["W1bd"], fused["b1f"], fused["G"],
                fused["W2bd"], fused["b2f"],
                fused["fw1"], fused["fb1"], fused["fw2"], fused["fb2"])
    n_out = fused["fw2"].shape[1]

    return pl.pallas_call(
        _fused_forward_kernel,
        out_shape=jax.ShapeDtypeStruct((B, n_out), jnp.float32),
        grid=(1,),
        in_specs=[_full_spec(a) for a in operands],
        out_specs=pl.BlockSpec((B, n_out), lambda i: (0, 0)),
        compiler_params=pltpu.CompilerParams(
            dimension_semantics=("arbitrary",),
            vmem_limit_bytes=32 * 1024 * 1024),
    )(*operands)


# ---------------------------------------------------------------------------
# Wrapper-side (one-time) parameter preprocessing and patch extraction
# ---------------------------------------------------------------------------

def extract_patch_matrix(x, D, K, s):
    """[B, C, H, W] -> [B, D*D*C*K*K]; column = ((r*D+c)*C + ci)*K*K + kh*K + kw."""
    B, C = x.shape[0], x.shape[1]
    rows = (jnp.arange(D) * s)[:, None] + jnp.arange(K)[None, :]   # [D, K]
    cols = (jnp.arange(D) * s)[:, None] + jnp.arange(K)[None, :]   # [D, K]
    p = x[:, :, rows, :]                 # [B, C, D, K, W]
    p = p[:, :, :, :, cols]              # [B, C, Dr, Kh, Dc, Kw]
    p = jnp.transpose(p, (0, 2, 4, 1, 3, 5))   # [B, Dr, Dc, C, Kh, Kw]
    return p.reshape(B, D * D * C * K * K)


def prepare_fused_params(params, *, channels_list, conv_size, conv_stride,
                         conv_matrix_dim_list):
    """Build the block-diagonal weights, gather matrix and permuted FC1 once."""
    K, s = conv_size, conv_stride
    D1, D2 = conv_matrix_dim_list
    C0, C1, C2 = channels_list
    L1, F1 = D1 * D1, C0 * K * K
    L2, F2 = D2 * D2, C1 * K * K

    (w1, b1), (w2, b2) = params["conv"]      # w: [L, F, C], b: [L, 1, C]
    (fw1, fb1), (fw2, fb2) = params["fc"]    # fw: [Fin, Fout], fb: [1, Fout]

    def block_diag(w, L, F, C):
        eye = jnp.eye(L, dtype=w.dtype)
        return jnp.einsum('lfc,lm->lfmc', w, eye).reshape(L * F, L * C)

    W1bd = block_diag(w1, L1, F1, C1)        # [L1*F1, L1*C1]
    W2bd = block_diag(w2, L2, F2, C2)        # [L2*F2, L2*C2]
    b1f = b1[:, 0, :].reshape(1, L1 * C1)
    b2f = b2[:, 0, :].reshape(1, L2 * C2)

    # 0/1 gather matrix: Y1 columns (l1=r1*D1+c1, ci) -> layer-2 patch columns
    # (l2=r2*D2+c2, f2=ci*K*K+kh*K+kw).
    G = np.zeros((L1 * C1, L2 * F2), np.float32)
    for r2 in range(D2):
        for c2 in range(D2):
            for ci in range(C1):
                for kh in range(K):
                    for kw in range(K):
                        l1 = (r2 * s + kh) * D1 + (c2 * s + kw)
                        col = (r2 * D2 + c2) * F2 + ci * K * K + kh * K + kw
                        G[l1 * C1 + ci, col] = 1.0

    # Permute FC1 rows: Y2 columns are (l2, co); torch flatten is (co, r, c).
    perm = np.empty(L2 * C2, np.int32)
    for r in range(D2):
        for c in range(D2):
            for co in range(C2):
                perm[(r * D2 + c) * C2 + co] = co * D2 * D2 + r * D2 + c
    fw1p = fw1[perm, :]

    return dict(W1bd=W1bd, b1f=b1f, G=jnp.asarray(G), W2bd=W2bd, b2f=b2f,
                fw1=fw1p, fb1=fb1, fw2=fw2, fb2=fb2)


# ---------------------------------------------------------------------------
# Parameter init (matches torch Conv2d / Linear default init shapes/ranges)
# ---------------------------------------------------------------------------

def init_params(key, channels_list, conv_size, conv_matrix_dim_list, fc_dim_list):
    params = {"conv": [], "fc": []}
    K = conv_size
    for i, D in enumerate(conv_matrix_dim_list):
        C_in, C_out = channels_list[i], channels_list[i + 1]
        L, F_in = D * D, C_in * K * K
        key, kw, kb = jax.random.split(key, 3)
        scale = 1.0 / float(F_in) ** 0.5
        # L independent Conv2d weights [C_out, C_in, K, K] flattened (ci,kh,kw)
        # and transposed to [F_in, C_out].
        w = jax.random.uniform(kw, (L, F_in, C_out), jnp.float32, -scale, scale)
        b = jax.random.uniform(kb, (L, 1, C_out), jnp.float32, -scale, scale)
        params["conv"].append((w, b))
    for j in range(len(fc_dim_list) - 1):
        F_in, F_out = fc_dim_list[j], fc_dim_list[j + 1]
        key, kw, kb = jax.random.split(key, 3)
        scale = 1.0 / float(F_in) ** 0.5
        w = jax.random.uniform(kw, (F_in, F_out), jnp.float32, -scale, scale)
        b = jax.random.uniform(kb, (1, F_out), jnp.float32, -scale, scale)
        params["fc"].append((w, b))
    return params


# ---------------------------------------------------------------------------
# Pure-jnp reference (per-location formulation, mirrors the torch module)
# ---------------------------------------------------------------------------

def local_net_reference(x, params, *, channels_list, conv_size, conv_stride,
                        conv_matrix_dim_list):
    B = x.shape[0]
    K, s = conv_size, conv_stride
    for i, D in enumerate(conv_matrix_dim_list):
        C_out = channels_list[i + 1]
        patches = []
        for r in range(D):              # c1 (rows), outer — matches torch loop
            for c in range(D):          # c2 (cols)
                p = x[:, :, r * s:r * s + K, c * s:c * s + K]
                patches.append(p.reshape(B, -1))
        P = jnp.stack(patches, axis=0)                        # [L, B, F]
        w, b = params["conv"][i]
        y = jnp.maximum(jnp.einsum('lbf,lfc->lbc', P, w) + b, 0.0)
        # torch.cat(dim=2) over locations then reshape -> [B, C_out, D, D]
        x = jnp.transpose(y, (1, 2, 0)).reshape(B, C_out, D, D)
    x = x.reshape(B, -1)
    n_fc = len(params["fc"])
    for j, (w, b) in enumerate(params["fc"]):
        x = x @ w + b
        if j < n_fc - 1:
            x = jnp.maximum(x, 0.0)
    return x


# ---------------------------------------------------------------------------

if __name__ == "__main__":
    # input 16x16 -> (K=3, s=2, D=7) -> 7x7 -> (K=3, s=2, D=3) -> 3x3
    channels_list = [4, 8, 16]
    conv_size = 3
    conv_stride = 2
    conv_matrix_dim_list = [7, 3]
    fc_dim_list = [channels_list[-1] * conv_matrix_dim_list[-1] ** 2, 32, 10]

    key = jax.random.PRNGKey(0)
    kx, kp = jax.random.split(key)
    x = jax.random.normal(kx, (2, 4, 16, 16), dtype=jnp.float32)
    params = init_params(kp, channels_list, conv_size,
                         conv_matrix_dim_list, fc_dim_list)

    cfg = dict(channels_list=channels_list, conv_size=conv_size,
               conv_stride=conv_stride,
               conv_matrix_dim_list=conv_matrix_dim_list)

    fused = prepare_fused_params(params, **cfg)      # one-time weight prep

    out = local_net_forward(x, fused, **cfg)
    out = jax.block_until_ready(out)
    assert out.shape == (2, fc_dim_list[-1]), out.shape

    ref = local_net_reference(x, params, **cfg)
    max_err = float(jnp.max(jnp.abs(out - ref)))
    assert jnp.allclose(out, ref, atol=2e-4, rtol=2e-4), max_err

    print("KERNEL_OK")
</pallas_src>

<mosaic_0001>
module attributes {stable_mosaic.version = 11 : i64} {
  func.func @_fused_forward_kernel(%arg0: i32, %arg1: memref<2x1764xf32, #tpu.memory_space<vmem>>, %arg2: memref<1764x392xf32, #tpu.memory_space<vmem>>, %arg3: memref<1x392xf32, #tpu.memory_space<vmem>>, %arg4: memref<392x648xf32, #tpu.memory_space<vmem>>, %arg5: memref<648x144xf32, #tpu.memory_space<vmem>>, %arg6: memref<1x144xf32, #tpu.memory_space<vmem>>, %arg7: memref<144x32xf32, #tpu.memory_space<vmem>>, %arg8: memref<1x32xf32, #tpu.memory_space<vmem>>, %arg9: memref<32x10xf32, #tpu.memory_space<vmem>>, %arg10: memref<1x10xf32, #tpu.memory_space<vmem>>, %arg11: memref<2x10xf32, #tpu.memory_space<vmem>>) attributes {dimension_semantics = [#tpu.dimension_semantics<arbitrary>], iteration_bounds = array<i64: 1>, scalar_prefetch = 0 : i64, scratch_operands = 0 : i64, tpu.core_type = #tpu.core_type<tc>, window_params = [{pipeline_mode = #tpu.pipeline_mode<synchronous>, transform_indices = @transform_0, window_bounds = array<i64: 2, 1764>}, {pipeline_mode = #tpu.pipeline_mode<synchronous>, transform_indices = @transform_1, window_bounds = array<i64: 1764, 392>}, {pipeline_mode = #tpu.pipeline_mode<synchronous>, transform_indices = @transform_2, window_bounds = array<i64: 1, 392>}, {pipeline_mode = #tpu.pipeline_mode<synchronous>, transform_indices = @transform_3, window_bounds = array<i64: 392, 648>}, {pipeline_mode = #tpu.pipeline_mode<synchronous>, transform_indices = @transform_4, window_bounds = array<i64: 648, 144>}, {pipeline_mode = #tpu.pipeline_mode<synchronous>, transform_indices = @transform_5, window_bounds = array<i64: 1, 144>}, {pipeline_mode = #tpu.pipeline_mode<synchronous>, transform_indices = @transform_6, window_bounds = array<i64: 144, 32>}, {pipeline_mode = #tpu.pipeline_mode<synchronous>, transform_indices = @transform_7, window_bounds = array<i64: 1, 32>}, {pipeline_mode = #tpu.pipeline_mode<synchronous>, transform_indices = @transform_8, window_bounds = array<i64: 32, 10>}, {pipeline_mode = #tpu.pipeline_mode<synchronous>, transform_indices = @transform_9, window_bounds = array<i64: 1, 10>}, {pipeline_mode = #tpu.pipeline_mode<synchronous>, transform_indices = @transform_10, window_bounds = array<i64: 2, 10>}]} {
    %c0 = arith.constant 0 : index
    %c0_0 = arith.constant 0 : index
    %0 = vector.load %arg1[%c0, %c0_0] : memref<2x1764xf32, #tpu.memory_space<vmem>>, vector<2x1764xf32>
    %c0_1 = arith.constant 0 : index
    %c0_2 = arith.constant 0 : index
    %1 = vector.load %arg2[%c0_1, %c0_2] : memref<1764x392xf32, #tpu.memory_space<vmem>>, vector<1764x392xf32>
    %cst = arith.constant dense<0.000000e+00> : vector<2x392xf32>
    %2 = tpu.matmul %0, %1, %cst {dimension_numbers = #tpu.dot_dimension_numbers<[1], [0], [0], [1], [0, 0, 1, 1], [], []>} : vector<2x1764xf32>, vector<1764x392xf32>, vector<2x392xf32> -> vector<2x392xf32>
    %c0_3 = arith.constant 0 : index
    %c0_4 = arith.constant 0 : index
    %3 = vector.load %arg3[%c0_3, %c0_4] : memref<1x392xf32, #tpu.memory_space<vmem>>, vector<1x392xf32>
    %4 = vector.broadcast %3 : vector<1x392xf32> to vector<2x392xf32>
    %5 = arith.addf %2, %4 : vector<2x392xf32>
    %cst_5 = arith.constant 0.000000e+00 : f32
    %6 = vector.broadcast %cst_5 : f32 to vector<2x392xf32>
    %7 = arith.maximumf %5, %6 : vector<2x392xf32>
    %c0_6 = arith.constant 0 : index
    %c0_7 = arith.constant 0 : index
    %8 = vector.load %arg4[%c0_6, %c0_7] : memref<392x648xf32, #tpu.memory_space<vmem>>, vector<392x648xf32>
    %cst_8 = arith.constant dense<0.000000e+00> : vector<2x648xf32>
    %9 = tpu.matmul %7, %8, %cst_8 {dimension_numbers = #tpu.dot_dimension_numbers<[1], [0], [0], [1], [0, 0, 1, 1], [], []>} : vector<2x392xf32>, vector<392x648xf32>, vector<2x648xf32> -> vector<2x648xf32>
    %c0_9 = arith.constant 0 : index
    %c0_10 = arith.constant 0 : index
    %10 = vector.load %arg5[%c0_9, %c0_10] : memref<648x144xf32, #tpu.memory_space<vmem>>, vector<648x144xf32>
    %cst_11 = arith.constant dense<0.000000e+00> : vector<2x144xf32>
    %11 = tpu.matmul %9, %10, %cst_11 {dimension_numbers = #tpu.dot_dimension_numbers<[1], [0], [0], [1], [0, 0, 1, 1], [], []>} : vector<2x648xf32>, vector<648x144xf32>, vector<2x144xf32> -> vector<2x144xf32>
    %c0_12 = arith.constant 0 : index
    %c0_13 = arith.constant 0 : index
    %12 = vector.load %arg6[%c0_12, %c0_13] : memref<1x144xf32, #tpu.memory_space<vmem>>, vector<1x144xf32>
    %13 = vector.broadcast %12 : vector<1x144xf32> to vector<2x144xf32>
    %14 = arith.addf %11, %13 : vector<2x144xf32>
    %cst_14 = arith.constant 0.000000e+00 : f32
    %15 = vector.broadcast %cst_14 : f32 to vector<2x144xf32>
    %16 = arith.maximumf %14, %15 : vector<2x144xf32>
    %c0_15 = arith.constant 0 : index
    %c0_16 = arith.constant 0 : index
    %17 = vector.load %arg7[%c0_15, %c0_16] : memref<144x32xf32, #tpu.memory_space<vmem>>, vector<144x32xf32>
    %cst_17 = arith.constant dense<0.000000e+00> : vector<2x32xf32>
    %18 = tpu.matmul %16, %17, %cst_17 {dimension_numbers = #tpu.dot_dimension_numbers<[1], [0], [0], [1], [0, 0, 1, 1], [], []>} : vector<2x144xf32>, vector<144x32xf32>, vector<2x32xf32> -> vector<2x32xf32>
    %c0_18 = arith.constant 0 : index
    %c0_19 = arith.constant 0 : index
    %19 = vector.load %arg8[%c0_18, %c0_19] : memref<1x32xf32, #tpu.memory_space<vmem>>, vector<1x32xf32>
    %20 = vector.broadcast %19 : vector<1x32xf32> to vector<2x32xf32>
    %21 = arith.addf %18, %20 : vector<2x32xf32>
    %cst_20 = arith.constant 0.000000e+00 : f32
    %22 = vector.broadcast %cst_20 : f32 to vector<2x32xf32>
    %23 = arith.maximumf %21, %22 : vector<2x32xf32>
    %c0_21 = arith.constant 0 : index
    %c0_22 = arith.constant 0 : index
    %24 = vector.load %arg9[%c0_21, %c0_22] : memref<32x10xf32, #tpu.memory_space<vmem>>, vector<32x10xf32>
    %cst_23 = arith.constant dense<0.000000e+00> : vector<2x10xf32>
    %25 = tpu.matmul %23, %24, %cst_23 {dimension_numbers = #tpu.dot_dimension_numbers<[1], [0], [0], [1], [0, 0, 1, 1], [], []>} : vector<2x32xf32>, vector<32x10xf32>, vector<2x10xf32> -> vector<2x10xf32>
    %c0_24 = arith.constant 0 : index
    %c0_25 = arith.constant 0 : index
    %26 = vector.load %arg10[%c0_24, %c0_25] : memref<1x10xf32, #tpu.memory_space<vmem>>, vector<1x10xf32>
    %27 = vector.broadcast %26 : vector<1x10xf32> to vector<2x10xf32>
    %28 = arith.addf %25, %27 : vector<2x10xf32>
    %c0_26 = arith.constant 0 : index
    %c0_27 = arith.constant 0 : index
    %29 = vector.load %arg11[%c0_26, %c0_27] : memref<2x10xf32, #tpu.memory_space<vmem>>, vector<2x10xf32>
    tpu.vector_store %arg11[%c0_26, %c0_27], %28 {strides = array<i32>} : memref<2x10xf32, #tpu.memory_space<vmem>>, vector<2x10xf32>,
    return
  }
  func.func @transform_0(%arg0: i32) -> (i32, i32) {
    %c0_i32 = arith.constant 0 : i32
    %c0_i32_0 = arith.constant 0 : i32
    %c0_i32_1 = arith.constant 0 : i32
    return %c0_i32, %c0_i32_0 : i32, i32
  }
  func.func @transform_1(%arg0: i32) -> (i32, i32) {
    %c0_i32 = arith.constant 0 : i32
    %c0_i32_0 = arith.constant 0 : i32
    %c0_i32_1 = arith.constant 0 : i32
    return %c0_i32, %c0_i32_0 : i32, i32
  }
  func.func @transform_2(%arg0: i32) -> (i32, i32) {
    %c0_i32 = arith.constant 0 : i32
    %c0_i32_0 = arith.constant 0 : i32
    %c0_i32_1 = arith.constant 0 : i32
    return %c0_i32, %c0_i32_0 : i32, i32
  }
  func.func @transform_3(%arg0: i32) -> (i32, i32) {
    %c0_i32 = arith.constant 0 : i32
    %c0_i32_0 = arith.constant 0 : i32
    %c0_i32_1 = arith.constant 0 : i32
    return %c0_i32, %c0_i32_0 : i32, i32
  }
  func.func @transform_4(%arg0: i32) -> (i32, i32) {
    %c0_i32 = arith.constant 0 : i32
    %c0_i32_0 = arith.constant 0 : i32
    %c0_i32_1 = arith.constant 0 : i32
    return %c0_i32, %c0_i32_0 : i32, i32
  }
  func.func @transform_5(%arg0: i32) -> (i32, i32) {
    %c0_i32 = arith.constant 0 : i32
    %c0_i32_0 = arith.constant 0 : i32
    %c0_i32_1 = arith.constant 0 : i32
    return %c0_i32, %c0_i32_0 : i32, i32
  }
  func.func @transform_6(%arg0: i32) -> (i32, i32) {
    %c0_i32 = arith.constant 0 : i32
    %c0_i32_0 = arith.constant 0 : i32
    %c0_i32_1 = arith.constant 0 : i32
    return %c0_i32, %c0_i32_0 : i32, i32
  }
  func.func @transform_7(%arg0: i32) -> (i32, i32) {
    %c0_i32 = arith.constant 0 : i32
    %c0_i32_0 = arith.constant 0 : i32
    %c0_i32_1 = arith.constant 0 : i32
    return %c0_i32, %c0_i32_0 : i32, i32
  }
  func.func @transform_8(%arg0: i32) -> (i32, i32) {
    %c0_i32 = arith.constant 0 : i32
    %c0_i32_0 = arith.constant 0 : i32
    %c0_i32_1 = arith.constant 0 : i32
    return %c0_i32, %c0_i32_0 : i32, i32
  }
  func.func @transform_9(%arg0: i32) -> (i32, i32) {
    %c0_i32 = arith.constant 0 : i32
    %c0_i32_0 = arith.constant 0 : i32
    %c0_i32_1 = arith.constant 0 : i32
    return %c0_i32, %c0_i32_0 : i32, i32
  }
  func.func @transform_10(%arg0: i32) -> (i32, i32) {
    %c0_i32 = arith.constant 0 : i32
    %c0_i32_0 = arith.constant 0 : i32
    %c0_i32_1 = arith.constant 0 : i32
    return %c0_i32, %c0_i32_0 : i32, i32
  }
}

</mosaic_0001>

<bundles_post_ra>
// kernel: tpu_custom_call.1
= control target key start
LH: loop header
LB: loop body
LE: loop exit
PB: predicated region body
PF: predicated region fallthrough
CT: control target
= control target key end

     0   :  { %s9132_s0 = inlined_call_operand.vmem [shape: f32[2,1764], index: 0, kind: input, shape index: {}]   ;;  %s9133_s1 = inlined_call_operand.vmem [shape: f32[1764,392], index: 1, kind: input, shape index: {}]   ;;  %s9134_s2 = inlined_call_operand.vmem [shape: f32[1,392], index: 2, kind: input, shape index: {}]   ;;  %s9135_s3 = inlined_call_operand.vmem [shape: f32[392,648], index: 3, kind: input, shape index: {}]   ;;  %s9136_s4 = inlined_call_operand.vmem [shape: f32[648,144], index: 4, kind: input, shape index: {}]   ;;  %s9137_s5 = inlined_call_operand.vmem [shape: f32[1,144], index: 5, kind: input, shape index: {}]   ;;  %s9138_s6 = inlined_call_operand.vmem [shape: f32[144,32], index: 6, kind: input, shape index: {}]   ;;  %s9139_s7 = inlined_call_operand.vmem [shape: f32[1,32], index: 7, kind: input, shape index: {}]   ;;  %s9140_s8 = inlined_call_operand.vmem [shape: f32[32,10], index: 8, kind: input, shape index: {}]   ;;  %s9141_s9 = inlined_call_operand.vmem [shape: f32[1,10], index: 9, kind: input, shape index: {}]   ;;  %s9142_s10 = inlined_call_operand.hbm [shape: f32[2,10], index: 10, kind: output, shape index: {}]  }
   0x1   :  { %v41_v0 = vld [vmem:[%s9133_s1 + $0x8] sm:$0xff]  ;;  %v43_v2 = vld [vmem:[%s9133_s1 + $0x18] sm:$0xff]  ;;  %v40_v5 = vld [vmem:[%s9133_s1] sm:$0xff] }
   0x2   :  { %v45_v1 = vld [vmem:[%s9133_s1 + $0x28] sm:$0xff]  ;;  %v47_v4 = vld [vmem:[%s9133_s1 + $0x38] sm:$0xff]  ;;  %v44_v6 = vld [vmem:[%s9133_s1 + $0x20] sm:$0xff] }
   0x3   :  { %v3384_v3 = vpack.c.bf16 %v45_v1, %v41_v0  ;;  %v3824_v7 = vpack.c.bf16 %v47_v4, %v43_v2  ;;  %v3386_v8 = vpack.c.bf16 %v44_v6, %v40_v5  ;;  %v42_v9 = vld [vmem:[%s9133_s1 + $0x10] sm:$0xff]  ;;  %v49_v11 = vld [vmem:[%s9133_s1 + $0x48] sm:$0xff]  ;;  %v51_v14 = vld [vmem:[%s9133_s1 + $0x58] sm:$0xff] }
   0x4   :  { %v46_v10 = vld [vmem:[%s9133_s1 + $0x30] sm:$0xff]  ;;  %v53_v13 = vld [vmem:[%s9133_s1 + $0x68] sm:$0xff]  ;;  %v55_v15 = vld [vmem:[%s9133_s1 + $0x78] sm:$0xff] }
   0x5   :  { %3385 = vmatprep.subr.bf16.mxu0 %v3384_v3  ;;  %v3826_v12 = vpack.c.bf16 %v46_v10, %v42_v9  ;;  %3825 = vmatprep.subr.bf16.mxu1 %v3824_v7  ;;  %v3388_v16 = vpack.c.bf16 %v53_v13, %v49_v11  ;;  %v3828_v17 = vpack.c.bf16 %v55_v15, %v51_v14  ;;  %v48_v18 = vld [vmem:[%s9133_s1 + $0x40] sm:$0xff]  ;;  %v50_v20 = vld [vmem:[%s9133_s1 + $0x50] sm:$0xff]  ;;  %v57_v23 = vld [vmem:[%s9133_s1 + $0x88] sm:$0xff] }
   0x6   :  { %3387 = vmatpush1.bf16.msra.mxu0 %v3386_v8  ;;  %v52_v19 = vld [vmem:[%s9133_s1 + $0x60] sm:$0xff]  ;;  %v54_v22 = vld [vmem:[%s9133_s1 + $0x70] sm:$0xff]  ;;  %v61_v24 = vld [vmem:[%s9133_s1 + $0xa8] sm:$0xff] }
   0x7   :  { %3827 = vmatpush1.bf16.msra.mxu1 %v3826_v12  ;;  %v3390_v21 = vpack.c.bf16 %v52_v19, %v48_v18  ;;  %3389 = vmatprep.subr.bf16.mxu0 %v3388_v16  ;;  %v3830_v25 = vpack.c.bf16 %v54_v22, %v50_v20  ;;  %v3392_v26 = vpack.c.bf16 %v61_v24, %v57_v23  ;;  %v59_v27 = vld [vmem:[%s9133_s1 + $0x98] sm:$0xff]  ;;  %v56_v29 = vld [vmem:[%s9133_s1 + $0x80] sm:$0xff]  ;;  %v58_v32 = vld [vmem:[%s9133_s1 + $0x90] sm:$0xff] }
   0x8   :  { %3829 = vmatprep.subr.bf16.mxu1 %v3828_v17  ;;  %v63_v28 = vld [vmem:[%s9133_s1 + $0xb8] sm:$0xff]  ;;  %v60_v31 = vld [vmem:[%s9133_s1 + $0xa0] sm:$0xff]  ;;  %v62_v33 = vld [vmem:[%s9133_s1 + $0xb0] sm:$0xff] }
   0x9   :  { %v3832_v30 = vpack.c.bf16 %v63_v28, %v59_v27  ;;  %v3394_v34 = vpack.c.bf16 %v60_v31, %v56_v29  ;;  %v65_v35 = vld [vmem:[%s9133_s1 + $0xc8] sm:$0xff]  ;;  %v67_v37 = vld [vmem:[%s9133_s1 + $0xd8] sm:$0xff]  ;;  %v3834_v38 = vpack.c.bf16 %v62_v33, %v58_v32  ;;  %v64_v41 = vld [vmem:[%s9133_s1 + $0xc0] sm:$0xff] }
   0xa   :  { %3391 = vmatpush1.bf16.msra.mxu0 %v3390_v21  ;;  %v69_v36 = vld [vmem:[%s9133_s1 + $0xe8] sm:$0xff]  ;;  %v71_v40 = vld [vmem:[%s9133_s1 + $0xf8] sm:$0xff]  ;;  %v68_v42 = vld [vmem:[%s9133_s1 + $0xe0] sm:$0xff] }
   0xb   :  { %3831 = vmatpush1.bf16.msra.mxu1 %v3830_v25  ;;  %3393 = vmatprep.subr.bf16.mxu0 %v3392_v26  ;;  %v3396_v39 = vpack.c.bf16 %v69_v36, %v65_v35  ;;  %v3836_v43 = vpack.c.bf16 %v71_v40, %v67_v37  ;;  %v66_v44 = vld [vmem:[%s9133_s1 + $0xd0] sm:$0xff]  ;;  %v73_v46 = vld [vmem:[%s9133_s1 + $0x108] sm:$0xff]  ;;  %v75_v48 = vld [vmem:[%s9133_s1 + $0x118] sm:$0xff]  ;;  %v3398_v50 = vpack.c.bf16 %v68_v42, %v64_v41 }
   0xc   :  { %3833 = vmatprep.subr.bf16.mxu1 %v3832_v30  ;;  %v70_v45 = vld [vmem:[%s9133_s1 + $0xf0] sm:$0xff]  ;;  %v77_v47 = vld [vmem:[%s9133_s1 + $0x128] sm:$0xff]  ;;  %v79_v49 = vld [vmem:[%s9133_s1 + $0x138] sm:$0xff] }
   0xd   :  { %v3838_v51 = vpack.c.bf16 %v70_v45, %v66_v44  ;;  %v3400_v52 = vpack.c.bf16 %v77_v47, %v73_v46  ;;  %v72_v53 = vld [vmem:[%s9133_s1 + $0x100] sm:$0xff]  ;;  %v74_v55 = vld [vmem:[%s9133_s1 + $0x110] sm:$0xff]  ;;  %v3840_v56 = vpack.c.bf16 %v79_v49, %v75_v48  ;;  %v81_v58 = vld [vmem:[%s9133_s1 + $0x148] sm:$0xff]  ;;  %v926_v46 = vlaneseq }
   0xe   :  { %3395 = vmatpush1.bf16.msra.mxu0 %v3394_v34  ;;  %v76_v54 = vld [vmem:[%s9133_s1 + $0x120] sm:$0xff]  ;;  %v78_v57 = vld [vmem:[%s9133_s1 + $0x130] sm:$0xff]  ;;  %v85_v59 = vld [vmem:[%s9133_s1 + $0x168] sm:$0xff]  ;;  %v4817_v47 = vmov 1983009808  }
   0xf   :  { %3835 = vmatpush1.bf16.msra.mxu1 %v3834_v38  ;;  %3397 = vmatprep.subr.bf16.mxu0 %v3396_v39  ;;  %v83_v60 = vld [vmem:[%s9133_s1 + $0x158] sm:$0xff]  ;;  %v3402_v62 = vpack.c.bf16 %v76_v54, %v72_v53  ;;  %v3842_v63 = vpack.c.bf16 %v78_v57, %v74_v55  ;;  %v3404_v0 = vpack.c.bf16 %v85_v59, %v81_v58  ;;  %v80_v1 = vld [vmem:[%s9133_s1 + $0x140] sm:$0xff]  ;;  %v82_v3 = vld [vmem:[%s9133_s1 + $0x150] sm:$0xff]  ;;  %v952_v48 = vunpack.c.l.s4 %v4817_v47 }
  0x10   :  { %3837 = vmatprep.subr.bf16.mxu1 %v3836_v43  ;;  %v87_v61 = vld [vmem:[%s9133_s1 + $0x178] sm:$0xff]  ;;  %v84_v2 = vld [vmem:[%s9133_s1 + $0x160] sm:$0xff]  ;;  %v86_v5 = vld [vmem:[%s9133_s1 + $0x170] sm:$0xff] }
  0x11   :  { %v3844_v4 = vpack.c.bf16 %v87_v61, %v83_v60  ;;  %v89_v6 = vld [vmem:[%s9133_s1 + $0x188] sm:$0xff]  ;;  %v91_v8 = vld [vmem:[%s9133_s1 + $0x198] sm:$0xff]  ;;  %v3406_v10 = vpack.c.bf16 %v84_v2, %v80_v1  ;;  %v3846_v11 = vpack.c.bf16 %v86_v5, %v82_v3  ;;  %v88_v13 = vld [vmem:[%s9133_s1 + $0x180] sm:$0xff]  ;;  %v5129_v61 = vshrl.u32 %v926_v46, 7 }
  0x12   :  { %3399 = vmatpush1.bf16.msra.mxu0 %v3398_v50  ;;  %v93_v7 = vld [vmem:[%s9133_s1 + $0x1a8] sm:$0xff]  ;;  %v95_v9 = vld [vmem:[%s9133_s1 + $0x1b8] sm:$0xff]  ;;  %v92_v14 = vld [vmem:[%s9133_s1 + $0x1a0] sm:$0xff] }
  0x13   :  { %3839 = vmatpush1.bf16.msra.mxu1 %v3838_v51  ;;  %3401 = vmatprep.subr.bf16.mxu0 %v3400_v52  ;;  %v3408_v12 = vpack.c.bf16 %v93_v7, %v89_v6  ;;  %v90_v15 = vld [vmem:[%s9133_s1 + $0x190] sm:$0xff]  ;;  %v3848_v16 = vpack.c.bf16 %v95_v9, %v91_v8  ;;  %v97_v18 = vld [vmem:[%s9133_s1 + $0x1c8] sm:$0xff]  ;;  %v99_v20 = vld [vmem:[%s9133_s1 + $0x1d8] sm:$0xff]  ;;  %v3410_v22 = vpack.c.bf16 %v92_v14, %v88_v13 }
  0x14   :  { %3841 = vmatprep.subr.bf16.mxu1 %v3840_v56  ;;  %v94_v17 = vld [vmem:[%s9133_s1 + $0x1b0] sm:$0xff]  ;;  %v101_v19 = vld [vmem:[%s9133_s1 + $0x1e8] sm:$0xff]  ;;  %v103_v21 = vld [vmem:[%s9133_s1 + $0x1f8] sm:$0xff] }
  0x15   :  { %v3850_v23 = vpack.c.bf16 %v94_v17, %v90_v15  ;;  %v3412_v24 = vpack.c.bf16 %v101_v19, %v97_v18  ;;  %v96_v25 = vld [vmem:[%s9133_s1 + $0x1c0] sm:$0xff]  ;;  %v98_v27 = vld [vmem:[%s9133_s1 + $0x1d0] sm:$0xff]  ;;  %v3852_v28 = vpack.c.bf16 %v103_v21, %v99_v20  ;;  %v105_v30 = vld [vmem:[%s9133_s1 + $0x208] sm:$0xff] }
  0x16   :  { %3403 = vmatpush1.bf16.msra.mxu0 %v3402_v62  ;;  %v100_v26 = vld [vmem:[%s9133_s1 + $0x1e0] sm:$0xff]  ;;  %v102_v29 = vld [vmem:[%s9133_s1 + $0x1f0] sm:$0xff]  ;;  %v109_v31 = vld [vmem:[%s9133_s1 + $0x228] sm:$0xff]  ;;  %v953_v62 = vunpack.c.0.s8 %v952_v48 }
  0x17   :  { %3843 = vmatpush1.bf16.msra.mxu1 %v3842_v63  ;;  %3405 = vmatprep.subr.bf16.mxu0 %v3404_v0  ;;  %v107_v32 = vld [vmem:[%s9133_s1 + $0x218] sm:$0xff]  ;;  %v3414_v34 = vpack.c.bf16 %v100_v26, %v96_v25  ;;  %v3854_v35 = vpack.c.bf16 %v102_v29, %v98_v27  ;;  %v3416_v36 = vpack.c.bf16 %v109_v31, %v105_v30  ;;  %v104_v37 = vld [vmem:[%s9133_s1 + $0x200] sm:$0xff]  ;;  %v106_v39 = vld [vmem:[%s9133_s1 + $0x210] sm:$0xff] }
  0x18   :  { %3845 = vmatprep.subr.bf16.mxu1 %v3844_v4  ;;  %v111_v33 = vld [vmem:[%s9133_s1 + $0x238] sm:$0xff]  ;;  %v108_v38 = vld [vmem:[%s9133_s1 + $0x220] sm:$0xff]  ;;  %v110_v41 = vld [vmem:[%s9133_s1 + $0x230] sm:$0xff] }
  0x19   :  { %v3856_v40 = vpack.c.bf16 %v111_v33, %v107_v32  ;;  %v113_v42 = vld [vmem:[%s9133_s1 + $0x248] sm:$0xff]  ;;  %v115_v44 = vld [vmem:[%s9133_s1 + $0x258] sm:$0xff]  ;;  %v3418_v49 = vpack.c.bf16 %v108_v38, %v104_v37  ;;  %v3858_v50 = vpack.c.bf16 %v110_v41, %v106_v39  ;;  %v112_v52 = vld [vmem:[%s9133_s1 + $0x240] sm:$0xff] }
  0x1a   :  { %3407 = vmatpush1.bf16.msra.mxu0 %v3406_v10  ;;  %v117_v43 = vld [vmem:[%s9133_s1 + $0x268] sm:$0xff]  ;;  %v119_v45 = vld [vmem:[%s9133_s1 + $0x278] sm:$0xff]  ;;  %v116_v53 = vld [vmem:[%s9133_s1 + $0x260] sm:$0xff] }
  0x1b   :  { %3847 = vmatpush1.bf16.msra.mxu1 %v3846_v11  ;;  %3409 = vmatprep.subr.bf16.mxu0 %v3408_v12  ;;  %v3420_v51 = vpack.c.bf16 %v117_v43, %v113_v42  ;;  %v114_v54 = vld [vmem:[%s9133_s1 + $0x250] sm:$0xff]  ;;  %v3860_v55 = vpack.c.bf16 %v119_v45, %v115_v44  ;;  %v121_v57 = vld [vmem:[%s9133_s1 + $0x288] sm:$0xff]  ;;  %v123_v59 = vld [vmem:[%s9133_s1 + $0x298] sm:$0xff]  ;;  %v3422_v63 = vpack.c.bf16 %v116_v53, %v112_v52 }
  0x1c   :  { %3849 = vmatprep.subr.bf16.mxu1 %v3848_v16  ;;  %v118_v56 = vld [vmem:[%s9133_s1 + $0x270] sm:$0xff]  ;;  %v125_v58 = vld [vmem:[%s9133_s1 + $0x2a8] sm:$0xff]  ;;  %v127_v60 = vld [vmem:[%s9133_s1 + $0x2b8] sm:$0xff]  ;;  %v5156_v11 = vsub.s32 %v953_v62, %v5129_v61 }
  0x1d   :  { %v3862_v0 = vpack.c.bf16 %v118_v56, %v114_v54  ;;  %v3424_v1 = vpack.c.bf16 %v125_v58, %v121_v57  ;;  %v120_v2 = vld [vmem:[%s9133_s1 + $0x280] sm:$0xff]  ;;  %v122_v4 = vld [vmem:[%s9133_s1 + $0x290] sm:$0xff]  ;;  %v3864_v5 = vpack.c.bf16 %v127_v60, %v123_v59  ;;  %v129_v7 = vld [vmem:[%s9133_s1 + $0x2c8] sm:$0xff] }
  0x1e   :  { %3411 = vmatpush1.bf16.msra.mxu0 %v3410_v22  ;;  %v124_v3 = vld [vmem:[%s9133_s1 + $0x2a0] sm:$0xff]  ;;  %v126_v6 = vld [vmem:[%s9133_s1 + $0x2b0] sm:$0xff]  ;;  %v133_v8 = vld [vmem:[%s9133_s1 + $0x2e8] sm:$0xff] }
  0x1f   :  { %3851 = vmatpush1.bf16.msra.mxu1 %v3850_v23  ;;  %3413 = vmatprep.subr.bf16.mxu0 %v3412_v24  ;;  %v131_v9 = vld [vmem:[%s9133_s1 + $0x2d8] sm:$0xff]  ;;  %v3426_v12 = vpack.c.bf16 %v124_v3, %v120_v2  ;;  %v128_v13 = vld [vmem:[%s9133_s1 + $0x2c0] sm:$0xff]  ;;  %v3866_v14 = vpack.c.bf16 %v126_v6, %v122_v4  ;;  %v3428_v15 = vpack.c.bf16 %v133_v8, %v129_v7  ;;  %v130_v17 = vld [vmem:[%s9133_s1 + $0x2d0] sm:$0xff] }
  0x20   :  { %3853 = vmatprep.subr.bf16.mxu1 %v3852_v28  ;;  %v135_v10 = vld [vmem:[%s9133_s1 + $0x2f8] sm:$0xff]  ;;  %v132_v16 = vld [vmem:[%s9133_s1 + $0x2e0] sm:$0xff]  ;;  %v134_v18 = vld [vmem:[%s9133_s1 + $0x2f0] sm:$0xff] }
  0x21   :  { %v3868_v19 = vpack.c.bf16 %v135_v10, %v131_v9  ;;  %v137_v20 = vld [vmem:[%s9133_s1 + $0x308] sm:$0xff]  ;;  %v5179_v22 = vld [vmem:[%s9132_s0] sm:$0xff]  ;;  %v139_v23 = vld [vmem:[%s9133_s1 + $0x318] sm:$0xff]  ;;  %v3430_v26 = vpack.c.bf16 %v132_v16, %v128_v13  ;;  %v3870_v27 = vpack.c.bf16 %v134_v18, %v130_v17 }
  0x22   :  { %3415 = vmatpush1.bf16.msra.mxu0 %v3414_v34  ;;  %v141_v21 = vld [vmem:[%s9133_s1 + $0x328] sm:$0xff]  ;;  %v143_v24 = vld [vmem:[%s9133_s1 + $0x338] sm:$0xff]  ;;  %v5189_v25 = vrot.slane %v5179_v22, %v5156_v11  ;;  %v136_v29 = vld [vmem:[%s9133_s1 + $0x300] sm:$0xff]  ;;  %v950_v8 = vcombine.high %v5179_v22, %v5179_v22 }
  0x23   :  { %3855 = vmatpush1.bf16.msra.mxu1 %v3854_v35  ;;  %3417 = vmatprep.subr.bf16.mxu0 %v3416_v36  ;;  %v3432_v28 = vpack.c.bf16 %v141_v21, %v137_v20  ;;  %v140_v30 = vld [vmem:[%s9133_s1 + $0x320] sm:$0xff]  ;;  %v138_v31 = vld [vmem:[%s9133_s1 + $0x310] sm:$0xff]  ;;  %v3872_v33 = vpack.c.bf16 %v143_v24, %v139_v23  ;;  %v145_v35 = vld [vmem:[%s9133_s1 + $0x348] sm:$0xff] }
  0x24   :  { %3857 = vmatprep.subr.bf16.mxu1 %v3856_v40  ;;  %v965_v32 = vcombine.high %v5189_v25, %v5189_v25  ;;  %v142_v34 = vld [vmem:[%s9133_s1 + $0x330] sm:$0xff]  ;;  %v149_v36 = vld [vmem:[%s9133_s1 + $0x368] sm:$0xff]  ;;  %v147_v37 = vld [vmem:[%s9133_s1 + $0x358] sm:$0xff]  ;;  %v3434_v39 = vpack.c.bf16 %v140_v30, %v136_v29  ;;  %v5310_v24 = vrot.slane %v950_v8, %v5156_v11 }
  0x25   :  { %v151_v38 = vld [vmem:[%s9133_s1 + $0x378] sm:$0xff]  ;;  %v3874_v40 = vpack.c.bf16 %v142_v34, %v138_v31  ;;  %v3436_v41 = vpack.c.bf16 %v149_v36, %v145_v35  ;;  %v144_v42 = vld [vmem:[%s9133_s1 + $0x340] sm:$0xff]  ;;  %v146_v44 = vld [vmem:[%s9133_s1 + $0x350] sm:$0xff] }
  0x26   :  { %3419 = vmatpush1.bf16.msra.mxu0 %v3418_v49  ;;  %1102 = vmatprep.mubr.f32.mxu0 %v965_v32  ;;  %v148_v43 = vld [vmem:[%s9133_s1 + $0x360] sm:$0xff]  ;;  %v3876_v45 = vpack.c.bf16 %v151_v38, %v147_v37  ;;  %v150_v46 = vld [vmem:[%s9133_s1 + $0x370] sm:$0xff]  ;;  %v153_v47 = vld [vmem:[%s9133_s1 + $0x388] sm:$0xff]  ;;  %v966_v38 = vcombine.high %v5310_v24, %v5310_v24 }
  0x27   :  { %3859 = vmatpush1.bf16.msra.mxu1 %v3858_v50  ;;  %3421 = vmatprep.subr.bf16.mxu0 %v3420_v51  ;;  %v157_v48 = vld [vmem:[%s9133_s1 + $0x3a8] sm:$0xff]  ;;  %v155_v49 = vld [vmem:[%s9133_s1 + $0x398] sm:$0xff]  ;;  %v3438_v51 = vpack.c.bf16 %v148_v43, %v144_v42  ;;  %v3878_v52 = vpack.c.bf16 %v150_v46, %v146_v44  ;;  %v152_v54 = vld [vmem:[%s9133_s1 + $0x380] sm:$0xff] }
  0x28   :  { %3861 = vmatprep.subr.bf16.mxu1 %v3860_v55  ;;  %1599 = vmatprep.mubr.f32.mxu1 %v965_v32  ;;  %v159_v50 = vld [vmem:[%s9133_s1 + $0x3b8] sm:$0xff]  ;;  %v3440_v53 = vpack.c.bf16 %v157_v48, %v153_v47  ;;  %v156_v55 = vld [vmem:[%s9133_s1 + $0x3a0] sm:$0xff]  ;;  %v154_v56 = vld [vmem:[%s9133_s1 + $0x390] sm:$0xff] }
  0x29   :  { %v3880_v57 = vpack.c.bf16 %v159_v50, %v155_v49  ;;  %v158_v58 = vld [vmem:[%s9133_s1 + $0x3b0] sm:$0xff]  ;;  %v161_v59 = vld [vmem:[%s9133_s1 + $0x3c8] sm:$0xff]  ;;  %v163_v62 = vld [vmem:[%s9133_s1 + $0x3d8] sm:$0xff] }
  0x2a   :  { %3423 = vmatpush1.bf16.msra.mxu0 %v3422_v63  ;;  %v165_v60 = vld [vmem:[%s9133_s1 + $0x3e8] sm:$0xff]  ;;  %v167_v63 = vld [vmem:[%s9133_s1 + $0x3f8] sm:$0xff]  ;;  %v160_v3 = vld [vmem:[%s9133_s1 + $0x3c0] sm:$0xff] }
  0x2b   :  { %3863 = vmatpush1.bf16.msra.mxu1 %v3862_v0  ;;  %3425 = vmatprep.subr.bf16.mxu0 %v3424_v1  ;;  %v3442_v0 = vpack.c.bf16 %v156_v55, %v152_v54  ;;  %v3882_v1 = vpack.c.bf16 %v158_v58, %v154_v56  ;;  %v3444_v2 = vpack.c.bf16 %v165_v60, %v161_v59  ;;  %v164_v4 = vld [vmem:[%s9133_s1 + $0x3e0] sm:$0xff]  ;;  %v166_v7 = vld [vmem:[%s9133_s1 + $0x3f0] sm:$0xff]  ;;  %v169_v9 = vld [vmem:[%s9133_s1 + $0x408] sm:$0xff] }
  0x2c   :  { %3865 = vmatprep.subr.bf16.mxu1 %v3864_v5  ;;  %v162_v5 = vld [vmem:[%s9133_s1 + $0x3d0] sm:$0xff]  ;;  %v3884_v6 = vpack.c.bf16 %v167_v63, %v163_v62  ;;  %v173_v10 = vld [vmem:[%s9133_s1 + $0x428] sm:$0xff]  ;;  %v175_v13 = vld [vmem:[%s9133_s1 + $0x438] sm:$0xff] }
  0x2d   :  { %v3448_v16 = vpack.c.bf16 %v173_v10, %v169_v9  ;;  %v168_v17 = vld [vmem:[%s9133_s1 + $0x400] sm:$0xff]  ;;  %v174_v21 = vld [vmem:[%s9133_s1 + $0x430] sm:$0xff]  ;;  %v177_v22 = vld [vmem:[%s9133_s1 + $0x448] sm:$0xff] }
  0x2e   :  { %3427 = vmatpush1.bf16.msra.mxu0 %v3426_v12  ;;  %v171_v12 = vld [vmem:[%s9133_s1 + $0x418] sm:$0xff]  ;;  %v172_v18 = vld [vmem:[%s9133_s1 + $0x420] sm:$0xff]  ;;  %v181_v23 = vld [vmem:[%s9133_s1 + $0x468] sm:$0xff] }
  0x2f   :  { %3867 = vmatpush1.bf16.msra.mxu1 %v3866_v14  ;;  %3429 = vmatprep.subr.bf16.mxu0 %v3428_v15  ;;  %v3446_v14 = vpack.c.bf16 %v164_v4, %v160_v3  ;;  %v3886_v15 = vpack.c.bf16 %v166_v7, %v162_v5  ;;  %v3888_v20 = vpack.c.bf16 %v175_v13, %v171_v12  ;;  %v176_v31 = vld [vmem:[%s9133_s1 + $0x440] sm:$0xff]  ;;  %v182_v35 = vld [vmem:[%s9133_s1 + $0x470] sm:$0xff]  ;;  %v185_v36 = vld [vmem:[%s9133_s1 + $0x488] sm:$0xff] }
  0x30   :  { %3869 = vmatprep.subr.bf16.mxu1 %v3868_v19  ;;  %v170_v19 = vld [vmem:[%s9133_s1 + $0x410] sm:$0xff]  ;;  %v3452_v30 = vpack.c.bf16 %v181_v23, %v177_v22  ;;  %v180_v32 = vld [vmem:[%s9133_s1 + $0x460] sm:$0xff]  ;;  %v189_v37 = vld [vmem:[%s9133_s1 + $0x4a8] sm:$0xff] }
  0x31   :  { %v3890_v29 = vpack.c.bf16 %v174_v21, %v170_v19  ;;  %v3456_v43 = vpack.c.bf16 %v189_v37, %v185_v36  ;;  %v184_v44 = vld [vmem:[%s9133_s1 + $0x480] sm:$0xff]  ;;  %v186_v46 = vld [vmem:[%s9133_s1 + $0x490] sm:$0xff]  ;;  %v193_v48 = vld [vmem:[%s9133_s1 + $0x4c8] sm:$0xff] }
  0x32   :  { %3431 = vmatpush1.bf16.msra.mxu0 %v3430_v26  ;;  %v179_v26 = vld [vmem:[%s9133_s1 + $0x458] sm:$0xff]  ;;  %v197_v49 = vld [vmem:[%s9133_s1 + $0x4e8] sm:$0xff]  ;;  %v192_v55 = vld [vmem:[%s9133_s1 + $0x4c0] sm:$0xff] }
  0x33   :  { %3871 = vmatpush1.bf16.msra.mxu1 %v3870_v27  ;;  %3433 = vmatprep.subr.bf16.mxu0 %v3432_v28  ;;  %v183_v27 = vld [vmem:[%s9133_s1 + $0x478] sm:$0xff]  ;;  %v3450_v28 = vpack.c.bf16 %v172_v18, %v168_v17  ;;  %v3460_v54 = vpack.c.bf16 %v197_v49, %v193_v48  ;;  %v196_v56 = vld [vmem:[%s9133_s1 + $0x4e0] sm:$0xff]  ;;  %v198_v59 = vld [vmem:[%s9133_s1 + $0x4f0] sm:$0xff] }
  0x34   :  { %3873 = vmatprep.subr.bf16.mxu1 %v3872_v33  ;;  %v178_v33 = vld [vmem:[%s9133_s1 + $0x450] sm:$0xff]  ;;  %v3892_v34 = vpack.c.bf16 %v183_v27, %v179_v26  ;;  %v195_v50 = vld [vmem:[%s9133_s1 + $0x4d8] sm:$0xff]  ;;  %v201_v60 = vld [vmem:[%s9133_s1 + $0x508] sm:$0xff] }
  0x35   :  { %v3894_v42 = vpack.c.bf16 %v182_v35, %v178_v33  ;;  %v205_v62 = vld [vmem:[%s9133_s1 + $0x528] sm:$0xff]  ;;  %v203_v63 = vld [vmem:[%s9133_s1 + $0x518] sm:$0xff]  ;;  %v200_v4 = vld [vmem:[%s9133_s1 + $0x500] sm:$0xff] }
  0x36   :  { %3435 = vmatpush1.bf16.msra.mxu0 %v3434_v39  ;;  %v187_v39 = vld [vmem:[%s9133_s1 + $0x498] sm:$0xff]  ;;  %v3464_v3 = vpack.c.bf16 %v205_v62, %v201_v60  ;;  %v204_v5 = vld [vmem:[%s9133_s1 + $0x520] sm:$0xff]  ;;  %v206_v8 = vld [vmem:[%s9133_s1 + $0x530] sm:$0xff] }
  0x37   :  { %3875 = vmatpush1.bf16.msra.mxu1 %v3874_v40  ;;  %3437 = vmatprep.subr.bf16.mxu0 %v3436_v41  ;;  %v191_v40 = vld [vmem:[%s9133_s1 + $0x4b8] sm:$0xff]  ;;  %v3454_v41 = vpack.c.bf16 %v180_v32, %v176_v31  ;;  %v209_v9 = vld [vmem:[%s9133_s1 + $0x548] sm:$0xff]  ;;  %v208_v17 = vld [vmem:[%s9133_s1 + $0x540] sm:$0xff] }
  0x38   :  { %3877 = vmatprep.subr.bf16.mxu1 %v3876_v45  ;;  %v188_v45 = vld [vmem:[%s9133_s1 + $0x4a0] sm:$0xff]  ;;  %v3896_v47 = vpack.c.bf16 %v191_v40, %v187_v39  ;;  %v213_v10 = vld [vmem:[%s9133_s1 + $0x568] sm:$0xff]  ;;  %v211_v12 = vld [vmem:[%s9133_s1 + $0x558] sm:$0xff] }
  0x39   :  { %v215_v13 = vld [vmem:[%s9133_s1 + $0x578] sm:$0xff]  ;;  %v212_v18 = vld [vmem:[%s9133_s1 + $0x560] sm:$0xff]  ;;  %v210_v19 = vld [vmem:[%s9133_s1 + $0x550] sm:$0xff] }
  0x3a   :  { %3439 = vmatpush1.bf16.msra.mxu0 %v3438_v51  ;;  %v199_v51 = vld [vmem:[%s9133_s1 + $0x4f8] sm:$0xff]  ;;  %v214_v21 = vld [vmem:[%s9133_s1 + $0x570] sm:$0xff]  ;;  %v217_v22 = vld [vmem:[%s9133_s1 + $0x588] sm:$0xff] }
  0x3b   :  { %3879 = vmatpush1.bf16.msra.mxu1 %v3878_v52  ;;  %3441 = vmatprep.subr.bf16.mxu0 %v3440_v53  ;;  %v3458_v52 = vpack.c.bf16 %v188_v45, %v184_v44  ;;  %v3900_v58 = vpack.c.bf16 %v199_v51, %v195_v50  ;;  %v221_v23 = vld [vmem:[%s9133_s1 + $0x5a8] sm:$0xff]  ;;  %v219_v26 = vld [vmem:[%s9133_s1 + $0x598] sm:$0xff]  ;;  %v216_v31 = vld [vmem:[%s9133_s1 + $0x580] sm:$0xff] }
  0x3c   :  { %3881 = vmatprep.subr.bf16.mxu1 %v3880_v57  ;;  %v194_v57 = vld [vmem:[%s9133_s1 + $0x4d0] sm:$0xff]  ;;  %v223_v27 = vld [vmem:[%s9133_s1 + $0x5b8] sm:$0xff]  ;;  %v220_v32 = vld [vmem:[%s9133_s1 + $0x5a0] sm:$0xff] }
  0x3d   :  { %v218_v33 = vld [vmem:[%s9133_s1 + $0x590] sm:$0xff]  ;;  %v225_v36 = vld [vmem:[%s9133_s1 + $0x5c8] sm:$0xff]  ;;  %v231_v39 = vld [vmem:[%s9133_s1 + $0x5f8] sm:$0xff]  ;;  %v3474_v40 = vpack.c.bf16 %v220_v32, %v216_v31 }
  0x3e   :  { %3443 = vmatpush1.bf16.msra.mxu0 %v3442_v0  ;;  %v207_v0 = vld [vmem:[%s9133_s1 + $0x538] sm:$0xff]  ;;  %v222_v35 = vld [vmem:[%s9133_s1 + $0x5b0] sm:$0xff]  ;;  %v229_v37 = vld [vmem:[%s9133_s1 + $0x5e8] sm:$0xff] }
  0x3f   :  { %3883 = vmatpush1.bf16.msra.mxu1 %v3882_v1  ;;  %3445 = vmatprep.subr.bf16.mxu0 %v3444_v2  ;;  %v3462_v1 = vpack.c.bf16 %v196_v56, %v192_v55  ;;  %v3902_v2 = vpack.c.bf16 %v198_v59, %v194_v57  ;;  %v3904_v7 = vpack.c.bf16 %v207_v0, %v203_v63  ;;  %v228_v44 = vld [vmem:[%s9133_s1 + $0x5e0] sm:$0xff]  ;;  %v226_v45 = vld [vmem:[%s9133_s1 + $0x5d0] sm:$0xff]  ;;  %v237_v48 = vld [vmem:[%s9133_s1 + $0x628] sm:$0xff] }
  0x40   :  { %3885 = vmatprep.subr.bf16.mxu1 %v3884_v6  ;;  %v202_v6 = vld [vmem:[%s9133_s1 + $0x510] sm:$0xff]  ;;  %v235_v49 = vld [vmem:[%s9133_s1 + $0x618] sm:$0xff]  ;;  %v236_v55 = vld [vmem:[%s9133_s1 + $0x620] sm:$0xff] }
  0x41   :  { %v239_v50 = vld [vmem:[%s9133_s1 + $0x638] sm:$0xff]  ;;  %v234_v56 = vld [vmem:[%s9133_s1 + $0x610] sm:$0xff]  ;;  %v241_v59 = vld [vmem:[%s9133_s1 + $0x648] sm:$0xff] }
  0x42   :  { %3447 = vmatpush1.bf16.msra.mxu0 %v3446_v14  ;;  %v3466_v14 = vpack.c.bf16 %v204_v5, %v200_v4  ;;  %v3920_v57 = vpack.c.bf16 %v239_v50, %v235_v49  ;;  %v245_v60 = vld [vmem:[%s9133_s1 + $0x668] sm:$0xff]  ;;  %v243_v62 = vld [vmem:[%s9133_s1 + $0x658] sm:$0xff]  ;;  %v244_v4 = vld [vmem:[%s9133_s1 + $0x660] sm:$0xff] }
  0x43   :  { %3887 = vmatpush1.bf16.msra.mxu1 %v3886_v15  ;;  %3449 = vmatprep.subr.bf16.mxu0 %v3448_v16  ;;  %v3906_v15 = vpack.c.bf16 %v206_v8, %v202_v6  ;;  %v3468_v16 = vpack.c.bf16 %v213_v10, %v209_v9  ;;  %v247_v63 = vld [vmem:[%s9133_s1 + $0x678] sm:$0xff]  ;;  %v242_v5 = vld [vmem:[%s9133_s1 + $0x650] sm:$0xff]  ;;  %v249_v8 = vld [vmem:[%s9133_s1 + $0x688] sm:$0xff] }
  0x44   :  { %3889 = vmatprep.subr.bf16.mxu1 %v3888_v20  ;;  %v3908_v20 = vpack.c.bf16 %v215_v13, %v211_v12  ;;  %v3924_v6 = vpack.c.bf16 %v247_v63, %v243_v62  ;;  %v253_v9 = vld [vmem:[%s9133_s1 + $0x6a8] sm:$0xff]  ;;  %v251_v10 = vld [vmem:[%s9133_s1 + $0x698] sm:$0xff]  ;;  %v260_v31 = vld [vmem:[%s9133_s1 + $0x6e0] sm:$0xff] }
  0x45   :  { %1103 = vmatmul.mubr.f32.vlgmr.msra.gmra.mrb[0].mxu0 %v5189_v25  ;;  %v255_v12 = vld [vmem:[%s9133_s1 + $0x6b8] sm:$0xff]  ;;  %v258_v32 = vld [vmem:[%s9133_s1 + $0x6d0] sm:$0xff] }
  0x46   :  { %3451 = vmatpush1.bf16.msra.mxu0 %v3450_v28  ;;  %1600 = vmatmul.mubr.f32.vlgmr.msra.gmra.mrb[0].mxu1 %v5189_v25  ;;  %v190_v25 = vld [vmem:[%s9133_s1 + $0x4b0] sm:$0xff]  ;;  %v3470_v28 = vpack.c.bf16 %v212_v18, %v208_v17  ;;  %v252_v17 = vld [vmem:[%s9133_s1 + $0x6a0] sm:$0xff]  ;;  %v279_v49 = vld [vmem:[%s9133_s1 + $0x778] sm:$0xff] }
  0x47   :  { %3891 = vmatpush1.bf16.msra.mxu1 %v3890_v29  ;;  %3453 = vmatprep.subr.bf16.mxu0 %v3452_v30  ;;  %v3898_v53 = vpack.c.bf16 %v190_v25, %v186_v46  ;;  %v3910_v29 = vpack.c.bf16 %v214_v21, %v210_v19  ;;  %v3472_v30 = vpack.c.bf16 %v221_v23, %v217_v22  ;;  %v233_v25 = vld [vmem:[%s9133_s1 + $0x608] sm:$0xff]  ;;  %v250_v18 = vld [vmem:[%s9133_s1 + $0x690] sm:$0xff]  ;;  %v259_v23 = vld [vmem:[%s9133_s1 + $0x6d8] sm:$0xff] }
  0x48   :  { %3893 = vmatprep.subr.bf16.mxu1 %v3892_v34  ;;  %1173 = vmatprep.mubr.f32.mxu0 %v966_v38  ;;  %v3912_v34 = vpack.c.bf16 %v223_v27, %v219_v26  ;;  %v3928_v19 = vpack.c.bf16 %v255_v12, %v251_v10  ;;  %v257_v21 = vld [vmem:[%s9133_s1 + $0x6c8] sm:$0xff]  ;;  %v263_v26 = vld [vmem:[%s9133_s1 + $0x6f8] sm:$0xff] }
  0x49   :  { %1670 = vmatprep.mubr.f32.mxu1 %v966_v38  ;;  %v227_v38 = vld [vmem:[%s9133_s1 + $0x5d8] sm:$0xff]  ;;  %v261_v22 = vld [vmem:[%s9133_s1 + $0x6e8] sm:$0xff] }
  0x4a   :  { %3455 = vmatpush1.bf16.msra.mxu0 %v3454_v41  ;;  %v3914_v41 = vpack.c.bf16 %v222_v35, %v218_v33  ;;  %v3916_v46 = vpack.c.bf16 %v231_v39, %v227_v38  ;;  %v3932_v33 = vpack.c.bf16 %v263_v26, %v259_v23  ;;  %v265_v35 = vld [vmem:[%s9133_s1 + $0x708] sm:$0xff]  ;;  %v271_v38 = vld [vmem:[%s9133_s1 + $0x738] sm:$0xff] }
  0x4b   :  { %3895 = vmatpush1.bf16.msra.mxu1 %v3894_v42  ;;  %3457 = vmatprep.subr.bf16.mxu0 %v3456_v43  ;;  %v3476_v42 = vpack.c.bf16 %v229_v37, %v225_v36  ;;  %v224_v43 = vld [vmem:[%s9133_s1 + $0x5c0] sm:$0xff]  ;;  %v269_v36 = vld [vmem:[%s9133_s1 + $0x728] sm:$0xff]  ;;  %v267_v37 = vld [vmem:[%s9133_s1 + $0x718] sm:$0xff] }
  0x4c   :  { %3897 = vmatprep.subr.bf16.mxu1 %v3896_v47  ;;  %v230_v47 = vld [vmem:[%s9133_s1 + $0x5f0] sm:$0xff]  ;;  %v3478_v51 = vpack.c.bf16 %v228_v44, %v224_v43  ;;  %v268_v43 = vld [vmem:[%s9133_s1 + $0x720] sm:$0xff]  ;;  %v287_v62 = vld [vmem:[%s9133_s1 + $0x7b8] sm:$0xff] }
  0x4d   :  { %v266_v44 = vld [vmem:[%s9133_s1 + $0x710] sm:$0xff]  ;;  %v295_v10 = vld [vmem:[%s9133_s1 + $0x7f8] sm:$0xff] }
  0x4e   :  { %3459 = vmatpush1.bf16.msra.mxu0 %v3458_v52  ;;  %v3918_v52 = vpack.c.bf16 %v230_v47, %v226_v45  ;;  %v3936_v45 = vpack.c.bf16 %v271_v38, %v267_v37  ;;  %v273_v47 = vld [vmem:[%s9133_s1 + $0x748] sm:$0xff]  ;;  %v303_v23 = vld [vmem:[%s9133_s1 + $0x838] sm:$0xff] }
  0x4f   :  { %3899 = vmatpush1.bf16.msra.mxu1 %v3898_v53  ;;  %3461 = vmatprep.subr.bf16.mxu0 %v3460_v54  ;;  %v3480_v53 = vpack.c.bf16 %v237_v48, %v233_v25  ;;  %v232_v54 = vld [vmem:[%s9133_s1 + $0x600] sm:$0xff]  ;;  %v277_v25 = vld [vmem:[%s9133_s1 + $0x768] sm:$0xff]  ;;  %v275_v48 = vld [vmem:[%s9133_s1 + $0x758] sm:$0xff] }
  0x50   :  { %3901 = vmatprep.subr.bf16.mxu1 %v3900_v58  ;;  %v238_v58 = vld [vmem:[%s9133_s1 + $0x630] sm:$0xff]  ;;  %v3482_v0 = vpack.c.bf16 %v236_v55, %v232_v54  ;;  %v276_v54 = vld [vmem:[%s9133_s1 + $0x760] sm:$0xff]  ;;  %v311_v37 = vld [vmem:[%s9133_s1 + $0x878] sm:$0xff] }
  0x51   :  { %v274_v55 = vld [vmem:[%s9133_s1 + $0x750] sm:$0xff] }
  0x52   :  { %3463 = vmatpush1.bf16.msra.mxu0 %v3462_v1  ;;  %v3922_v1 = vpack.c.bf16 %v238_v58, %v234_v56  ;;  %v3940_v56 = vpack.c.bf16 %v279_v49, %v275_v48  ;;  %v281_v58 = vld [vmem:[%s9133_s1 + $0x788] sm:$0xff]  ;;  %v315_v49 = vld [vmem:[%s9133_s1 + $0x898] sm:$0xff] }
  0x53   :  { %3903 = vmatpush1.bf16.msra.mxu1 %v3902_v2  ;;  %3465 = vmatprep.subr.bf16.mxu0 %v3464_v3  ;;  %v3484_v2 = vpack.c.bf16 %v245_v60, %v241_v59  ;;  %v240_v3 = vld [vmem:[%s9133_s1 + $0x640] sm:$0xff]  ;;  %v285_v59 = vld [vmem:[%s9133_s1 + $0x7a8] sm:$0xff]  ;;  %v283_v60 = vld [vmem:[%s9133_s1 + $0x798] sm:$0xff] }
  0x54   :  { %3905 = vmatprep.subr.bf16.mxu1 %v3904_v7  ;;  %v246_v7 = vld [vmem:[%s9133_s1 + $0x670] sm:$0xff]  ;;  %v3486_v13 = vpack.c.bf16 %v244_v4, %v240_v3  ;;  %v284_v3 = vld [vmem:[%s9133_s1 + $0x7a0] sm:$0xff]  ;;  %v317_v48 = vld [vmem:[%s9133_s1 + $0x8a8] sm:$0xff] }
  0x55   :  { %v282_v4 = vld [vmem:[%s9133_s1 + $0x790] sm:$0xff] }
  0x56   :  { %3467 = vmatpush1.bf16.msra.mxu0 %v3466_v14  ;;  %v3926_v14 = vpack.c.bf16 %v246_v7, %v242_v5  ;;  %v3944_v5 = vpack.c.bf16 %v287_v62, %v283_v60  ;;  %v289_v7 = vld [vmem:[%s9133_s1 + $0x7c8] sm:$0xff]  ;;  %v323_v62 = vld [vmem:[%s9133_s1 + $0x8d8] sm:$0xff] }
  0x57   :  { %3907 = vmatpush1.bf16.msra.mxu1 %v3906_v15  ;;  %3469 = vmatprep.subr.bf16.mxu0 %v3468_v16  ;;  %v3488_v15 = vpack.c.bf16 %v253_v9, %v249_v8  ;;  %v248_v16 = vld [vmem:[%s9133_s1 + $0x680] sm:$0xff]  ;;  %v293_v8 = vld [vmem:[%s9133_s1 + $0x7e8] sm:$0xff]  ;;  %v291_v9 = vld [vmem:[%s9133_s1 + $0x7d8] sm:$0xff] }
  0x58   :  { %3909 = vmatprep.subr.bf16.mxu1 %v3908_v20  ;;  %v254_v20 = vld [vmem:[%s9133_s1 + $0x6b0] sm:$0xff]  ;;  %v3490_v27 = vpack.c.bf16 %v252_v17, %v248_v16  ;;  %v292_v16 = vld [vmem:[%s9133_s1 + $0x7e0] sm:$0xff]  ;;  %v325_v60 = vld [vmem:[%s9133_s1 + $0x8e8] sm:$0xff] }
  0x59   :  { %v290_v17 = vld [vmem:[%s9133_s1 + $0x7d0] sm:$0xff] }
  0x5a   :  { %3471 = vmatpush1.bf16.msra.mxu0 %v3470_v28  ;;  %v3930_v28 = vpack.c.bf16 %v254_v20, %v250_v18  ;;  %v3948_v18 = vpack.c.bf16 %v295_v10, %v291_v9  ;;  %v297_v20 = vld [vmem:[%s9133_s1 + $0x808] sm:$0xff]  ;;  %v331_v10 = vld [vmem:[%s9133_s1 + $0x918] sm:$0xff] }
  0x5b   :  { %3911 = vmatpush1.bf16.msra.mxu1 %v3910_v29  ;;  %3473 = vmatprep.subr.bf16.mxu0 %v3472_v30  ;;  %v3492_v29 = vpack.c.bf16 %v261_v22, %v257_v21  ;;  %v256_v30 = vld [vmem:[%s9133_s1 + $0x6c0] sm:$0xff]  ;;  %v301_v21 = vld [vmem:[%s9133_s1 + $0x828] sm:$0xff]  ;;  %v299_v22 = vld [vmem:[%s9133_s1 + $0x818] sm:$0xff] }
  0x5c   :  { %3913 = vmatprep.subr.bf16.mxu1 %v3912_v34  ;;  %v262_v34 = vld [vmem:[%s9133_s1 + $0x6f0] sm:$0xff]  ;;  %v3494_v39 = vpack.c.bf16 %v260_v31, %v256_v30  ;;  %v300_v30 = vld [vmem:[%s9133_s1 + $0x820] sm:$0xff]  ;;  %v333_v9 = vld [vmem:[%s9133_s1 + $0x928] sm:$0xff] }
  0x5d   :  { %v298_v31 = vld [vmem:[%s9133_s1 + $0x810] sm:$0xff] }
  0x5e   :  { %3475 = vmatpush1.bf16.msra.mxu0 %v3474_v40  ;;  %v3934_v40 = vpack.c.bf16 %v262_v34, %v258_v32  ;;  %v3952_v32 = vpack.c.bf16 %v303_v23, %v299_v22  ;;  %v305_v34 = vld [vmem:[%s9133_s1 + $0x848] sm:$0xff]  ;;  %v339_v23 = vld [vmem:[%s9133_s1 + $0x958] sm:$0xff] }
  0x5f   :  { %3915 = vmatpush1.bf16.msra.mxu1 %v3914_v41  ;;  %3477 = vmatprep.subr.bf16.mxu0 %v3476_v42  ;;  %v3496_v41 = vpack.c.bf16 %v269_v36, %v265_v35  ;;  %v264_v42 = vld [vmem:[%s9133_s1 + $0x700] sm:$0xff]  ;;  %v309_v35 = vld [vmem:[%s9133_s1 + $0x868] sm:$0xff]  ;;  %v307_v36 = vld [vmem:[%s9133_s1 + $0x858] sm:$0xff] }
  0x60   :  { %3917 = vmatprep.subr.bf16.mxu1 %v3916_v46  ;;  %v270_v46 = vld [vmem:[%s9133_s1 + $0x730] sm:$0xff]  ;;  %v3498_v50 = vpack.c.bf16 %v268_v43, %v264_v42  ;;  %v304_v42 = vld [vmem:[%s9133_s1 + $0x840] sm:$0xff]  ;;  %v341_v22 = vld [vmem:[%s9133_s1 + $0x968] sm:$0xff] }
  0x61   :  { %v308_v43 = vld [vmem:[%s9133_s1 + $0x860] sm:$0xff] }
  0x62   :  { %3479 = vmatpush1.bf16.msra.mxu0 %v3478_v51  ;;  %v3938_v51 = vpack.c.bf16 %v270_v46, %v266_v44  ;;  %v306_v44 = vld [vmem:[%s9133_s1 + $0x850] sm:$0xff]  ;;  %v3956_v46 = vpack.c.bf16 %v311_v37, %v307_v36  ;;  %v349_v36 = vld [vmem:[%s9133_s1 + $0x9a8] sm:$0xff]  ;;  %v347_v37 = vld [vmem:[%s9133_s1 + $0x998] sm:$0xff] }
  0x63   :  { %3919 = vmatpush1.bf16.msra.mxu1 %v3918_v52  ;;  %3481 = vmatprep.subr.bf16.mxu0 %v3480_v53  ;;  %v3500_v52 = vpack.c.bf16 %v277_v25, %v273_v47  ;;  %v272_v53 = vld [vmem:[%s9133_s1 + $0x740] sm:$0xff]  ;;  %v310_v47 = vld [vmem:[%s9133_s1 + $0x870] sm:$0xff]  ;;  %v313_v25 = vld [vmem:[%s9133_s1 + $0x888] sm:$0xff] }
  0x64   :  { %3921 = vmatprep.subr.bf16.mxu1 %v3920_v57  ;;  %v278_v57 = vld [vmem:[%s9133_s1 + $0x770] sm:$0xff]  ;;  %v3502_v63 = vpack.c.bf16 %v276_v54, %v272_v53  ;;  %v3958_v53 = vpack.c.bf16 %v310_v47, %v306_v44  ;;  %v3520_v54 = vpack.c.bf16 %v317_v48, %v313_v25  ;;  %v348_v44 = vld [vmem:[%s9133_s1 + $0x9a0] sm:$0xff]  ;;  %v353_v48 = vld [vmem:[%s9133_s1 + $0x9c8] sm:$0xff] }
  0x65   :  { %v350_v25 = vld [vmem:[%s9133_s1 + $0x9b0] sm:$0xff] }
  0x66   :  { %3483 = vmatpush1.bf16.msra.mxu0 %v3482_v0  ;;  %v3942_v0 = vpack.c.bf16 %v278_v57, %v274_v55  ;;  %v312_v55 = vld [vmem:[%s9133_s1 + $0x880] sm:$0xff]  ;;  %v314_v57 = vld [vmem:[%s9133_s1 + $0x890] sm:$0xff] }
  0x67   :  { %3923 = vmatpush1.bf16.msra.mxu1 %v3922_v1  ;;  %3485 = vmatprep.subr.bf16.mxu0 %v3484_v2  ;;  %v3504_v1 = vpack.c.bf16 %v285_v59, %v281_v58  ;;  %v280_v2 = vld [vmem:[%s9133_s1 + $0x780] sm:$0xff]  ;;  %v321_v59 = vld [vmem:[%s9133_s1 + $0x8c8] sm:$0xff] }
  0x68   :  { %3925 = vmatprep.subr.bf16.mxu1 %v3924_v6  ;;  %v286_v6 = vld [vmem:[%s9133_s1 + $0x7b0] sm:$0xff]  ;;  %v3506_v12 = vpack.c.bf16 %v284_v3, %v280_v2  ;;  %v3524_v2 = vpack.c.bf16 %v325_v60, %v321_v59  ;;  %v320_v3 = vld [vmem:[%s9133_s1 + $0x8c0] sm:$0xff]  ;;  %v361_v59 = vld [vmem:[%s9133_s1 + $0xa08] sm:$0xff] }
  0x69   :  { %v365_v60 = vld [vmem:[%s9133_s1 + $0xa28] sm:$0xff] }
  0x6a   :  { %3487 = vmatpush1.bf16.msra.mxu0 %v3486_v13  ;;  %v3946_v13 = vpack.c.bf16 %v286_v6, %v282_v4  ;;  %v324_v4 = vld [vmem:[%s9133_s1 + $0x8e0] sm:$0xff] }
  0x6b   :  { %3927 = vmatpush1.bf16.msra.mxu1 %v3926_v14  ;;  %3489 = vmatprep.subr.bf16.mxu0 %v3488_v15  ;;  %v3508_v14 = vpack.c.bf16 %v293_v8, %v289_v7  ;;  %v288_v15 = vld [vmem:[%s9133_s1 + $0x7c0] sm:$0xff]  ;;  %v326_v7 = vld [vmem:[%s9133_s1 + $0x8f0] sm:$0xff]  ;;  %v329_v8 = vld [vmem:[%s9133_s1 + $0x908] sm:$0xff] }
  0x6c   :  { %3929 = vmatprep.subr.bf16.mxu1 %v3928_v19  ;;  %v294_v19 = vld [vmem:[%s9133_s1 + $0x7f0] sm:$0xff]  ;;  %v3510_v26 = vpack.c.bf16 %v292_v16, %v288_v15  ;;  %v3528_v15 = vpack.c.bf16 %v333_v9, %v329_v8  ;;  %v328_v16 = vld [vmem:[%s9133_s1 + $0x900] sm:$0xff]  ;;  %v369_v8 = vld [vmem:[%s9133_s1 + $0xa48] sm:$0xff] }
  0x6d   :  { %v373_v9 = vld [vmem:[%s9133_s1 + $0xa68] sm:$0xff] }
  0x6e   :  { %3491 = vmatpush1.bf16.msra.mxu0 %v3490_v27  ;;  %v3950_v27 = vpack.c.bf16 %v294_v19, %v290_v17  ;;  %v332_v17 = vld [vmem:[%s9133_s1 + $0x920] sm:$0xff] }
  0x6f   :  { %3931 = vmatpush1.bf16.msra.mxu1 %v3930_v28  ;;  %3493 = vmatprep.subr.bf16.mxu0 %v3492_v29  ;;  %v3512_v28 = vpack.c.bf16 %v301_v21, %v297_v20  ;;  %v296_v29 = vld [vmem:[%s9133_s1 + $0x800] sm:$0xff]  ;;  %v334_v20 = vld [vmem:[%s9133_s1 + $0x930] sm:$0xff]  ;;  %v337_v21 = vld [vmem:[%s9133_s1 + $0x948] sm:$0xff] }
  0x70   :  { %3933 = vmatprep.subr.bf16.mxu1 %v3932_v33  ;;  %v302_v33 = vld [vmem:[%s9133_s1 + $0x830] sm:$0xff]  ;;  %v3514_v38 = vpack.c.bf16 %v300_v30, %v296_v29  ;;  %v3532_v29 = vpack.c.bf16 %v341_v22, %v337_v21  ;;  %v336_v30 = vld [vmem:[%s9133_s1 + $0x940] sm:$0xff]  ;;  %v377_v21 = vld [vmem:[%s9133_s1 + $0xa88] sm:$0xff] }
  0x71   :  { %v381_v22 = vld [vmem:[%s9133_s1 + $0xaa8] sm:$0xff] }
  0x72   :  { %3495 = vmatpush1.bf16.msra.mxu0 %v3494_v39  ;;  %v5709_v39 = vld [vmem:[%s9132_s0 + $0x8] sm:$0xff] }
  0x73   :  { %3935 = vmatpush1.bf16.msra.mxu1 %v3934_v40  ;;  %3497 = vmatprep.subr.bf16.mxu0 %v3496_v41  ;;  %v3954_v40 = vpack.c.bf16 %v302_v33, %v298_v31  ;;  %v3516_v41 = vpack.c.bf16 %v309_v35, %v305_v34  ;;  %v340_v31 = vld [vmem:[%s9133_s1 + $0x960] sm:$0xff]  ;;  %v342_v34 = vld [vmem:[%s9133_s1 + $0x970] sm:$0xff]  ;;  %v345_v35 = vld [vmem:[%s9133_s1 + $0x988] sm:$0xff] }
  0x74   :  { %3937 = vmatprep.subr.bf16.mxu1 %v3936_v45  ;;  %v5722_v45 = vrot.slane %v5709_v39, %v5156_v11 }
  0x76   :  { %3499 = vmatpush1.bf16.msra.mxu0 %v3498_v50  ;;  %v319_v50 = vld [vmem:[%s9133_s1 + $0x8b8] sm:$0xff] }
  0x77   :  { %3939 = vmatpush1.bf16.msra.mxu1 %v3938_v51  ;;  %3501 = vmatprep.subr.bf16.mxu0 %v3500_v52  ;;  %v982_v51 = vcombine.high %v5722_v45, %v5722_v45  ;;  %v3518_v52 = vpack.c.bf16 %v308_v43, %v304_v42  ;;  %v3960_v58 = vpack.c.bf16 %v319_v50, %v315_v49  ;;  %v344_v43 = vld [vmem:[%s9133_s1 + $0x980] sm:$0xff]  ;;  %v357_v49 = vld [vmem:[%s9133_s1 + $0x9e8] sm:$0xff]  ;;  %v355_v50 = vld [vmem:[%s9133_s1 + $0x9d8] sm:$0xff] }
  0x78   :  { %3941 = vmatprep.subr.bf16.mxu1 %v3940_v56  ;;  %v316_v56 = vld [vmem:[%s9133_s1 + $0x8a0] sm:$0xff]  ;;  %v3536_v42 = vpack.c.bf16 %v349_v36, %v345_v35  ;;  %v385_v35 = vld [vmem:[%s9133_s1 + $0xac8] sm:$0xff] }
  0x79   :  { %v389_v36 = vld [vmem:[%s9133_s1 + $0xae8] sm:$0xff] }
  0x7a   :  { %3503 = vmatpush1.bf16.msra.mxu0 %v3502_v63  ;;  %v327_v63 = vld [vmem:[%s9133_s1 + $0x8f8] sm:$0xff] }
  0x7b   :  { %3943 = vmatpush1.bf16.msra.mxu1 %v3942_v0  ;;  %3505 = vmatprep.subr.bf16.mxu0 %v3504_v1  ;;  %v3522_v0 = vpack.c.bf16 %v316_v56, %v312_v55  ;;  %v3964_v6 = vpack.c.bf16 %v327_v63, %v323_v62  ;;  %v352_v55 = vld [vmem:[%s9133_s1 + $0x9c0] sm:$0xff]  ;;  %v363_v62 = vld [vmem:[%s9133_s1 + $0xa18] sm:$0xff] }
  0x7c   :  { %3945 = vmatprep.subr.bf16.mxu1 %v3944_v5  ;;  %v322_v5 = vld [vmem:[%s9133_s1 + $0x8d0] sm:$0xff]  ;;  %v356_v56 = vld [vmem:[%s9133_s1 + $0x9e0] sm:$0xff]  ;;  %v367_v63 = vld [vmem:[%s9133_s1 + $0xa38] sm:$0xff] }
  0x7e   :  { %3507 = vmatpush1.bf16.msra.mxu0 %v3506_v12  ;;  %v335_v12 = vld [vmem:[%s9133_s1 + $0x938] sm:$0xff] }
  0x7f   :  { %3947 = vmatpush1.bf16.msra.mxu1 %v3946_v13  ;;  %3509 = vmatprep.subr.bf16.mxu0 %v3508_v14  ;;  %v3526_v13 = vpack.c.bf16 %v324_v4, %v320_v3  ;;  %v3966_v14 = vpack.c.bf16 %v326_v7, %v322_v5  ;;  %v3968_v19 = vpack.c.bf16 %v335_v12, %v331_v10  ;;  %v360_v3 = vld [vmem:[%s9133_s1 + $0xa00] sm:$0xff]  ;;  %v362_v5 = vld [vmem:[%s9133_s1 + $0xa10] sm:$0xff]  ;;  %v371_v10 = vld [vmem:[%s9133_s1 + $0xa58] sm:$0xff] }
  0x80   :  { %3949 = vmatprep.subr.bf16.mxu1 %v3948_v18  ;;  %v330_v18 = vld [vmem:[%s9133_s1 + $0x910] sm:$0xff]  ;;  %v364_v4 = vld [vmem:[%s9133_s1 + $0xa20] sm:$0xff]  ;;  %v375_v12 = vld [vmem:[%s9133_s1 + $0xa78] sm:$0xff] }
  0x81   :  { %v366_v7 = vld [vmem:[%s9133_s1 + $0xa30] sm:$0xff] }
  0x82   :  { %3511 = vmatpush1.bf16.msra.mxu0 %v3510_v26  ;;  %v343_v26 = vld [vmem:[%s9133_s1 + $0x978] sm:$0xff] }
  0x83   :  { %3951 = vmatpush1.bf16.msra.mxu1 %v3950_v27  ;;  %3513 = vmatprep.subr.bf16.mxu0 %v3512_v28  ;;  %v3530_v27 = vpack.c.bf16 %v332_v17, %v328_v16  ;;  %v3970_v28 = vpack.c.bf16 %v334_v20, %v330_v18  ;;  %v3972_v33 = vpack.c.bf16 %v343_v26, %v339_v23  ;;  %v368_v16 = vld [vmem:[%s9133_s1 + $0xa40] sm:$0xff]  ;;  %v370_v18 = vld [vmem:[%s9133_s1 + $0xa50] sm:$0xff]  ;;  %v379_v23 = vld [vmem:[%s9133_s1 + $0xa98] sm:$0xff] }
  0x84   :  { %3953 = vmatprep.subr.bf16.mxu1 %v3952_v32  ;;  %v338_v32 = vld [vmem:[%s9133_s1 + $0x950] sm:$0xff]  ;;  %v372_v17 = vld [vmem:[%s9133_s1 + $0xa60] sm:$0xff]  ;;  %v383_v26 = vld [vmem:[%s9133_s1 + $0xab8] sm:$0xff] }
  0x85   :  { %1174 = vmatmul.mubr.f32.vlgmr.msra.gmra.mrb[0].mxu0 %v5310_v24  ;;  %v374_v20 = vld [vmem:[%s9133_s1 + $0xa70] sm:$0xff] }
  0x86   :  { %3515 = vmatpush1.bf16.msra.mxu0 %v3514_v38  ;;  %1671 = vmatmul.mubr.f32.vlgmr.msra.gmra.mrb[0].mxu1 %v5310_v24  ;;  %v318_v24 = vld [vmem:[%s9133_s1 + $0x8b0] sm:$0xff]  ;;  %v351_v38 = vld [vmem:[%s9133_s1 + $0x9b8] sm:$0xff] }
  0x87   :  { %3955 = vmatpush1.bf16.msra.mxu1 %v3954_v40  ;;  %3517 = vmatprep.subr.bf16.mxu0 %v3516_v41  ;;  %v3962_v1 = vpack.c.bf16 %v318_v24, %v314_v57  ;;  %v3534_v40 = vpack.c.bf16 %v340_v31, %v336_v30  ;;  %v3974_v41 = vpack.c.bf16 %v342_v34, %v338_v32  ;;  %v354_v57 = vld [vmem:[%s9133_s1 + $0x9d0] sm:$0xff]  ;;  %v376_v30 = vld [vmem:[%s9133_s1 + $0xa80] sm:$0xff] }
  0x88   :  { %3957 = vmatprep.subr.bf16.mxu1 %v3956_v46  ;;  %1244 = vmatprep.mubr.f32.mxu0 %v982_v51  ;;  %v346_v46 = vld [vmem:[%s9133_s1 + $0x990] sm:$0xff]  ;;  %v3976_v47 = vpack.c.bf16 %v351_v38, %v347_v37  ;;  %v380_v31 = vld [vmem:[%s9133_s1 + $0xaa0] sm:$0xff]  ;;  %v387_v37 = vld [vmem:[%s9133_s1 + $0xad8] sm:$0xff] }
  0x89   :  { %1741 = vmatprep.mubr.f32.mxu1 %v982_v51  ;;  %v359_v51 = vld [vmem:[%s9133_s1 + $0x9f8] sm:$0xff]  ;;  %v358_v24 = vld [vmem:[%s9133_s1 + $0x9f0] sm:$0xff] }
  0x8a   :  { %3519 = vmatpush1.bf16.msra.mxu0 %v3518_v52  ;;  %v3538_v52 = vpack.c.bf16 %v348_v44, %v344_v43  ;;  %v378_v32 = vld [vmem:[%s9133_s1 + $0xa90] sm:$0xff]  ;;  %v391_v38 = vld [vmem:[%s9133_s1 + $0xaf8] sm:$0xff]  ;;  %v384_v43 = vld [vmem:[%s9133_s1 + $0xac0] sm:$0xff] }
  0x8b   :  { %3959 = vmatpush1.bf16.msra.mxu1 %v3958_v53  ;;  %3521 = vmatprep.subr.bf16.mxu0 %v3520_v54  ;;  %v3978_v53 = vpack.c.bf16 %v350_v25, %v346_v46  ;;  %v3540_v54 = vpack.c.bf16 %v357_v49, %v353_v48  ;;  %v382_v34 = vld [vmem:[%s9133_s1 + $0xab0] sm:$0xff]  ;;  %v388_v44 = vld [vmem:[%s9133_s1 + $0xae0] sm:$0xff]  ;;  %v393_v48 = vld [vmem:[%s9133_s1 + $0xb08] sm:$0xff] }
  0x8c   :  { %3961 = vmatprep.subr.bf16.mxu1 %v3960_v58  ;;  %v3980_v58 = vpack.c.bf16 %v359_v51, %v355_v50  ;;  %v386_v46 = vld [vmem:[%s9133_s1 + $0xad0] sm:$0xff]  ;;  %v397_v49 = vld [vmem:[%s9133_s1 + $0xb28] sm:$0xff]  ;;  %v395_v50 = vld [vmem:[%s9133_s1 + $0xb18] sm:$0xff] }
  0x8d   :  { %v390_v25 = vld [vmem:[%s9133_s1 + $0xaf0] sm:$0xff]  ;;  %v399_v51 = vld [vmem:[%s9133_s1 + $0xb38] sm:$0xff] }
  0x8e   :  { %3523 = vmatpush1.bf16.msra.mxu0 %v3522_v0  ;;  %v3542_v0 = vpack.c.bf16 %v356_v56, %v352_v55  ;;  %v392_v55 = vld [vmem:[%s9133_s1 + $0xb00] sm:$0xff] }
  0x8f   :  { %3963 = vmatpush1.bf16.msra.mxu1 %v3962_v1  ;;  %3525 = vmatprep.subr.bf16.mxu0 %v3524_v2  ;;  %v3982_v1 = vpack.c.bf16 %v358_v24, %v354_v57  ;;  %v3544_v2 = vpack.c.bf16 %v365_v60, %v361_v59  ;;  %v396_v56 = vld [vmem:[%s9133_s1 + $0xb20] sm:$0xff]  ;;  %v394_v57 = vld [vmem:[%s9133_s1 + $0xb10] sm:$0xff]  ;;  %v401_v59 = vld [vmem:[%s9133_s1 + $0xb48] sm:$0xff] }
  0x90   :  { %3965 = vmatprep.subr.bf16.mxu1 %v3964_v6  ;;  %v3984_v6 = vpack.c.bf16 %v367_v63, %v363_v62  ;;  %v398_v24 = vld [vmem:[%s9133_s1 + $0xb30] sm:$0xff]  ;;  %v405_v60 = vld [vmem:[%s9133_s1 + $0xb68] sm:$0xff]  ;;  %v403_v62 = vld [vmem:[%s9133_s1 + $0xb58] sm:$0xff] }
  0x91   :  { %v407_v63 = vld [vmem:[%s9133_s1 + $0xb78] sm:$0xff] }
  0x92   :  { %3527 = vmatpush1.bf16.msra.mxu0 %v3526_v13  ;;  %v3546_v13 = vpack.c.bf16 %v364_v4, %v360_v3  ;;  %v400_v3 = vld [vmem:[%s9133_s1 + $0xb40] sm:$0xff] }
  0x93   :  { %3967 = vmatpush1.bf16.msra.mxu1 %v3966_v14  ;;  %3529 = vmatprep.subr.bf16.mxu0 %v3528_v15  ;;  %v3986_v14 = vpack.c.bf16 %v366_v7, %v362_v5  ;;  %v3548_v15 = vpack.c.bf16 %v373_v9, %v369_v8  ;;  %v404_v4 = vld [vmem:[%s9133_s1 + $0xb60] sm:$0xff]  ;;  %v402_v5 = vld [vmem:[%s9133_s1 + $0xb50] sm:$0xff]  ;;  %v409_v8 = vld [vmem:[%s9133_s1 + $0xb88] sm:$0xff] }
  0x94   :  { %3969 = vmatprep.subr.bf16.mxu1 %v3968_v19  ;;  %v3988_v19 = vpack.c.bf16 %v375_v12, %v371_v10  ;;  %v406_v7 = vld [vmem:[%s9133_s1 + $0xb70] sm:$0xff]  ;;  %v413_v9 = vld [vmem:[%s9133_s1 + $0xba8] sm:$0xff]  ;;  %v411_v10 = vld [vmem:[%s9133_s1 + $0xb98] sm:$0xff] }
  0x95   :  { %v415_v12 = vld [vmem:[%s9133_s1 + $0xbb8] sm:$0xff] }
  0x96   :  { %3531 = vmatpush1.bf16.msra.mxu0 %v3530_v27  ;;  %v3550_v27 = vpack.c.bf16 %v372_v17, %v368_v16  ;;  %v408_v16 = vld [vmem:[%s9133_s1 + $0xb80] sm:$0xff] }
  0x97   :  { %3971 = vmatpush1.bf16.msra.mxu1 %v3970_v28  ;;  %3533 = vmatprep.subr.bf16.mxu0 %v3532_v29  ;;  %v3990_v28 = vpack.c.bf16 %v374_v20, %v370_v18  ;;  %v3552_v29 = vpack.c.bf16 %v381_v22, %v377_v21  ;;  %v412_v17 = vld [vmem:[%s9133_s1 + $0xba0] sm:$0xff]  ;;  %v410_v18 = vld [vmem:[%s9133_s1 + $0xb90] sm:$0xff]  ;;  %v417_v21 = vld [vmem:[%s9133_s1 + $0xbc8] sm:$0xff] }
  0x98   :  { %3973 = vmatprep.subr.bf16.mxu1 %v3972_v33  ;;  %v3992_v33 = vpack.c.bf16 %v383_v26, %v379_v23  ;;  %v414_v20 = vld [vmem:[%s9133_s1 + $0xbb0] sm:$0xff]  ;;  %v421_v22 = vld [vmem:[%s9133_s1 + $0xbe8] sm:$0xff]  ;;  %v419_v23 = vld [vmem:[%s9133_s1 + $0xbd8] sm:$0xff] }
  0x99   :  { %v423_v26 = vld [vmem:[%s9133_s1 + $0xbf8] sm:$0xff] }
  0x9a   :  { %3535 = vmatpush1.bf16.msra.mxu0 %v3534_v40  ;;  %v3554_v40 = vpack.c.bf16 %v380_v31, %v376_v30  ;;  %v416_v30 = vld [vmem:[%s9133_s1 + $0xbc0] sm:$0xff] }
  0x9b   :  { %3975 = vmatpush1.bf16.msra.mxu1 %v3974_v41  ;;  %3537 = vmatprep.subr.bf16.mxu0 %v3536_v42  ;;  %v3994_v41 = vpack.c.bf16 %v382_v34, %v378_v32  ;;  %v3556_v42 = vpack.c.bf16 %v389_v36, %v385_v35  ;;  %v420_v31 = vld [vmem:[%s9133_s1 + $0xbe0] sm:$0xff]  ;;  %v418_v32 = vld [vmem:[%s9133_s1 + $0xbd0] sm:$0xff]  ;;  %v425_v35 = vld [vmem:[%s9133_s1 + $0xc08] sm:$0xff] }
  0x9c   :  { %3977 = vmatprep.subr.bf16.mxu1 %v3976_v47  ;;  %v3996_v47 = vpack.c.bf16 %v391_v38, %v387_v37  ;;  %v422_v34 = vld [vmem:[%s9133_s1 + $0xbf0] sm:$0xff]  ;;  %v429_v36 = vld [vmem:[%s9133_s1 + $0xc28] sm:$0xff]  ;;  %v967_v37 = vcombine.high %v5709_v39, %v5709_v39  ;;  %v427_v38 = vld [vmem:[%s9133_s1 + $0xc18] sm:$0xff] }
  0x9d   :  { %v428_v39 = vld [vmem:[%s9133_s1 + $0xc20] sm:$0xff] }
  0x9e   :  { %3539 = vmatpush1.bf16.msra.mxu0 %v3538_v52  ;;  %v3558_v52 = vpack.c.bf16 %v388_v44, %v384_v43  ;;  %v3576_v43 = vpack.c.bf16 %v429_v36, %v425_v35  ;;  %v424_v44 = vld [vmem:[%s9133_s1 + $0xc00] sm:$0xff]  ;;  %v462_v35 = vld [vmem:[%s9133_s1 + $0xd30] sm:$0xff]  ;;  %v465_v36 = vld [vmem:[%s9133_s1 + $0xd48] sm:$0xff] }
  0x9f   :  { %3979 = vmatpush1.bf16.msra.mxu1 %v3978_v53  ;;  %3541 = vmatprep.subr.bf16.mxu0 %v3540_v54  ;;  %v3998_v53 = vpack.c.bf16 %v390_v25, %v386_v46  ;;  %v3560_v54 = vpack.c.bf16 %v397_v49, %v393_v48  ;;  %v426_v46 = vld [vmem:[%s9133_s1 + $0xc10] sm:$0xff]  ;;  %v433_v48 = vld [vmem:[%s9133_s1 + $0xc48] sm:$0xff] }
  0xa0   :  { %3981 = vmatprep.subr.bf16.mxu1 %v3980_v58  ;;  %v4000_v58 = vpack.c.bf16 %v399_v51, %v395_v50  ;;  %v430_v25 = vld [vmem:[%s9133_s1 + $0xc30] sm:$0xff]  ;;  %v437_v49 = vld [vmem:[%s9133_s1 + $0xc68] sm:$0xff]  ;;  %v6100_v50 = vrot.slane %v967_v37, %v5156_v11  ;;  %v435_v51 = vld [vmem:[%s9133_s1 + $0xc58] sm:$0xff] }
  0xa1   :  { %v469_v37 = vld [vmem:[%s9133_s1 + $0xd68] sm:$0xff] }
  0xa2   :  { %3543 = vmatpush1.bf16.msra.mxu0 %v3542_v0  ;;  %v3562_v0 = vpack.c.bf16 %v396_v56, %v392_v55  ;;  %v3580_v55 = vpack.c.bf16 %v437_v49, %v433_v48  ;;  %v432_v56 = vld [vmem:[%s9133_s1 + $0xc40] sm:$0xff]  ;;  %v473_v48 = vld [vmem:[%s9133_s1 + $0xd88] sm:$0xff] }
  0xa3   :  { %3983 = vmatpush1.bf16.msra.mxu1 %v3982_v1  ;;  %3545 = vmatprep.subr.bf16.mxu0 %v3544_v2  ;;  %v4002_v1 = vpack.c.bf16 %v398_v24, %v394_v57  ;;  %v3564_v2 = vpack.c.bf16 %v405_v60, %v401_v59  ;;  %v436_v57 = vld [vmem:[%s9133_s1 + $0xc60] sm:$0xff]  ;;  %v438_v59 = vld [vmem:[%s9133_s1 + $0xc70] sm:$0xff]  ;;  %v441_v60 = vld [vmem:[%s9133_s1 + $0xc88] sm:$0xff] }
  0xa4   :  { %3985 = vmatprep.subr.bf16.mxu1 %v3984_v6  ;;  %v4004_v6 = vpack.c.bf16 %v407_v63, %v403_v62  ;;  %v445_v62 = vld [vmem:[%s9133_s1 + $0xca8] sm:$0xff]  ;;  %v983_v63 = vcombine.high %v6100_v50, %v6100_v50 }
  0xa5   :  { %v477_v49 = vld [vmem:[%s9133_s1 + $0xda8] sm:$0xff] }
  0xa6   :  { %3547 = vmatpush1.bf16.msra.mxu0 %v3546_v13  ;;  %v3566_v13 = vpack.c.bf16 %v404_v4, %v400_v3  ;;  %v3584_v4 = vpack.c.bf16 %v445_v62, %v441_v60  ;;  %v481_v60 = vld [vmem:[%s9133_s1 + $0xdc8] sm:$0xff] }
  0xa7   :  { %3987 = vmatpush1.bf16.msra.mxu1 %v3986_v14  ;;  %3549 = vmatprep.subr.bf16.mxu0 %v3548_v15  ;;  %v4006_v14 = vpack.c.bf16 %v406_v7, %v402_v5  ;;  %v3568_v15 = vpack.c.bf16 %v413_v9, %v409_v8  ;;  %v440_v5 = vld [vmem:[%s9133_s1 + $0xc80] sm:$0xff]  ;;  %v442_v7 = vld [vmem:[%s9133_s1 + $0xc90] sm:$0xff]  ;;  %v449_v9 = vld [vmem:[%s9133_s1 + $0xcc8] sm:$0xff] }
  0xa8   :  { %3989 = vmatprep.subr.bf16.mxu1 %v3988_v19  ;;  %v4008_v19 = vpack.c.bf16 %v415_v12, %v411_v10  ;;  %v453_v10 = vld [vmem:[%s9133_s1 + $0xce8] sm:$0xff]  ;;  %v451_v12 = vld [vmem:[%s9133_s1 + $0xcd8] sm:$0xff] }
  0xa9   :  { %v485_v62 = vld [vmem:[%s9133_s1 + $0xde8] sm:$0xff] }
  0xaa   :  { %3551 = vmatpush1.bf16.msra.mxu0 %v3550_v27  ;;  %v3570_v27 = vpack.c.bf16 %v412_v17, %v408_v16  ;;  %v3588_v16 = vpack.c.bf16 %v453_v10, %v449_v9  ;;  %v448_v17 = vld [vmem:[%s9133_s1 + $0xcc0] sm:$0xff]  ;;  %v493_v9 = vld [vmem:[%s9133_s1 + $0xe28] sm:$0xff]  ;;  %v491_v10 = vld [vmem:[%s9133_s1 + $0xe18] sm:$0xff] }
  0xab   :  { %3991 = vmatpush1.bf16.msra.mxu1 %v3990_v28  ;;  %3553 = vmatprep.subr.bf16.mxu0 %v3552_v29  ;;  %v4010_v28 = vpack.c.bf16 %v414_v20, %v410_v18  ;;  %v3572_v29 = vpack.c.bf16 %v421_v22, %v417_v21  ;;  %v452_v18 = vld [vmem:[%s9133_s1 + $0xce0] sm:$0xff]  ;;  %v454_v21 = vld [vmem:[%s9133_s1 + $0xcf0] sm:$0xff]  ;;  %v457_v22 = vld [vmem:[%s9133_s1 + $0xd08] sm:$0xff] }
  0xac   :  { %3993 = vmatprep.subr.bf16.mxu1 %v3992_v33  ;;  %v4012_v33 = vpack.c.bf16 %v423_v26, %v419_v23  ;;  %v461_v23 = vld [vmem:[%s9133_s1 + $0xd28] sm:$0xff]  ;;  %v459_v26 = vld [vmem:[%s9133_s1 + $0xd18] sm:$0xff] }
  0xae   :  { %3555 = vmatpush1.bf16.msra.mxu0 %v3554_v40  ;;  %v431_v40 = vld [vmem:[%s9133_s1 + $0xc38] sm:$0xff] }
  0xaf   :  { %3995 = vmatpush1.bf16.msra.mxu1 %v3994_v41  ;;  %3557 = vmatprep.subr.bf16.mxu0 %v3556_v42  ;;  %v3574_v41 = vpack.c.bf16 %v420_v31, %v416_v30  ;;  %v4014_v42 = vpack.c.bf16 %v422_v34, %v418_v32  ;;  %v3592_v30 = vpack.c.bf16 %v461_v23, %v457_v22  ;;  %v456_v31 = vld [vmem:[%s9133_s1 + $0xd00] sm:$0xff]  ;;  %v501_v22 = vld [vmem:[%s9133_s1 + $0xe68] sm:$0xff]  ;;  %v499_v23 = vld [vmem:[%s9133_s1 + $0xe58] sm:$0xff] }
  0xb0   :  { %3997 = vmatprep.subr.bf16.mxu1 %v3996_v47  ;;  %v4016_v47 = vpack.c.bf16 %v431_v40, %v427_v38  ;;  %v460_v32 = vld [vmem:[%s9133_s1 + $0xd20] sm:$0xff]  ;;  %v467_v38 = vld [vmem:[%s9133_s1 + $0xd58] sm:$0xff] }
  0xb1   :  { %v471_v40 = vld [vmem:[%s9133_s1 + $0xd78] sm:$0xff] }
  0xb2   :  { %3559 = vmatpush1.bf16.msra.mxu0 %v3558_v52  ;;  %v439_v52 = vld [vmem:[%s9133_s1 + $0xc78] sm:$0xff] }
  0xb3   :  { %3999 = vmatpush1.bf16.msra.mxu1 %v3998_v53  ;;  %3561 = vmatprep.subr.bf16.mxu0 %v3560_v54  ;;  %v3578_v53 = vpack.c.bf16 %v428_v39, %v424_v44  ;;  %v4018_v54 = vpack.c.bf16 %v430_v25, %v426_v46  ;;  %v4020_v24 = vpack.c.bf16 %v439_v52, %v435_v51  ;;  %v464_v44 = vld [vmem:[%s9133_s1 + $0xd40] sm:$0xff]  ;;  %v466_v46 = vld [vmem:[%s9133_s1 + $0xd50] sm:$0xff]  ;;  %v475_v51 = vld [vmem:[%s9133_s1 + $0xd98] sm:$0xff] }
  0xb4   :  { %4001 = vmatprep.subr.bf16.mxu1 %v4000_v58  ;;  %v434_v58 = vld [vmem:[%s9133_s1 + $0xc50] sm:$0xff]  ;;  %v468_v39 = vld [vmem:[%s9133_s1 + $0xd60] sm:$0xff]  ;;  %v479_v52 = vld [vmem:[%s9133_s1 + $0xdb8] sm:$0xff] }
  0xb5   :  { %v4022_v3 = vpack.c.bf16 %v438_v59, %v434_v58  ;;  %v470_v25 = vld [vmem:[%s9133_s1 + $0xd70] sm:$0xff] }
  0xb6   :  { %3563 = vmatpush1.bf16.msra.mxu0 %v3562_v0  ;;  %v443_v0 = vld [vmem:[%s9133_s1 + $0xc98] sm:$0xff]  ;;  %v474_v58 = vld [vmem:[%s9133_s1 + $0xd90] sm:$0xff] }
  0xb7   :  { %4003 = vmatpush1.bf16.msra.mxu1 %v4002_v1  ;;  %3565 = vmatprep.subr.bf16.mxu0 %v3564_v2  ;;  %v447_v1 = vld [vmem:[%s9133_s1 + $0xcb8] sm:$0xff]  ;;  %v3582_v2 = vpack.c.bf16 %v436_v57, %v432_v56  ;;  %v472_v56 = vld [vmem:[%s9133_s1 + $0xd80] sm:$0xff]  ;;  %v478_v59 = vld [vmem:[%s9133_s1 + $0xdb0] sm:$0xff] }
  0xb8   :  { %4005 = vmatprep.subr.bf16.mxu1 %v4004_v6  ;;  %v444_v6 = vld [vmem:[%s9133_s1 + $0xca0] sm:$0xff]  ;;  %v4024_v8 = vpack.c.bf16 %v447_v1, %v443_v0  ;;  %v487_v0 = vld [vmem:[%s9133_s1 + $0xdf8] sm:$0xff] }
  0xb9   :  { %v476_v57 = vld [vmem:[%s9133_s1 + $0xda0] sm:$0xff] }
  0xba   :  { %3567 = vmatpush1.bf16.msra.mxu0 %v3566_v13  ;;  %v455_v13 = vld [vmem:[%s9133_s1 + $0xcf8] sm:$0xff]  ;;  %v3602_v1 = vpack.c.bf16 %v476_v57, %v472_v56  ;;  %v516_v56 = vld [vmem:[%s9133_s1 + $0xee0] sm:$0xff]  ;;  %v514_v57 = vld [vmem:[%s9133_s1 + $0xed0] sm:$0xff] }
  0xbb   :  { %4007 = vmatpush1.bf16.msra.mxu1 %v4006_v14  ;;  %3569 = vmatprep.subr.bf16.mxu0 %v3568_v15  ;;  %v3586_v14 = vpack.c.bf16 %v444_v6, %v440_v5  ;;  %v4028_v20 = vpack.c.bf16 %v455_v13, %v451_v12  ;;  %v484_v5 = vld [vmem:[%s9133_s1 + $0xde0] sm:$0xff]  ;;  %v482_v6 = vld [vmem:[%s9133_s1 + $0xdd0] sm:$0xff]  ;;  %v495_v12 = vld [vmem:[%s9133_s1 + $0xe38] sm:$0xff] }
  0xbc   :  { %4009 = vmatprep.subr.bf16.mxu1 %v4008_v19  ;;  %v450_v19 = vld [vmem:[%s9133_s1 + $0xcd0] sm:$0xff] }
  0xbe   :  { %3571 = vmatpush1.bf16.msra.mxu0 %v3570_v27  ;;  %v463_v27 = vld [vmem:[%s9133_s1 + $0xd38] sm:$0xff] }
  0xbf   :  { %4011 = vmatpush1.bf16.msra.mxu1 %v4010_v28  ;;  %3573 = vmatprep.subr.bf16.mxu0 %v3572_v29  ;;  %v3590_v28 = vpack.c.bf16 %v452_v18, %v448_v17  ;;  %v4030_v29 = vpack.c.bf16 %v454_v21, %v450_v19  ;;  %v4032_v34 = vpack.c.bf16 %v463_v27, %v459_v26  ;;  %v492_v17 = vld [vmem:[%s9133_s1 + $0xe20] sm:$0xff]  ;;  %v490_v18 = vld [vmem:[%s9133_s1 + $0xe10] sm:$0xff]  ;;  %v497_v21 = vld [vmem:[%s9133_s1 + $0xe48] sm:$0xff] }
  0xc0   :  { %4013 = vmatprep.subr.bf16.mxu1 %v4012_v33  ;;  %v458_v33 = vld [vmem:[%s9133_s1 + $0xd10] sm:$0xff]  ;;  %v4048_v19 = vpack.c.bf16 %v495_v12, %v491_v10  ;;  %v503_v26 = vld [vmem:[%s9133_s1 + $0xe78] sm:$0xff] }
  0xc1   :  { %v535_v10 = vld [vmem:[%s9133_s1 + $0xf78] sm:$0xff] }
  0xc2   :  { %3575 = vmatpush1.bf16.msra.mxu0 %v3574_v41  ;;  %v3594_v41 = vpack.c.bf16 %v460_v32, %v456_v31  ;;  %v500_v31 = vld [vmem:[%s9133_s1 + $0xe60] sm:$0xff]  ;;  %v498_v32 = vld [vmem:[%s9133_s1 + $0xe50] sm:$0xff] }
  0xc3   :  { %4015 = vmatpush1.bf16.msra.mxu1 %v4014_v42  ;;  %3577 = vmatprep.subr.bf16.mxu0 %v3576_v43  ;;  %v4034_v42 = vpack.c.bf16 %v462_v35, %v458_v33  ;;  %v3596_v43 = vpack.c.bf16 %v469_v37, %v465_v36  ;;  %v4052_v33 = vpack.c.bf16 %v503_v26, %v499_v23  ;;  %v505_v35 = vld [vmem:[%s9133_s1 + $0xe88] sm:$0xff]  ;;  %v507_v37 = vld [vmem:[%s9133_s1 + $0xe98] sm:$0xff] }
  0xc4   :  { %4017 = vmatprep.subr.bf16.mxu1 %v4016_v47  ;;  %v4036_v47 = vpack.c.bf16 %v471_v40, %v467_v38  ;;  %v509_v36 = vld [vmem:[%s9133_s1 + $0xea8] sm:$0xff]  ;;  %v511_v38 = vld [vmem:[%s9133_s1 + $0xeb8] sm:$0xff] }
  0xc5   :  { %1245 = vmatmul.mubr.f32.vlgmr.msra.gmra.mrb[0].mxu0 %v5722_v45  ;;  %v543_v23 = vld [vmem:[%s9133_s1 + $0xfb8] sm:$0xff] }
  0xc6   :  { %3579 = vmatpush1.bf16.msra.mxu0 %v3578_v53  ;;  %1742 = vmatmul.mubr.f32.vlgmr.msra.gmra.mrb[0].mxu1 %v5722_v45  ;;  %v446_v45 = vld [vmem:[%s9133_s1 + $0xcb0] sm:$0xff]  ;;  %v3598_v53 = vpack.c.bf16 %v468_v39, %v464_v44  ;;  %v508_v44 = vld [vmem:[%s9133_s1 + $0xea0] sm:$0xff] }
  0xc7   :  { %4019 = vmatpush1.bf16.msra.mxu1 %v4018_v54  ;;  %3581 = vmatprep.subr.bf16.mxu0 %v3580_v55  ;;  %v4026_v15 = vpack.c.bf16 %v446_v45, %v442_v7  ;;  %v4038_v54 = vpack.c.bf16 %v470_v25, %v466_v46  ;;  %v3600_v55 = vpack.c.bf16 %v477_v49, %v473_v48  ;;  %v489_v45 = vld [vmem:[%s9133_s1 + $0xe08] sm:$0xff]  ;;  %v506_v39 = vld [vmem:[%s9133_s1 + $0xe90] sm:$0xff]  ;;  %v515_v49 = vld [vmem:[%s9133_s1 + $0xed8] sm:$0xff] }
  0xc8   :  { %4021 = vmatprep.subr.bf16.mxu1 %v4020_v24  ;;  %1315 = vmatprep.mubr.f32.mxu0 %v983_v63  ;;  %v4040_v24 = vpack.c.bf16 %v479_v52, %v475_v51  ;;  %v4056_v46 = vpack.c.bf16 %v511_v38, %v507_v37  ;;  %v513_v25 = vld [vmem:[%s9133_s1 + $0xec8] sm:$0xff]  ;;  %v519_v51 = vld [vmem:[%s9133_s1 + $0xef8] sm:$0xff] }
  0xc9   :  { %1812 = vmatprep.mubr.f32.mxu1 %v983_v63  ;;  %v483_v63 = vld [vmem:[%s9133_s1 + $0xdd8] sm:$0xff]  ;;  %v517_v48 = vld [vmem:[%s9133_s1 + $0xee8] sm:$0xff] }
  0xca   :  { %3583 = vmatpush1.bf16.msra.mxu0 %v3582_v2  ;;  %v4042_v2 = vpack.c.bf16 %v478_v59, %v474_v58  ;;  %v4044_v7 = vpack.c.bf16 %v487_v0, %v483_v63  ;;  %v4060_v58 = vpack.c.bf16 %v519_v51, %v515_v49  ;;  %v521_v59 = vld [vmem:[%s9133_s1 + $0xf08] sm:$0xff]  ;;  %v527_v63 = vld [vmem:[%s9133_s1 + $0xf38] sm:$0xff]  ;;  %v6475_v51 = vld [vmem:[%s9132_s0 + $0x10] sm:$0xff] }
  0xcb   :  { %4023 = vmatpush1.bf16.msra.mxu1 %v4022_v3  ;;  %3585 = vmatprep.subr.bf16.mxu0 %v3584_v4  ;;  %v3604_v3 = vpack.c.bf16 %v485_v62, %v481_v60  ;;  %v480_v4 = vld [vmem:[%s9133_s1 + $0xdc0] sm:$0xff]  ;;  %v525_v60 = vld [vmem:[%s9133_s1 + $0xf28] sm:$0xff]  ;;  %v523_v62 = vld [vmem:[%s9133_s1 + $0xf18] sm:$0xff] }
  0xcc   :  { %4025 = vmatprep.subr.bf16.mxu1 %v4024_v8  ;;  %v486_v8 = vld [vmem:[%s9133_s1 + $0xdf0] sm:$0xff]  ;;  %v3606_v13 = vpack.c.bf16 %v484_v5, %v480_v4  ;;  %v524_v4 = vld [vmem:[%s9133_s1 + $0xf20] sm:$0xff]  ;;  %v551_v37 = vld [vmem:[%s9133_s1 + $0xff8] sm:$0xff] }
  0xcd   :  { %v522_v5 = vld [vmem:[%s9133_s1 + $0xf10] sm:$0xff]  ;;  %v559_v49 = vld [vmem:[%s9133_s1 + $0x1038] sm:$0xff] }
  0xce   :  { %3587 = vmatpush1.bf16.msra.mxu0 %v3586_v14  ;;  %v4046_v14 = vpack.c.bf16 %v486_v8, %v482_v6  ;;  %v4064_v6 = vpack.c.bf16 %v527_v63, %v523_v62  ;;  %v529_v8 = vld [vmem:[%s9133_s1 + $0xf48] sm:$0xff]  ;;  %v6497_v62 = vrot.slane %v6475_v51, %v5156_v11  ;;  %v563_v63 = vld [vmem:[%s9133_s1 + $0x1058] sm:$0xff] }
  0xcf   :  { %4027 = vmatpush1.bf16.msra.mxu1 %v4026_v15  ;;  %3589 = vmatprep.subr.bf16.mxu0 %v3588_v16  ;;  %v3608_v15 = vpack.c.bf16 %v493_v9, %v489_v45  ;;  %v488_v16 = vld [vmem:[%s9133_s1 + $0xe00] sm:$0xff]  ;;  %v533_v45 = vld [vmem:[%s9133_s1 + $0xf68] sm:$0xff]  ;;  %v531_v9 = vld [vmem:[%s9133_s1 + $0xf58] sm:$0xff] }
  0xd0   :  { %4029 = vmatprep.subr.bf16.mxu1 %v4028_v20  ;;  %v494_v20 = vld [vmem:[%s9133_s1 + $0xe30] sm:$0xff]  ;;  %v3610_v27 = vpack.c.bf16 %v492_v17, %v488_v16  ;;  %v532_v16 = vld [vmem:[%s9133_s1 + $0xf60] sm:$0xff] }
  0xd1   :  { %v530_v17 = vld [vmem:[%s9133_s1 + $0xf50] sm:$0xff] }
  0xd2   :  { %3591 = vmatpush1.bf16.msra.mxu0 %v3590_v28  ;;  %v4050_v28 = vpack.c.bf16 %v494_v20, %v490_v18  ;;  %v4068_v18 = vpack.c.bf16 %v535_v10, %v531_v9  ;;  %v537_v20 = vld [vmem:[%s9133_s1 + $0xf88] sm:$0xff]  ;;  %v999_v10 = vcombine.high %v6497_v62, %v6497_v62 }
  0xd3   :  { %4031 = vmatpush1.bf16.msra.mxu1 %v4030_v29  ;;  %3593 = vmatprep.subr.bf16.mxu0 %v3592_v30  ;;  %v3612_v29 = vpack.c.bf16 %v501_v22, %v497_v21  ;;  %v496_v30 = vld [vmem:[%s9133_s1 + $0xe40] sm:$0xff]  ;;  %v541_v21 = vld [vmem:[%s9133_s1 + $0xfa8] sm:$0xff]  ;;  %v539_v22 = vld [vmem:[%s9133_s1 + $0xf98] sm:$0xff] }
  0xd4   :  { %4033 = vmatprep.subr.bf16.mxu1 %v4032_v34  ;;  %v502_v34 = vld [vmem:[%s9133_s1 + $0xe70] sm:$0xff]  ;;  %v3614_v40 = vpack.c.bf16 %v500_v31, %v496_v30  ;;  %v540_v30 = vld [vmem:[%s9133_s1 + $0xfa0] sm:$0xff]  ;;  %v573_v9 = vld [vmem:[%s9133_s1 + $0x10a8] sm:$0xff] }
  0xd5   :  { %v538_v31 = vld [vmem:[%s9133_s1 + $0xf90] sm:$0xff] }
  0xd6   :  { %3595 = vmatpush1.bf16.msra.mxu0 %v3594_v41  ;;  %v4054_v41 = vpack.c.bf16 %v502_v34, %v498_v32  ;;  %v4072_v32 = vpack.c.bf16 %v543_v23, %v539_v22  ;;  %v545_v34 = vld [vmem:[%s9133_s1 + $0xfc8] sm:$0xff] }
  0xd7   :  { %4035 = vmatpush1.bf16.msra.mxu1 %v4034_v42  ;;  %3597 = vmatprep.subr.bf16.mxu0 %v3596_v43  ;;  %v3616_v42 = vpack.c.bf16 %v509_v36, %v505_v35  ;;  %v504_v43 = vld [vmem:[%s9133_s1 + $0xe80] sm:$0xff]  ;;  %v549_v35 = vld [vmem:[%s9133_s1 + $0xfe8] sm:$0xff]  ;;  %v547_v36 = vld [vmem:[%s9133_s1 + $0xfd8] sm:$0xff] }
  0xd8   :  { %4037 = vmatprep.subr.bf16.mxu1 %v4036_v47  ;;  %v510_v47 = vld [vmem:[%s9133_s1 + $0xeb0] sm:$0xff]  ;;  %v3618_v52 = vpack.c.bf16 %v508_v44, %v504_v43  ;;  %v548_v43 = vld [vmem:[%s9133_s1 + $0xfe0] sm:$0xff] }
  0xd9   :  { %v546_v44 = vld [vmem:[%s9133_s1 + $0xfd0] sm:$0xff] }
  0xda   :  { %3599 = vmatpush1.bf16.msra.mxu0 %v3598_v53  ;;  %v4058_v53 = vpack.c.bf16 %v510_v47, %v506_v39  ;;  %v4076_v39 = vpack.c.bf16 %v551_v37, %v547_v36  ;;  %v553_v47 = vld [vmem:[%s9133_s1 + $0x1008] sm:$0xff] }
  0xdb   :  { %4039 = vmatpush1.bf16.msra.mxu1 %v4038_v54  ;;  %3601 = vmatprep.subr.bf16.mxu0 %v3600_v55  ;;  %v3620_v54 = vpack.c.bf16 %v517_v48, %v513_v25  ;;  %v512_v55 = vld [vmem:[%s9133_s1 + $0xec0] sm:$0xff]  ;;  %v557_v25 = vld [vmem:[%s9133_s1 + $0x1028] sm:$0xff]  ;;  %v555_v48 = vld [vmem:[%s9133_s1 + $0x1018] sm:$0xff] }
  0xdc   :  { %4041 = vmatprep.subr.bf16.mxu1 %v4040_v24  ;;  %v518_v24 = vld [vmem:[%s9133_s1 + $0xef0] sm:$0xff]  ;;  %v3622_v0 = vpack.c.bf16 %v516_v56, %v512_v55  ;;  %v552_v55 = vld [vmem:[%s9133_s1 + $0x1000] sm:$0xff] }
  0xdd   :  { %v556_v56 = vld [vmem:[%s9133_s1 + $0x1020] sm:$0xff] }
  0xde   :  { %3603 = vmatpush1.bf16.msra.mxu0 %v3602_v1  ;;  %v4062_v1 = vpack.c.bf16 %v518_v24, %v514_v57  ;;  %v554_v57 = vld [vmem:[%s9133_s1 + $0x1010] sm:$0xff] }
  0xdf   :  { %4043 = vmatpush1.bf16.msra.mxu1 %v4042_v2  ;;  %3605 = vmatprep.subr.bf16.mxu0 %v3604_v3  ;;  %v3624_v2 = vpack.c.bf16 %v525_v60, %v521_v59  ;;  %v520_v3 = vld [vmem:[%s9133_s1 + $0xf00] sm:$0xff]  ;;  %v558_v24 = vld [vmem:[%s9133_s1 + $0x1030] sm:$0xff]  ;;  %v561_v59 = vld [vmem:[%s9133_s1 + $0x1048] sm:$0xff] }
  0xe0   :  { %4045 = vmatprep.subr.bf16.mxu1 %v4044_v7  ;;  %v526_v7 = vld [vmem:[%s9133_s1 + $0xf30] sm:$0xff]  ;;  %v3626_v12 = vpack.c.bf16 %v524_v4, %v520_v3  ;;  %v565_v60 = vld [vmem:[%s9133_s1 + $0x1068] sm:$0xff]  ;;  %v560_v4 = vld [vmem:[%s9133_s1 + $0x1040] sm:$0xff] }
  0xe1   :  { %v3644_v3 = vpack.c.bf16 %v565_v60, %v561_v59 }
  0xe2   :  { %3607 = vmatpush1.bf16.msra.mxu0 %v3606_v13  ;;  %v4066_v13 = vpack.c.bf16 %v526_v7, %v522_v5  ;;  %v564_v5 = vld [vmem:[%s9133_s1 + $0x1060] sm:$0xff] }
  0xe3   :  { %4047 = vmatpush1.bf16.msra.mxu1 %v4046_v14  ;;  %3609 = vmatprep.subr.bf16.mxu0 %v3608_v15  ;;  %v3628_v14 = vpack.c.bf16 %v533_v45, %v529_v8  ;;  %v528_v15 = vld [vmem:[%s9133_s1 + $0xf40] sm:$0xff]  ;;  %v566_v8 = vld [vmem:[%s9133_s1 + $0x1070] sm:$0xff]  ;;  %v569_v45 = vld [vmem:[%s9133_s1 + $0x1088] sm:$0xff] }
  0xe4   :  { %4049 = vmatprep.subr.bf16.mxu1 %v4048_v19  ;;  %v534_v19 = vld [vmem:[%s9133_s1 + $0xf70] sm:$0xff]  ;;  %v3630_v26 = vpack.c.bf16 %v532_v16, %v528_v15 }
  0xe6   :  { %3611 = vmatpush1.bf16.msra.mxu0 %v3610_v27  ;;  %v4070_v27 = vpack.c.bf16 %v534_v19, %v530_v17 }
  0xe7   :  { %4051 = vmatpush1.bf16.msra.mxu1 %v4050_v28  ;;  %3613 = vmatprep.subr.bf16.mxu0 %v3612_v29  ;;  %v3632_v28 = vpack.c.bf16 %v541_v21, %v537_v20  ;;  %v536_v29 = vld [vmem:[%s9133_s1 + $0xf80] sm:$0xff] }
  0xe8   :  { %4053 = vmatprep.subr.bf16.mxu1 %v4052_v33  ;;  %v542_v33 = vld [vmem:[%s9133_s1 + $0xfb0] sm:$0xff]  ;;  %v3634_v38 = vpack.c.bf16 %v540_v30, %v536_v29 }
  0xea   :  { %3615 = vmatpush1.bf16.msra.mxu0 %v3614_v40  ;;  %v4074_v40 = vpack.c.bf16 %v542_v33, %v538_v31 }
  0xeb   :  { %4055 = vmatpush1.bf16.msra.mxu1 %v4054_v41  ;;  %3617 = vmatprep.subr.bf16.mxu0 %v3616_v42  ;;  %v3636_v41 = vpack.c.bf16 %v549_v35, %v545_v34  ;;  %v544_v42 = vld [vmem:[%s9133_s1 + $0xfc0] sm:$0xff] }
  0xec   :  { %4057 = vmatprep.subr.bf16.mxu1 %v4056_v46  ;;  %v550_v46 = vld [vmem:[%s9133_s1 + $0xff0] sm:$0xff] }
  0xee   :  { %3619 = vmatpush1.bf16.msra.mxu0 %v3618_v52  ;;  %v3638_v52 = vpack.c.bf16 %v548_v43, %v544_v42 }
  0xef   :  { %4059 = vmatpush1.bf16.msra.mxu1 %v4058_v53  ;;  %3621 = vmatprep.subr.bf16.mxu0 %v3620_v54  ;;  %v4078_v53 = vpack.c.bf16 %v550_v46, %v546_v44  ;;  %v3640_v54 = vpack.c.bf16 %v557_v25, %v553_v47 }
  0xf0   :  { %4061 = vmatprep.subr.bf16.mxu1 %v4060_v58  ;;  %v4080_v58 = vpack.c.bf16 %v559_v49, %v555_v48 }
  0xf2   :  { %3623 = vmatpush1.bf16.msra.mxu0 %v3622_v0  ;;  %v567_v0 = vld [vmem:[%s9133_s1 + $0x1078] sm:$0xff] }
  0xf3   :  { %4063 = vmatpush1.bf16.msra.mxu1 %v4062_v1  ;;  %3625 = vmatprep.subr.bf16.mxu0 %v3624_v2  ;;  %v3642_v1 = vpack.c.bf16 %v556_v56, %v552_v55  ;;  %v4082_v2 = vpack.c.bf16 %v558_v24, %v554_v57  ;;  %v4084_v7 = vpack.c.bf16 %v567_v0, %v563_v63 }
  0xf4   :  { %4065 = vmatprep.subr.bf16.mxu1 %v4064_v6  ;;  %v562_v6 = vld [vmem:[%s9133_s1 + $0x1050] sm:$0xff] }
  0xf6   :  { %3627 = vmatpush1.bf16.msra.mxu0 %v3626_v12  ;;  %v571_v12 = vld [vmem:[%s9133_s1 + $0x1098] sm:$0xff] }
  0xf7   :  { %4067 = vmatpush1.bf16.msra.mxu1 %v4066_v13  ;;  %3629 = vmatprep.subr.bf16.mxu0 %v3628_v14  ;;  %v575_v13 = vld [vmem:[%s9133_s1 + $0x10b8] sm:$0xff] }
  0xf8   :  { %4069 = vmatprep.subr.bf16.mxu1 %v4068_v18 }
  0xfa   :  { %3631 = vmatpush1.bf16.msra.mxu0 %v3630_v26 }
  0xfb   :  { %4071 = vmatpush1.bf16.msra.mxu1 %v4070_v27  ;;  %3633 = vmatprep.subr.bf16.mxu0 %v3632_v28 }
  0xfc   :  { %4073 = vmatprep.subr.bf16.mxu1 %v4072_v32 }
  0xfe   :  { %3635 = vmatpush1.bf16.msra.mxu0 %v3634_v38 }
  0xff   :  { %4075 = vmatpush1.bf16.msra.mxu1 %v4074_v40  ;;  %3637 = vmatprep.subr.bf16.mxu0 %v3636_v41 }
 0x100   :  { %4077 = vmatprep.subr.bf16.mxu1 %v4076_v39 }
 0x102   :  { %3639 = vmatpush1.bf16.msra.mxu0 %v3638_v52 }
 0x103   :  { %4079 = vmatpush1.bf16.msra.mxu1 %v4078_v53  ;;  %3641 = vmatprep.subr.bf16.mxu0 %v3640_v54 }
 0x104   :  { %4081 = vmatprep.subr.bf16.mxu1 %v4080_v58 }
 0x105   :  { %1316 = vmatmul.mubr.f32.vlgmr.msra.gmra.mrb[0].mxu0 %v6100_v50 }
 0x106   :  { %15 = vsyncpa [#allocation3], 0  ;;  %3643 = vmatpush1.bf16.msra.mxu0 %v3642_v1  ;;  %1813 = vmatmul.mubr.f32.vlgmr.msra.gmra.mrb[0].mxu1 %v6100_v50  ;;  %v3646_v14 = vpack.c.bf16 %v564_v5, %v560_v4  ;;  %v4086_v15 = vpack.c.bf16 %v566_v8, %v562_v6  ;;  %v3648_v16 = vpack.c.bf16 %v573_v9, %v569_v45  ;;  %v568_v17 = vld [vmem:[%s9133_s1 + $0x1080] sm:$0xff]  ;;  %v570_v19 = vld [vmem:[%s9133_s1 + $0x1090] sm:$0xff]  ;;  %vm1022_vm0 = vcmask 818176  }
 0x107   :  { %4083 = vmatpush1.bf16.msra.mxu1 %v4082_v2  ;;  %3645 = vmatprep.subr.bf16.mxu0 %v3644_v3  ;;  %v572_v18 = vld [vmem:[%s9133_s1 + $0x10a0] sm:$0xff]  ;;  %v4088_v20 = vpack.c.bf16 %v575_v13, %v571_v12  ;;  %v574_v50 = vld [vmem:[%s9133_s1 + $0x10b0] sm:$0xff]  ;;  %v577_v21 = vld [vmem:[%s9133_s1 + $0x10c8] sm:$0xff]  ;;  %vm1025_vm1 = vcmask 1043456   ;;  %vm2330_vm2 = vcmask 64512   ;;  %vm3177_vm3 = vcmask 130048  }
 0x108   :  { %4085 = vmatprep.subr.bf16.mxu1 %v4084_v7  ;;  %v581_v22 = vld [vmem:[%s9133_s1 + $0x10e8] sm:$0xff]  ;;  %1386 = vmatprep.mubr.f32.mxu0 %v999_v10  ;;  %v579_v23 = vld [vmem:[%s9133_s1 + $0x10d8] sm:$0xff]  ;;  %v3650_v27 = vpack.c.bf16 %v572_v18, %v568_v17  ;;  %v4090_v28 = vpack.c.bf16 %v574_v50, %v570_v19  ;;  %v576_v30 = vld [vmem:[%s9133_s1 + $0x10c0] sm:$0xff]  ;;  %vm4819_vm4 = vmmov 0   ;;  %vm3263_vm5 = vcmask 261120  }
 0x109   :  { %v583_v26 = vld [vmem:[%s9133_s1 + $0x10f8] sm:$0xff]  ;;  %1883 = vmatprep.mubr.f32.mxu1 %v999_v10  ;;  %v3652_v29 = vpack.c.bf16 %v581_v22, %v577_v21  ;;  %v580_v31 = vld [vmem:[%s9133_s1 + $0x10e0] sm:$0xff]  ;;  %v578_v32 = vld [vmem:[%s9133_s1 + $0x10d0] sm:$0xff]  ;;  %vm3337_vm6 = vcmask 74752  }
 0x10a   :  { %3647 = vmatpush1.bf16.msra.mxu0 %v3646_v14  ;;  %v4092_v33 = vpack.c.bf16 %v583_v26, %v579_v23  ;;  %v582_v34 = vld [vmem:[%s9133_s1 + $0x10f0] sm:$0xff]  ;;  %v585_v35 = vld [vmem:[%s9133_s1 + $0x1108] sm:$0xff]  ;;  %v587_v37 = vld [vmem:[%s9133_s1 + $0x1118] sm:$0xff]  ;;  %v3654_v40 = vpack.c.bf16 %v580_v31, %v576_v30 }
 0x10b   :  { %4087 = vmatpush1.bf16.msra.mxu1 %v4086_v15  ;;  %3649 = vmatprep.subr.bf16.mxu0 %v3648_v16  ;;  %v589_v36 = vld [vmem:[%s9133_s1 + $0x1128] sm:$0xff]  ;;  %v591_v38 = vld [vmem:[%s9133_s1 + $0x1138] sm:$0xff]  ;;  %v4094_v41 = vpack.c.bf16 %v582_v34, %v578_v32  ;;  %v584_v43 = vld [vmem:[%s9133_s1 + $0x1100] sm:$0xff] }
 0x10c   :  { %4089 = vmatprep.subr.bf16.mxu1 %v4088_v20  ;;  %v3656_v42 = vpack.c.bf16 %v589_v36, %v585_v35  ;;  %v588_v44 = vld [vmem:[%s9133_s1 + $0x1120] sm:$0xff]  ;;  %v586_v39 = vld [vmem:[%s9133_s1 + $0x1110] sm:$0xff]  ;;  %v4096_v46 = vpack.c.bf16 %v591_v38, %v587_v37  ;;  %v593_v25 = vld [vmem:[%s9133_s1 + $0x1148] sm:$0xff] }
 0x10d   :  { %v590_v47 = vld [vmem:[%s9133_s1 + $0x1130] sm:$0xff]  ;;  %v597_v48 = vld [vmem:[%s9133_s1 + $0x1168] sm:$0xff]  ;;  %v595_v49 = vld [vmem:[%s9133_s1 + $0x1158] sm:$0xff]  ;;  %v3658_v53 = vpack.c.bf16 %v588_v44, %v584_v43 }
 0x10e   :  { %3651 = vmatpush1.bf16.msra.mxu0 %v3650_v27  ;;  %v599_v52 = vld [vmem:[%s9133_s1 + $0x1178] sm:$0xff]  ;;  %v4098_v54 = vpack.c.bf16 %v590_v47, %v586_v39  ;;  %v3660_v55 = vpack.c.bf16 %v597_v48, %v593_v25  ;;  %v592_v56 = vld [vmem:[%s9133_s1 + $0x1140] sm:$0xff]  ;;  %v594_v58 = vld [vmem:[%s9133_s1 + $0x1150] sm:$0xff] }
 0x10f   :  { %4091 = vmatpush1.bf16.msra.mxu1 %v4090_v28  ;;  %3653 = vmatprep.subr.bf16.mxu0 %v3652_v29  ;;  %v596_v57 = vld [vmem:[%s9133_s1 + $0x1160] sm:$0xff]  ;;  %v4100_v24 = vpack.c.bf16 %v599_v52, %v595_v49  ;;  %v598_v59 = vld [vmem:[%s9133_s1 + $0x1170] sm:$0xff]  ;;  %v601_v60 = vld [vmem:[%s9133_s1 + $0x1188] sm:$0xff] }
 0x110   :  { %4093 = vmatprep.subr.bf16.mxu1 %v4092_v33  ;;  %v605_v63 = vld [vmem:[%s9133_s1 + $0x11a8] sm:$0xff]  ;;  %v603_v0 = vld [vmem:[%s9133_s1 + $0x1198] sm:$0xff]  ;;  %v3662_v2 = vpack.c.bf16 %v596_v57, %v592_v56  ;;  %v4102_v3 = vpack.c.bf16 %v598_v59, %v594_v58  ;;  %v600_v5 = vld [vmem:[%s9133_s1 + $0x1180] sm:$0xff] }
 0x111   :  { %v607_v1 = vld [vmem:[%s9133_s1 + $0x11b8] sm:$0xff]  ;;  %v3664_v4 = vpack.c.bf16 %v605_v63, %v601_v60  ;;  %v604_v6 = vld [vmem:[%s9133_s1 + $0x11a0] sm:$0xff]  ;;  %v602_v7 = vld [vmem:[%s9133_s1 + $0x1190] sm:$0xff] }
 0x112   :  { %3655 = vmatpush1.bf16.msra.mxu0 %v3654_v40  ;;  %v4104_v8 = vpack.c.bf16 %v607_v1, %v603_v0  ;;  %v606_v45 = vld [vmem:[%s9133_s1 + $0x11b0] sm:$0xff]  ;;  %v609_v9 = vld [vmem:[%s9133_s1 + $0x11c8] sm:$0xff]  ;;  %v611_v12 = vld [vmem:[%s9133_s1 + $0x11d8] sm:$0xff]  ;;  %v3666_v14 = vpack.c.bf16 %v604_v6, %v600_v5 }
 0x113   :  { %4095 = vmatpush1.bf16.msra.mxu1 %v4094_v41  ;;  %3657 = vmatprep.subr.bf16.mxu0 %v3656_v42  ;;  %v613_v10 = vld [vmem:[%s9133_s1 + $0x11e8] sm:$0xff]  ;;  %v615_v13 = vld [vmem:[%s9133_s1 + $0x11f8] sm:$0xff]  ;;  %v4106_v15 = vpack.c.bf16 %v606_v45, %v602_v7  ;;  %v608_v17 = vld [vmem:[%s9133_s1 + $0x11c0] sm:$0xff] }
 0x114   :  { %4097 = vmatprep.subr.bf16.mxu1 %v4096_v46  ;;  %v3668_v16 = vpack.c.bf16 %v613_v10, %v609_v9  ;;  %v612_v18 = vld [vmem:[%s9133_s1 + $0x11e0] sm:$0xff]  ;;  %v610_v19 = vld [vmem:[%s9133_s1 + $0x11d0] sm:$0xff]  ;;  %v4108_v20 = vpack.c.bf16 %v615_v13, %v611_v12  ;;  %v617_v21 = vld [vmem:[%s9133_s1 + $0x1208] sm:$0xff] }
 0x115   :  { %v614_v50 = vld [vmem:[%s9133_s1 + $0x11f0] sm:$0xff]  ;;  %v621_v22 = vld [vmem:[%s9133_s1 + $0x1228] sm:$0xff]  ;;  %v619_v23 = vld [vmem:[%s9133_s1 + $0x1218] sm:$0xff]  ;;  %v3670_v27 = vpack.c.bf16 %v612_v18, %v608_v17 }
 0x116   :  { %3659 = vmatpush1.bf16.msra.mxu0 %v3658_v53  ;;  %v623_v26 = vld [vmem:[%s9133_s1 + $0x1238] sm:$0xff]  ;;  %v4110_v28 = vpack.c.bf16 %v614_v50, %v610_v19  ;;  %v3672_v29 = vpack.c.bf16 %v621_v22, %v617_v21  ;;  %v616_v30 = vld [vmem:[%s9133_s1 + $0x1200] sm:$0xff]  ;;  %v618_v32 = vld [vmem:[%s9133_s1 + $0x1210] sm:$0xff] }
 0x117   :  { %4099 = vmatpush1.bf16.msra.mxu1 %v4098_v54  ;;  %3661 = vmatprep.subr.bf16.mxu0 %v3660_v55  ;;  %v620_v31 = vld [vmem:[%s9133_s1 + $0x1220] sm:$0xff]  ;;  %v4112_v33 = vpack.c.bf16 %v623_v26, %v619_v23  ;;  %v622_v34 = vld [vmem:[%s9133_s1 + $0x1230] sm:$0xff]  ;;  %v625_v35 = vld [vmem:[%s9133_s1 + $0x1248] sm:$0xff] }
 0x118   :  { %4101 = vmatprep.subr.bf16.mxu1 %v4100_v24  ;;  %v629_v36 = vld [vmem:[%s9133_s1 + $0x1268] sm:$0xff]  ;;  %v627_v37 = vld [vmem:[%s9133_s1 + $0x1258] sm:$0xff]  ;;  %v3674_v40 = vpack.c.bf16 %v620_v31, %v616_v30  ;;  %v4114_v41 = vpack.c.bf16 %v622_v34, %v618_v32  ;;  %v624_v43 = vld [vmem:[%s9133_s1 + $0x1240] sm:$0xff] }
 0x119   :  { %v631_v38 = vld [vmem:[%s9133_s1 + $0x1278] sm:$0xff]  ;;  %v3676_v42 = vpack.c.bf16 %v629_v36, %v625_v35  ;;  %v628_v44 = vld [vmem:[%s9133_s1 + $0x1260] sm:$0xff]  ;;  %v626_v39 = vld [vmem:[%s9133_s1 + $0x1250] sm:$0xff] }
 0x11a   :  { %3663 = vmatpush1.bf16.msra.mxu0 %v3662_v2  ;;  %v4116_v46 = vpack.c.bf16 %v631_v38, %v627_v37  ;;  %v630_v47 = vld [vmem:[%s9133_s1 + $0x1270] sm:$0xff]  ;;  %v633_v25 = vld [vmem:[%s9133_s1 + $0x1288] sm:$0xff]  ;;  %v635_v49 = vld [vmem:[%s9133_s1 + $0x1298] sm:$0xff]  ;;  %v3678_v53 = vpack.c.bf16 %v628_v44, %v624_v43 }
 0x11b   :  { %4103 = vmatpush1.bf16.msra.mxu1 %v4102_v3  ;;  %3665 = vmatprep.subr.bf16.mxu0 %v3664_v4  ;;  %v637_v48 = vld [vmem:[%s9133_s1 + $0x12a8] sm:$0xff]  ;;  %v639_v52 = vld [vmem:[%s9133_s1 + $0x12b8] sm:$0xff]  ;;  %v4118_v54 = vpack.c.bf16 %v630_v47, %v626_v39  ;;  %v632_v56 = vld [vmem:[%s9133_s1 + $0x1280] sm:$0xff] }
 0x11c   :  { %4105 = vmatprep.subr.bf16.mxu1 %v4104_v8  ;;  %v3680_v55 = vpack.c.bf16 %v637_v48, %v633_v25  ;;  %v636_v57 = vld [vmem:[%s9133_s1 + $0x12a0] sm:$0xff]  ;;  %v634_v58 = vld [vmem:[%s9133_s1 + $0x1290] sm:$0xff]  ;;  %v4120_v24 = vpack.c.bf16 %v639_v52, %v635_v49  ;;  %v641_v60 = vld [vmem:[%s9133_s1 + $0x12c8] sm:$0xff] }
 0x11d   :  { %v638_v59 = vld [vmem:[%s9133_s1 + $0x12b0] sm:$0xff]  ;;  %v645_v63 = vld [vmem:[%s9133_s1 + $0x12e8] sm:$0xff]  ;;  %v643_v0 = vld [vmem:[%s9133_s1 + $0x12d8] sm:$0xff]  ;;  %v3682_v2 = vpack.c.bf16 %v636_v57, %v632_v56 }
 0x11e   :  { %3667 = vmatpush1.bf16.msra.mxu0 %v3666_v14  ;;  %v647_v1 = vld [vmem:[%s9133_s1 + $0x12f8] sm:$0xff]  ;;  %v4122_v3 = vpack.c.bf16 %v638_v59, %v634_v58  ;;  %v3684_v4 = vpack.c.bf16 %v645_v63, %v641_v60  ;;  %v640_v5 = vld [vmem:[%s9133_s1 + $0x12c0] sm:$0xff]  ;;  %v642_v7 = vld [vmem:[%s9133_s1 + $0x12d0] sm:$0xff] }
 0x11f   :  { %4107 = vmatpush1.bf16.msra.mxu1 %v4106_v15  ;;  %3669 = vmatprep.subr.bf16.mxu0 %v3668_v16  ;;  %v644_v6 = vld [vmem:[%s9133_s1 + $0x12e0] sm:$0xff]  ;;  %v4124_v8 = vpack.c.bf16 %v647_v1, %v643_v0  ;;  %v646_v45 = vld [vmem:[%s9133_s1 + $0x12f0] sm:$0xff]  ;;  %v649_v9 = vld [vmem:[%s9133_s1 + $0x1308] sm:$0xff]  ;;  %v984_v0 = vcombine.high %v6475_v51, %v6475_v51 }
 0x120   :  { %4109 = vmatprep.subr.bf16.mxu1 %v4108_v20  ;;  %v653_v10 = vld [vmem:[%s9133_s1 + $0x1328] sm:$0xff]  ;;  %v651_v12 = vld [vmem:[%s9133_s1 + $0x1318] sm:$0xff]  ;;  %v3686_v14 = vpack.c.bf16 %v644_v6, %v640_v5  ;;  %v4126_v15 = vpack.c.bf16 %v646_v45, %v642_v7  ;;  %v648_v17 = vld [vmem:[%s9133_s1 + $0x1300] sm:$0xff] }
 0x121   :  { %v655_v13 = vld [vmem:[%s9133_s1 + $0x1338] sm:$0xff]  ;;  %v3688_v16 = vpack.c.bf16 %v653_v10, %v649_v9  ;;  %v652_v18 = vld [vmem:[%s9133_s1 + $0x1320] sm:$0xff]  ;;  %v650_v19 = vld [vmem:[%s9133_s1 + $0x1310] sm:$0xff] }
 0x122   :  { %3671 = vmatpush1.bf16.msra.mxu0 %v3670_v27  ;;  %v4128_v20 = vpack.c.bf16 %v655_v13, %v651_v12  ;;  %v654_v50 = vld [vmem:[%s9133_s1 + $0x1330] sm:$0xff]  ;;  %v657_v21 = vld [vmem:[%s9133_s1 + $0x1348] sm:$0xff]  ;;  %v659_v23 = vld [vmem:[%s9133_s1 + $0x1358] sm:$0xff]  ;;  %v3690_v27 = vpack.c.bf16 %v652_v18, %v648_v17  ;;  %v6890_v12 = vrot.slane %v984_v0, %v5156_v11 }
 0x123   :  { %4111 = vmatpush1.bf16.msra.mxu1 %v4110_v28  ;;  %3673 = vmatprep.subr.bf16.mxu0 %v3672_v29  ;;  %v661_v22 = vld [vmem:[%s9133_s1 + $0x1368] sm:$0xff]  ;;  %v663_v26 = vld [vmem:[%s9133_s1 + $0x1378] sm:$0xff]  ;;  %v4130_v28 = vpack.c.bf16 %v654_v50, %v650_v19  ;;  %v656_v30 = vld [vmem:[%s9133_s1 + $0x1340] sm:$0xff] }
 0x124   :  { %4113 = vmatprep.subr.bf16.mxu1 %v4112_v33  ;;  %v3692_v29 = vpack.c.bf16 %v661_v22, %v657_v21  ;;  %v660_v31 = vld [vmem:[%s9133_s1 + $0x1360] sm:$0xff]  ;;  %v658_v32 = vld [vmem:[%s9133_s1 + $0x1350] sm:$0xff]  ;;  %v4132_v33 = vpack.c.bf16 %v663_v26, %v659_v23  ;;  %v665_v35 = vld [vmem:[%s9133_s1 + $0x1388] sm:$0xff]  ;;  %v1000_v23 = vcombine.high %v6890_v12, %v6890_v12 }
 0x125   :  { %v662_v34 = vld [vmem:[%s9133_s1 + $0x1370] sm:$0xff]  ;;  %v669_v36 = vld [vmem:[%s9133_s1 + $0x13a8] sm:$0xff]  ;;  %v667_v37 = vld [vmem:[%s9133_s1 + $0x1398] sm:$0xff] }
 0x126   :  { %3675 = vmatpush1.bf16.msra.mxu0 %v3674_v40  ;;  %v671_v38 = vld [vmem:[%s9133_s1 + $0x13b8] sm:$0xff]  ;;  %v3694_v40 = vpack.c.bf16 %v660_v31, %v656_v30  ;;  %v664_v43 = vld [vmem:[%s9133_s1 + $0x1380] sm:$0xff]  ;;  %v666_v39 = vld [vmem:[%s9133_s1 + $0x1390] sm:$0xff] }
 0x127   :  { %4115 = vmatpush1.bf16.msra.mxu1 %v4114_v41  ;;  %3677 = vmatprep.subr.bf16.mxu0 %v3676_v42  ;;  %v4134_v41 = vpack.c.bf16 %v662_v34, %v658_v32  ;;  %v3696_v42 = vpack.c.bf16 %v669_v36, %v665_v35  ;;  %v668_v44 = vld [vmem:[%s9133_s1 + $0x13a0] sm:$0xff]  ;;  %v670_v47 = vld [vmem:[%s9133_s1 + $0x13b0] sm:$0xff]  ;;  %v673_v25 = vld [vmem:[%s9133_s1 + $0x13c8] sm:$0xff] }
 0x128   :  { %4117 = vmatprep.subr.bf16.mxu1 %v4116_v46  ;;  %v4136_v46 = vpack.c.bf16 %v671_v38, %v667_v37  ;;  %v677_v48 = vld [vmem:[%s9133_s1 + $0x13e8] sm:$0xff]  ;;  %v675_v49 = vld [vmem:[%s9133_s1 + $0x13d8] sm:$0xff]  ;;  %v672_v56 = vld [vmem:[%s9133_s1 + $0x13c0] sm:$0xff] }
 0x129   :  { %v679_v52 = vld [vmem:[%s9133_s1 + $0x13f8] sm:$0xff]  ;;  %v676_v57 = vld [vmem:[%s9133_s1 + $0x13e0] sm:$0xff]  ;;  %v674_v58 = vld [vmem:[%s9133_s1 + $0x13d0] sm:$0xff] }
 0x12a   :  { %3679 = vmatpush1.bf16.msra.mxu0 %v3678_v53  ;;  %v3698_v53 = vpack.c.bf16 %v668_v44, %v664_v43  ;;  %v678_v59 = vld [vmem:[%s9133_s1 + $0x13f0] sm:$0xff]  ;;  %v681_v60 = vld [vmem:[%s9133_s1 + $0x1408] sm:$0xff]  ;;  %v683_v1 = vld [vmem:[%s9133_s1 + $0x1418] sm:$0xff] }
 0x12b   :  { %4119 = vmatpush1.bf16.msra.mxu1 %v4118_v54  ;;  %3681 = vmatprep.subr.bf16.mxu0 %v3680_v55  ;;  %v4138_v54 = vpack.c.bf16 %v670_v47, %v666_v39  ;;  %v3700_v55 = vpack.c.bf16 %v677_v48, %v673_v25  ;;  %v685_v63 = vld [vmem:[%s9133_s1 + $0x1428] sm:$0xff]  ;;  %v680_v6 = vld [vmem:[%s9133_s1 + $0x1400] sm:$0xff]  ;;  %v682_v7 = vld [vmem:[%s9133_s1 + $0x1410] sm:$0xff] }
 0x12c   :  { %4121 = vmatprep.subr.bf16.mxu1 %v4120_v24  ;;  %v4140_v24 = vpack.c.bf16 %v679_v52, %v675_v49  ;;  %v3704_v5 = vpack.c.bf16 %v685_v63, %v681_v60  ;;  %v684_v51 = vld [vmem:[%s9133_s1 + $0x1420] sm:$0xff]  ;;  %v686_v45 = vld [vmem:[%s9133_s1 + $0x1430] sm:$0xff]  ;;  %v689_v9 = vld [vmem:[%s9133_s1 + $0x1448] sm:$0xff] }
 0x12d   :  { %v693_v10 = vld [vmem:[%s9133_s1 + $0x1468] sm:$0xff]  ;;  %v691_v13 = vld [vmem:[%s9133_s1 + $0x1458] sm:$0xff]  ;;  %v688_v18 = vld [vmem:[%s9133_s1 + $0x1440] sm:$0xff] }
 0x12e   :  { %3683 = vmatpush1.bf16.msra.mxu0 %v3682_v2  ;;  %v687_v2 = vld [vmem:[%s9133_s1 + $0x1438] sm:$0xff]  ;;  %v3708_v17 = vpack.c.bf16 %v693_v10, %v689_v9  ;;  %v692_v11 = vld [vmem:[%s9133_s1 + $0x1460] sm:$0xff]  ;;  %v690_v19 = vld [vmem:[%s9133_s1 + $0x1450] sm:$0xff] }
 0x12f   :  { %4123 = vmatpush1.bf16.msra.mxu1 %v4122_v3  ;;  %3685 = vmatprep.subr.bf16.mxu0 %v3684_v4  ;;  %v3702_v3 = vpack.c.bf16 %v676_v57, %v672_v56  ;;  %v4142_v4 = vpack.c.bf16 %v678_v59, %v674_v58  ;;  %v694_v50 = vld [vmem:[%s9133_s1 + $0x1470] sm:$0xff]  ;;  %v697_v21 = vld [vmem:[%s9133_s1 + $0x1488] sm:$0xff]  ;;  %v699_v26 = vld [vmem:[%s9133_s1 + $0x1498] sm:$0xff] }
 0x130   :  { %4125 = vmatprep.subr.bf16.mxu1 %v4124_v8  ;;  %v4144_v8 = vpack.c.bf16 %v687_v2, %v683_v1  ;;  %v701_v22 = vld [vmem:[%s9133_s1 + $0x14a8] sm:$0xff]  ;;  %v696_v31 = vld [vmem:[%s9133_s1 + $0x1480] sm:$0xff]  ;;  %v707_v37 = vld [vmem:[%s9133_s1 + $0x14d8] sm:$0xff] }
 0x131   :  { %v3712_v30 = vpack.c.bf16 %v701_v22, %v697_v21  ;;  %v700_v32 = vld [vmem:[%s9133_s1 + $0x14a0] sm:$0xff]  ;;  %v705_v35 = vld [vmem:[%s9133_s1 + $0x14c8] sm:$0xff]  ;;  %v711_v38 = vld [vmem:[%s9133_s1 + $0x14f8] sm:$0xff] }
 0x132   :  { %3687 = vmatpush1.bf16.msra.mxu0 %v3686_v14  ;;  %v695_v14 = vld [vmem:[%s9133_s1 + $0x1478] sm:$0xff]  ;;  %v709_v36 = vld [vmem:[%s9133_s1 + $0x14e8] sm:$0xff]  ;;  %v704_v43 = vld [vmem:[%s9133_s1 + $0x14c0] sm:$0xff] }
 0x133   :  { %4127 = vmatpush1.bf16.msra.mxu1 %v4126_v15  ;;  %3689 = vmatprep.subr.bf16.mxu0 %v3688_v16  ;;  %v3706_v15 = vpack.c.bf16 %v684_v51, %v680_v6  ;;  %v4146_v16 = vpack.c.bf16 %v686_v45, %v682_v7  ;;  %v708_v44 = vld [vmem:[%s9133_s1 + $0x14e0] sm:$0xff]  ;;  %v706_v39 = vld [vmem:[%s9133_s1 + $0x14d0] sm:$0xff]  ;;  %v713_v25 = vld [vmem:[%s9133_s1 + $0x1508] sm:$0xff] }
 0x134   :  { %4129 = vmatprep.subr.bf16.mxu1 %v4128_v20  ;;  %v4148_v20 = vpack.c.bf16 %v695_v14, %v691_v13  ;;  %v710_v47 = vld [vmem:[%s9133_s1 + $0x14f0] sm:$0xff]  ;;  %v717_v48 = vld [vmem:[%s9133_s1 + $0x1528] sm:$0xff]  ;;  %v715_v49 = vld [vmem:[%s9133_s1 + $0x1518] sm:$0xff] }
 0x135   :  { %v719_v52 = vld [vmem:[%s9133_s1 + $0x1538] sm:$0xff]  ;;  %v712_v56 = vld [vmem:[%s9133_s1 + $0x1500] sm:$0xff]  ;;  %v714_v58 = vld [vmem:[%s9133_s1 + $0x1510] sm:$0xff] }
 0x136   :  { %3691 = vmatpush1.bf16.msra.mxu0 %v3690_v27  ;;  %v703_v27 = vld [vmem:[%s9133_s1 + $0x14b8] sm:$0xff]  ;;  %v716_v57 = vld [vmem:[%s9133_s1 + $0x1520] sm:$0xff]  ;;  %v718_v59 = vld [vmem:[%s9133_s1 + $0x1530] sm:$0xff] }
 0x137   :  { %4131 = vmatpush1.bf16.msra.mxu1 %v4130_v28  ;;  %3693 = vmatprep.subr.bf16.mxu0 %v3692_v29  ;;  %v3710_v28 = vpack.c.bf16 %v692_v11, %v688_v18  ;;  %v4150_v29 = vpack.c.bf16 %v694_v50, %v690_v19  ;;  %v4152_v34 = vpack.c.bf16 %v703_v27, %v699_v26  ;;  %v721_v60 = vld [vmem:[%s9133_s1 + $0x1548] sm:$0xff]  ;;  %v723_v0 = vld [vmem:[%s9133_s1 + $0x1558] sm:$0xff]  ;;  %v724_v6 = vld [vmem:[%s9133_s1 + $0x1560] sm:$0xff] }
 0x138   :  { %4133 = vmatprep.subr.bf16.mxu1 %v4132_v33  ;;  %v698_v33 = vld [vmem:[%s9133_s1 + $0x1490] sm:$0xff]  ;;  %v725_v63 = vld [vmem:[%s9133_s1 + $0x1568] sm:$0xff]  ;;  %v727_v1 = vld [vmem:[%s9133_s1 + $0x1578] sm:$0xff]  ;;  %v3722_v2 = vpack.c.bf16 %v716_v57, %v712_v56 }
 0x139   :  { %v722_v51 = vld [vmem:[%s9133_s1 + $0x1550] sm:$0xff]  ;;  %v4164_v7 = vpack.c.bf16 %v727_v1, %v723_v0  ;;  %v729_v45 = vld [vmem:[%s9133_s1 + $0x1588] sm:$0xff]  ;;  %v731_v10 = vld [vmem:[%s9133_s1 + $0x1598] sm:$0xff] }
 0x13a   :  { %3695 = vmatpush1.bf16.msra.mxu0 %v3694_v40  ;;  %v3714_v40 = vpack.c.bf16 %v700_v32, %v696_v31  ;;  %v733_v9 = vld [vmem:[%s9133_s1 + $0x15a8] sm:$0xff]  ;;  %v735_v13 = vld [vmem:[%s9133_s1 + $0x15b8] sm:$0xff]  ;;  %v732_v18 = vld [vmem:[%s9133_s1 + $0x15a0] sm:$0xff] }
 0x13b   :  { %4135 = vmatpush1.bf16.msra.mxu1 %v4134_v41  ;;  %3697 = vmatprep.subr.bf16.mxu0 %v3696_v42  ;;  %v3716_v42 = vpack.c.bf16 %v709_v36, %v705_v35  ;;  %v730_v11 = vld [vmem:[%s9133_s1 + $0x1590] sm:$0xff]  ;;  %v4168_v19 = vpack.c.bf16 %v735_v13, %v731_v10  ;;  %v737_v50 = vld [vmem:[%s9133_s1 + $0x15c8] sm:$0xff]  ;;  %v739_v22 = vld [vmem:[%s9133_s1 + $0x15d8] sm:$0xff] }
 0x13c   :  { %4137 = vmatprep.subr.bf16.mxu1 %v4136_v46  ;;  %v4156_v46 = vpack.c.bf16 %v711_v38, %v707_v37  ;;  %v741_v21 = vld [vmem:[%s9133_s1 + $0x15e8] sm:$0xff]  ;;  %v738_v31 = vld [vmem:[%s9133_s1 + $0x15d0] sm:$0xff]  ;;  %v747_v35 = vld [vmem:[%s9133_s1 + $0x1618] sm:$0xff] }
 0x13d   :  { %v751_v36 = vld [vmem:[%s9133_s1 + $0x1638] sm:$0xff]  ;;  %v754_v56 = vld [vmem:[%s9133_s1 + $0x1650] sm:$0xff] }
 0x13e   :  { %3699 = vmatpush1.bf16.msra.mxu0 %v3698_v53  ;;  %v3718_v53 = vpack.c.bf16 %v708_v44, %v704_v43  ;;  %v746_v43 = vld [vmem:[%s9133_s1 + $0x1610] sm:$0xff]  ;;  %v4176_v44 = vpack.c.bf16 %v751_v36, %v747_v35 }
 0x13f   :  { %4139 = vmatpush1.bf16.msra.mxu1 %v4138_v54  ;;  %3701 = vmatprep.subr.bf16.mxu0 %v3700_v55  ;;  %v4158_v54 = vpack.c.bf16 %v710_v47, %v706_v39  ;;  %v3720_v55 = vpack.c.bf16 %v717_v48, %v713_v25  ;;  %v750_v39 = vld [vmem:[%s9133_s1 + $0x1630] sm:$0xff]  ;;  %v757_v47 = vld [vmem:[%s9133_s1 + $0x1668] sm:$0xff]  ;;  %v755_v25 = vld [vmem:[%s9133_s1 + $0x1658] sm:$0xff] }
 0x140   :  { %4141 = vmatprep.subr.bf16.mxu1 %v4140_v24  ;;  %v4160_v24 = vpack.c.bf16 %v719_v52, %v715_v49  ;;  %v759_v48 = vld [vmem:[%s9133_s1 + $0x1678] sm:$0xff]  ;;  %v4178_v52 = vpack.c.bf16 %v750_v39, %v746_v43  ;;  %v790_v43 = vld [vmem:[%s9133_s1 + $0x1770] sm:$0xff]  ;;  %v797_v39 = vld [vmem:[%s9133_s1 + $0x17a8] sm:$0xff] }
 0x141   :  { %v4180_v57 = vpack.c.bf16 %v759_v48, %v755_v25 }
 0x142   :  { %3703 = vmatpush1.bf16.msra.mxu0 %v3702_v3  ;;  %v4162_v3 = vpack.c.bf16 %v718_v59, %v714_v58  ;;  %v758_v58 = vld [vmem:[%s9133_s1 + $0x1670] sm:$0xff]  ;;  %v765_v59 = vld [vmem:[%s9133_s1 + $0x16a8] sm:$0xff] }
 0x143   :  { %4143 = vmatpush1.bf16.msra.mxu1 %v4142_v4  ;;  %3705 = vmatprep.subr.bf16.mxu0 %v3704_v5  ;;  %v3724_v4 = vpack.c.bf16 %v725_v63, %v721_v60  ;;  %v720_v5 = vld [vmem:[%s9133_s1 + $0x1540] sm:$0xff]  ;;  %v763_v60 = vld [vmem:[%s9133_s1 + $0x1698] sm:$0xff]  ;;  %v4182_v1 = vpack.c.bf16 %v758_v58, %v754_v56  ;;  %v798_v56 = vld [vmem:[%s9133_s1 + $0x17b0] sm:$0xff] }
 0x144   :  { %4145 = vmatprep.subr.bf16.mxu1 %v4144_v8  ;;  %v726_v8 = vld [vmem:[%s9133_s1 + $0x1570] sm:$0xff]  ;;  %v3726_v14 = vpack.c.bf16 %v724_v6, %v720_v5  ;;  %v767_v63 = vld [vmem:[%s9133_s1 + $0x16b8] sm:$0xff]  ;;  %v805_v58 = vld [vmem:[%s9133_s1 + $0x17e8] sm:$0xff] }
 0x145   :  { %1387 = vmatmul.mubr.f32.vlgmr.msra.gmra.mrb[0].mxu0 %v6497_v62  ;;  %v762_v5 = vld [vmem:[%s9133_s1 + $0x1690] sm:$0xff]  ;;  %v4184_v6 = vpack.c.bf16 %v767_v63, %v763_v60 }
 0x146   :  { %3707 = vmatpush1.bf16.msra.mxu0 %v3706_v15  ;;  %1884 = vmatmul.mubr.f32.vlgmr.msra.gmra.mrb[0].mxu1 %v6497_v62  ;;  %v702_v62 = vld [vmem:[%s9133_s1 + $0x14b0] sm:$0xff]  ;;  %v4166_v15 = vpack.c.bf16 %v726_v8, %v722_v51  ;;  %v773_v8 = vld [vmem:[%s9133_s1 + $0x16e8] sm:$0xff] }
 0x147   :  { %4147 = vmatpush1.bf16.msra.mxu1 %v4146_v16  ;;  %3709 = vmatprep.subr.bf16.mxu0 %v3708_v17  ;;  %v4154_v41 = vpack.c.bf16 %v702_v62, %v698_v33  ;;  %v3728_v16 = vpack.c.bf16 %v733_v9, %v729_v45  ;;  %v728_v17 = vld [vmem:[%s9133_s1 + $0x1580] sm:$0xff]  ;;  %v742_v33 = vld [vmem:[%s9133_s1 + $0x15f0] sm:$0xff]  ;;  %v749_v62 = vld [vmem:[%s9133_s1 + $0x1628] sm:$0xff] }
 0x148   :  { %4149 = vmatprep.subr.bf16.mxu1 %v4148_v20  ;;  %1457 = vmatprep.mubr.f32.mxu0 %v1000_v23  ;;  %v734_v20 = vld [vmem:[%s9133_s1 + $0x15b0] sm:$0xff]  ;;  %v3730_v26 = vpack.c.bf16 %v732_v18, %v728_v17  ;;  %v4174_v38 = vpack.c.bf16 %v742_v33, %v738_v31  ;;  %v771_v45 = vld [vmem:[%s9133_s1 + $0x16d8] sm:$0xff]  ;;  %v789_v33 = vld [vmem:[%s9133_s1 + $0x1768] sm:$0xff] }
 0x149   :  { %1954 = vmatprep.mubr.f32.mxu1 %v1000_v23  ;;  %v743_v23 = vld [vmem:[%s9133_s1 + $0x15f8] sm:$0xff]  ;;  %v4170_v27 = vpack.c.bf16 %v734_v20, %v730_v11  ;;  %v766_v51 = vld [vmem:[%s9133_s1 + $0x16b0] sm:$0xff]  ;;  %v781_v20 = vld [vmem:[%s9133_s1 + $0x1728] sm:$0xff] }
 0x14a   :  { %3711 = vmatpush1.bf16.msra.mxu0 %v3710_v28  ;;  %v3732_v28 = vpack.c.bf16 %v741_v21, %v737_v50  ;;  %v4172_v32 = vpack.c.bf16 %v743_v23, %v739_v22  ;;  %v775_v9 = vld [vmem:[%s9133_s1 + $0x16f8] sm:$0xff]  ;;  %v4186_v13 = vpack.c.bf16 %v766_v51, %v762_v5  ;;  %v770_v17 = vld [vmem:[%s9133_s1 + $0x16d0] sm:$0xff]  ;;  %v813_v51 = vld [vmem:[%s9133_s1 + $0x1828] sm:$0xff] }
 0x14b   :  { %4151 = vmatpush1.bf16.msra.mxu1 %v4150_v29  ;;  %3713 = vmatprep.subr.bf16.mxu0 %v3712_v30  ;;  %v736_v29 = vld [vmem:[%s9133_s1 + $0x15c0] sm:$0xff]  ;;  %v4188_v18 = vpack.c.bf16 %v775_v9, %v771_v45  ;;  %v774_v11 = vld [vmem:[%s9133_s1 + $0x16f0] sm:$0xff]  ;;  %v779_v50 = vld [vmem:[%s9133_s1 + $0x1718] sm:$0xff] }
 0x14c   :  { %4153 = vmatprep.subr.bf16.mxu1 %v4152_v34  ;;  %v740_v30 = vld [vmem:[%s9133_s1 + $0x15e0] sm:$0xff]  ;;  %v745_v34 = vld [vmem:[%s9133_s1 + $0x1608] sm:$0xff]  ;;  %v783_v21 = vld [vmem:[%s9133_s1 + $0x1738] sm:$0xff]  ;;  %v4190_v23 = vpack.c.bf16 %v774_v11, %v770_v17 }
 0x14d   :  { %v3734_v37 = vpack.c.bf16 %v740_v30, %v736_v29  ;;  %v778_v29 = vld [vmem:[%s9133_s1 + $0x1710] sm:$0xff]  ;;  %v4192_v30 = vpack.c.bf16 %v783_v21, %v779_v50  ;;  %v821_v11 = vld [vmem:[%s9133_s1 + $0x1868] sm:$0xff]  ;;  %v7289_v50 = vld.sshfl [vmem:[%s9132_s0 + $0x18] sm:$0x33 pattern:$0x76325410] }
 0x14e   :  { %3715 = vmatpush1.bf16.msra.mxu0 %v3714_v40  ;;  %v3736_v40 = vpack.c.bf16 %v749_v62, %v745_v34  ;;  %v782_v31 = vld [vmem:[%s9133_s1 + $0x1730] sm:$0xff]  ;;  %v787_v34 = vld [vmem:[%s9133_s1 + $0x1758] sm:$0xff] }
 0x14f   :  { %4155 = vmatpush1.bf16.msra.mxu1 %v4154_v41  ;;  %3717 = vmatprep.subr.bf16.mxu0 %v3716_v42  ;;  %v744_v41 = vld [vmem:[%s9133_s1 + $0x1600] sm:$0xff]  ;;  %v791_v62 = vld [vmem:[%s9133_s1 + $0x1778] sm:$0xff]  ;;  %v4194_v36 = vpack.c.bf16 %v782_v31, %v778_v29  ;;  %v806_v5 = vld [vmem:[%s9133_s1 + $0x17f0] sm:$0xff] }
 0x150   :  { %4157 = vmatprep.subr.bf16.mxu1 %v4156_v46  ;;  %v748_v42 = vld [vmem:[%s9133_s1 + $0x1620] sm:$0xff]  ;;  %v753_v46 = vld [vmem:[%s9133_s1 + $0x1648] sm:$0xff]  ;;  %v814_v17 = vld [vmem:[%s9133_s1 + $0x1830] sm:$0xff] }
 0x151   :  { %v3738_v49 = vpack.c.bf16 %v748_v42, %v744_v41  ;;  %v786_v41 = vld [vmem:[%s9133_s1 + $0x1750] sm:$0xff]  ;;  %v4196_v42 = vpack.c.bf16 %v791_v62, %v787_v34  ;;  %v825_v31 = vld [vmem:[%s9133_s1 + $0x1888] sm:$0xff]  ;;  %v827_v34 = vld [vmem:[%s9133_s1 + $0x1898] sm:$0xff] }
 0x152   :  { %3719 = vmatpush1.bf16.msra.mxu0 %v3718_v53  ;;  %v3740_v53 = vpack.c.bf16 %v757_v47, %v753_v46  ;;  %v795_v46 = vld [vmem:[%s9133_s1 + $0x1798] sm:$0xff]  ;;  %v4198_v48 = vpack.c.bf16 %v790_v43, %v786_v41  ;;  %v826_v41 = vld [vmem:[%s9133_s1 + $0x1890] sm:$0xff]  ;;  %v833_v43 = vld [vmem:[%s9133_s1 + $0x18c8] sm:$0xff] }
 0x153   :  { %4159 = vmatpush1.bf16.msra.mxu1 %v4158_v54  ;;  %3721 = vmatprep.subr.bf16.mxu0 %v3720_v55  ;;  %v752_v54 = vld [vmem:[%s9133_s1 + $0x1640] sm:$0xff]  ;;  %v799_v47 = vld [vmem:[%s9133_s1 + $0x17b8] sm:$0xff] }
 0x154   :  { %4161 = vmatprep.subr.bf16.mxu1 %v4160_v24  ;;  %v756_v55 = vld [vmem:[%s9133_s1 + $0x1660] sm:$0xff]  ;;  %v761_v24 = vld [vmem:[%s9133_s1 + $0x1688] sm:$0xff]  ;;  %v831_v62 = vld [vmem:[%s9133_s1 + $0x18b8] sm:$0xff] }
 0x155   :  { %v3742_v0 = vpack.c.bf16 %v756_v55, %v752_v54  ;;  %v794_v54 = vld [vmem:[%s9133_s1 + $0x1790] sm:$0xff]  ;;  %v4200_v55 = vpack.c.bf16 %v799_v47, %v795_v46  ;;  %v839_v46 = vld [vmem:[%s9133_s1 + $0x18f8] sm:$0xff] }
 0x156   :  { %3723 = vmatpush1.bf16.msra.mxu0 %v3722_v2  ;;  %v3744_v2 = vpack.c.bf16 %v765_v59, %v761_v24  ;;  %v803_v24 = vld [vmem:[%s9133_s1 + $0x17d8] sm:$0xff]  ;;  %v4202_v63 = vpack.c.bf16 %v798_v56, %v794_v54  ;;  %v841_v56 = vld [vmem:[%s9133_s1 + $0x1908] sm:$0xff] }
 0x157   :  { %4163 = vmatpush1.bf16.msra.mxu1 %v4162_v3  ;;  %3725 = vmatprep.subr.bf16.mxu0 %v3724_v4  ;;  %v760_v3 = vld [vmem:[%s9133_s1 + $0x1680] sm:$0xff]  ;;  %v807_v59 = vld [vmem:[%s9133_s1 + $0x17f8] sm:$0xff] }
 0x158   :  { %4165 = vmatprep.subr.bf16.mxu1 %v4164_v7  ;;  %v764_v4 = vld [vmem:[%s9133_s1 + $0x16a0] sm:$0xff]  ;;  %v769_v7 = vld [vmem:[%s9133_s1 + $0x16c8] sm:$0xff] }
 0x159   :  { %v3746_v10 = vpack.c.bf16 %v764_v4, %v760_v3  ;;  %v802_v3 = vld [vmem:[%s9133_s1 + $0x17d0] sm:$0xff]  ;;  %v4204_v4 = vpack.c.bf16 %v807_v59, %v803_v24  ;;  %v847_v24 = vld [vmem:[%s9133_s1 + $0x1938] sm:$0xff] }
 0x15a   :  { %3727 = vmatpush1.bf16.msra.mxu0 %v3726_v14  ;;  %v3748_v14 = vpack.c.bf16 %v773_v8, %v769_v7  ;;  %v811_v7 = vld [vmem:[%s9133_s1 + $0x1818] sm:$0xff]  ;;  %v4206_v9 = vpack.c.bf16 %v806_v5, %v802_v3  ;;  %v849_v5 = vld [vmem:[%s9133_s1 + $0x1948] sm:$0xff] }
 0x15b   :  { %4167 = vmatpush1.bf16.msra.mxu1 %v4166_v15  ;;  %3729 = vmatprep.subr.bf16.mxu0 %v3728_v16  ;;  %v768_v15 = vld [vmem:[%s9133_s1 + $0x16c0] sm:$0xff]  ;;  %v815_v8 = vld [vmem:[%s9133_s1 + $0x1838] sm:$0xff] }
 0x15c   :  { %4169 = vmatprep.subr.bf16.mxu1 %v4168_v19  ;;  %v772_v16 = vld [vmem:[%s9133_s1 + $0x16e0] sm:$0xff]  ;;  %v777_v19 = vld [vmem:[%s9133_s1 + $0x1708] sm:$0xff] }
 0x15d   :  { %v3750_v22 = vpack.c.bf16 %v772_v16, %v768_v15  ;;  %v810_v15 = vld [vmem:[%s9133_s1 + $0x1810] sm:$0xff]  ;;  %v4208_v16 = vpack.c.bf16 %v815_v8, %v811_v7  ;;  %v855_v7 = vld [vmem:[%s9133_s1 + $0x1978] sm:$0xff] }
 0x15e   :  { %3731 = vmatpush1.bf16.msra.mxu0 %v3730_v26  ;;  %v3752_v26 = vpack.c.bf16 %v781_v20, %v777_v19  ;;  %v819_v19 = vld [vmem:[%s9133_s1 + $0x1858] sm:$0xff] }
 0x15f   :  { %4171 = vmatpush1.bf16.msra.mxu1 %v4170_v27  ;;  %3733 = vmatprep.subr.bf16.mxu0 %v3732_v28  ;;  %v776_v27 = vld [vmem:[%s9133_s1 + $0x1700] sm:$0xff]  ;;  %v823_v20 = vld [vmem:[%s9133_s1 + $0x1878] sm:$0xff] }
 0x160   :  { %4173 = vmatprep.subr.bf16.mxu1 %v4172_v32  ;;  %v780_v28 = vld [vmem:[%s9133_s1 + $0x1720] sm:$0xff]  ;;  %v785_v32 = vld [vmem:[%s9133_s1 + $0x1748] sm:$0xff]  ;;  %v4212_v29 = vpack.c.bf16 %v823_v20, %v819_v19  ;;  %v863_v19 = vld [vmem:[%s9133_s1 + $0x19b8] sm:$0xff] }
 0x161   :  { %v3754_v35 = vpack.c.bf16 %v780_v28, %v776_v27  ;;  %v820_v27 = vld [vmem:[%s9133_s1 + $0x1860] sm:$0xff]  ;;  %v818_v28 = vld [vmem:[%s9133_s1 + $0x1850] sm:$0xff] }
 0x162   :  { %3735 = vmatpush1.bf16.msra.mxu0 %v3734_v37  ;;  %v3756_v37 = vpack.c.bf16 %v789_v33, %v785_v32  ;;  %v829_v32 = vld [vmem:[%s9133_s1 + $0x18a8] sm:$0xff]  ;;  %v1008_v33 = vcombine.high %v7289_v50, %v7289_v50 }
 0x163   :  { %4175 = vmatpush1.bf16.msra.mxu1 %v4174_v38  ;;  %3737 = vmatprep.subr.bf16.mxu0 %v3736_v40  ;;  %v784_v38 = vld [vmem:[%s9133_s1 + $0x1740] sm:$0xff] }
 0x164   :  { %4177 = vmatprep.subr.bf16.mxu1 %v4176_v44  ;;  %v788_v40 = vld [vmem:[%s9133_s1 + $0x1760] sm:$0xff]  ;;  %v793_v44 = vld [vmem:[%s9133_s1 + $0x1788] sm:$0xff] }
 0x165   :  { %v3758_v25 = vpack.c.bf16 %v788_v40, %v784_v38  ;;  %v824_v38 = vld [vmem:[%s9133_s1 + $0x1880] sm:$0xff] }
 0x166   :  { %3739 = vmatpush1.bf16.msra.mxu0 %v3738_v49  ;;  %v3760_v49 = vpack.c.bf16 %v797_v39, %v793_v44  ;;  %v828_v40 = vld [vmem:[%s9133_s1 + $0x18a0] sm:$0xff]  ;;  %v837_v44 = vld [vmem:[%s9133_s1 + $0x18e8] sm:$0xff]  ;;  %v835_v39 = vld [vmem:[%s9133_s1 + $0x18d8] sm:$0xff] }
 0x167   :  { %4179 = vmatpush1.bf16.msra.mxu1 %v4178_v52  ;;  %3741 = vmatprep.subr.bf16.mxu0 %v3740_v53  ;;  %v792_v52 = vld [vmem:[%s9133_s1 + $0x1780] sm:$0xff]  ;;  %v3778_v47 = vpack.c.bf16 %v828_v40, %v824_v38  ;;  %v4220_v54 = vpack.c.bf16 %v839_v46, %v835_v39  ;;  %v866_v38 = vld [vmem:[%s9133_s1 + $0x19d0] sm:$0xff] }
 0x168   :  { %4181 = vmatprep.subr.bf16.mxu1 %v4180_v57  ;;  %v796_v53 = vld [vmem:[%s9133_s1 + $0x17a0] sm:$0xff]  ;;  %v801_v57 = vld [vmem:[%s9133_s1 + $0x17c8] sm:$0xff] }
 0x169   :  { %v3762_v60 = vpack.c.bf16 %v796_v53, %v792_v52  ;;  %v836_v52 = vld [vmem:[%s9133_s1 + $0x18e0] sm:$0xff]  ;;  %v834_v53 = vld [vmem:[%s9133_s1 + $0x18d0] sm:$0xff] }
 0x16a   :  { %3743 = vmatpush1.bf16.msra.mxu0 %v3742_v0  ;;  %v3764_v0 = vpack.c.bf16 %v805_v58, %v801_v57  ;;  %v845_v57 = vld [vmem:[%s9133_s1 + $0x1928] sm:$0xff]  ;;  %v843_v58 = vld [vmem:[%s9133_s1 + $0x1918] sm:$0xff] }
 0x16b   :  { %4183 = vmatpush1.bf16.msra.mxu1 %v4182_v1  ;;  %3745 = vmatprep.subr.bf16.mxu0 %v3744_v2  ;;  %v800_v1 = vld [vmem:[%s9133_s1 + $0x17c0] sm:$0xff]  ;;  %v4224_v3 = vpack.c.bf16 %v847_v24, %v843_v58 }
 0x16c   :  { %4185 = vmatprep.subr.bf16.mxu1 %v4184_v6  ;;  %v804_v2 = vld [vmem:[%s9133_s1 + $0x17e0] sm:$0xff]  ;;  %v809_v6 = vld [vmem:[%s9133_s1 + $0x1808] sm:$0xff] }
 0x16d   :  { %v3766_v45 = vpack.c.bf16 %v804_v2, %v800_v1  ;;  %v844_v1 = vld [vmem:[%s9133_s1 + $0x1920] sm:$0xff]  ;;  %v842_v2 = vld [vmem:[%s9133_s1 + $0x1910] sm:$0xff] }
 0x16e   :  { %3747 = vmatpush1.bf16.msra.mxu0 %v3746_v10  ;;  %v3768_v10 = vpack.c.bf16 %v813_v51, %v809_v6  ;;  %v853_v6 = vld [vmem:[%s9133_s1 + $0x1968] sm:$0xff]  ;;  %v851_v51 = vld [vmem:[%s9133_s1 + $0x1958] sm:$0xff] }
 0x16f   :  { %4187 = vmatpush1.bf16.msra.mxu1 %v4186_v13  ;;  %3749 = vmatprep.subr.bf16.mxu0 %v3748_v14  ;;  %v808_v13 = vld [vmem:[%s9133_s1 + $0x1800] sm:$0xff] }
 0x170   :  { %4189 = vmatprep.subr.bf16.mxu1 %v4188_v18  ;;  %v812_v14 = vld [vmem:[%s9133_s1 + $0x1820] sm:$0xff]  ;;  %v817_v18 = vld [vmem:[%s9133_s1 + $0x1848] sm:$0xff] }
 0x171   :  { %v3770_v21 = vpack.c.bf16 %v812_v14, %v808_v13  ;;  %v852_v13 = vld [vmem:[%s9133_s1 + $0x1960] sm:$0xff]  ;;  %v850_v14 = vld [vmem:[%s9133_s1 + $0x1950] sm:$0xff] }
 0x172   :  { %3751 = vmatpush1.bf16.msra.mxu0 %v3750_v22  ;;  %v4210_v22 = vpack.c.bf16 %v814_v17, %v810_v15  ;;  %v4228_v15 = vpack.c.bf16 %v855_v7, %v851_v51  ;;  %v857_v17 = vld [vmem:[%s9133_s1 + $0x1988] sm:$0xff] }
 0x173   :  { %4191 = vmatpush1.bf16.msra.mxu1 %v4190_v23  ;;  %3753 = vmatprep.subr.bf16.mxu0 %v3752_v26  ;;  %v3772_v23 = vpack.c.bf16 %v821_v11, %v817_v18  ;;  %v816_v26 = vld [vmem:[%s9133_s1 + $0x1840] sm:$0xff]  ;;  %v861_v18 = vld [vmem:[%s9133_s1 + $0x19a8] sm:$0xff]  ;;  %v859_v11 = vld [vmem:[%s9133_s1 + $0x1998] sm:$0xff] }
 0x174   :  { %4193 = vmatprep.subr.bf16.mxu1 %v4192_v30  ;;  %v822_v30 = vld [vmem:[%s9133_s1 + $0x1870] sm:$0xff] }
 0x176   :  { %3755 = vmatpush1.bf16.msra.mxu0 %v3754_v35  ;;  %v3774_v35 = vpack.c.bf16 %v820_v27, %v816_v26  ;;  %v860_v26 = vld [vmem:[%s9133_s1 + $0x19a0] sm:$0xff]  ;;  %v858_v27 = vld [vmem:[%s9133_s1 + $0x1990] sm:$0xff] }
 0x177   :  { %4195 = vmatpush1.bf16.msra.mxu1 %v4194_v36  ;;  %3757 = vmatprep.subr.bf16.mxu0 %v3756_v37  ;;  %v4214_v36 = vpack.c.bf16 %v822_v30, %v818_v28  ;;  %v3776_v37 = vpack.c.bf16 %v829_v32, %v825_v31  ;;  %v4232_v28 = vpack.c.bf16 %v863_v19, %v859_v11  ;;  %v865_v30 = vld [vmem:[%s9133_s1 + $0x19c8] sm:$0xff]  ;;  %v867_v32 = vld [vmem:[%s9133_s1 + $0x19d8] sm:$0xff] }
 0x178   :  { %4197 = vmatprep.subr.bf16.mxu1 %v4196_v42  ;;  %v4216_v42 = vpack.c.bf16 %v831_v62, %v827_v34  ;;  %v869_v31 = vld [vmem:[%s9133_s1 + $0x19e8] sm:$0xff] }
 0x17a   :  { %3759 = vmatpush1.bf16.msra.mxu0 %v3758_v25 }
 0x17b   :  { %4199 = vmatpush1.bf16.msra.mxu1 %v4198_v48  ;;  %3761 = vmatprep.subr.bf16.mxu0 %v3760_v49  ;;  %v3780_v48 = vpack.c.bf16 %v837_v44, %v833_v43  ;;  %v832_v49 = vld [vmem:[%s9133_s1 + $0x18c0] sm:$0xff]  ;;  %v875_v43 = vld [vmem:[%s9133_s1 + $0x1a18] sm:$0xff] }
 0x17c   :  { %4201 = vmatprep.subr.bf16.mxu1 %v4200_v55  ;;  %v838_v55 = vld [vmem:[%s9133_s1 + $0x18f0] sm:$0xff]  ;;  %v3782_v59 = vpack.c.bf16 %v836_v52, %v832_v49  ;;  %v879_v44 = vld [vmem:[%s9133_s1 + $0x1a38] sm:$0xff] }
 0x17d   :  { %v874_v49 = vld [vmem:[%s9133_s1 + $0x1a10] sm:$0xff]  ;;  %v4240_v52 = vpack.c.bf16 %v879_v44, %v875_v43 }
 0x17e   :  { %3763 = vmatpush1.bf16.msra.mxu0 %v3762_v60  ;;  %v4222_v60 = vpack.c.bf16 %v838_v55, %v834_v53  ;;  %v878_v53 = vld [vmem:[%s9133_s1 + $0x1a30] sm:$0xff]  ;;  %v885_v55 = vld [vmem:[%s9133_s1 + $0x1a68] sm:$0xff] }
 0x17f   :  { %4203 = vmatpush1.bf16.msra.mxu1 %v4202_v63  ;;  %3765 = vmatprep.subr.bf16.mxu0 %v3764_v0  ;;  %v3784_v63 = vpack.c.bf16 %v845_v57, %v841_v56  ;;  %v840_v0 = vld [vmem:[%s9133_s1 + $0x1900] sm:$0xff]  ;;  %v883_v56 = vld [vmem:[%s9133_s1 + $0x1a58] sm:$0xff]  ;;  %v4242_v24 = vpack.c.bf16 %v878_v53, %v874_v49  ;;  %v918_v49 = vld [vmem:[%s9133_s1 + $0x1b70] sm:$0xff] }
 0x180   :  { %4205 = vmatprep.subr.bf16.mxu1 %v4204_v4  ;;  %v846_v4 = vld [vmem:[%s9133_s1 + $0x1930] sm:$0xff]  ;;  %v3786_v8 = vpack.c.bf16 %v844_v1, %v840_v0  ;;  %v887_v57 = vld [vmem:[%s9133_s1 + $0x1a78] sm:$0xff] }
 0x181   :  { %v882_v0 = vld [vmem:[%s9133_s1 + $0x1a50] sm:$0xff]  ;;  %v4244_v1 = vpack.c.bf16 %v887_v57, %v883_v56  ;;  %v2037_v56 = vld [vmem:[%s9135_s3 + $0x8] sm:$0xff]  ;;  %v920_v57 = vld [vmem:[%s9133_s1 + $0x1b80] sm:$0xf] }
 0x182   :  { %3767 = vmatpush1.bf16.msra.mxu0 %v3766_v45  ;;  %v4226_v45 = vpack.c.bf16 %v846_v4, %v842_v2  ;;  %v886_v2 = vld [vmem:[%s9133_s1 + $0x1a70] sm:$0xff]  ;;  %v893_v4 = vld [vmem:[%s9133_s1 + $0x1aa8] sm:$0xff] }
 0x183   :  { %4207 = vmatpush1.bf16.msra.mxu1 %v4206_v9  ;;  %3769 = vmatprep.subr.bf16.mxu0 %v3768_v10  ;;  %v3788_v9 = vpack.c.bf16 %v853_v6, %v849_v5  ;;  %v848_v10 = vld [vmem:[%s9133_s1 + $0x1940] sm:$0xff]  ;;  %v891_v5 = vld [vmem:[%s9133_s1 + $0x1a98] sm:$0xff]  ;;  %v4246_v7 = vpack.c.bf16 %v886_v2, %v882_v0  ;;  %v2038_v0 = vld [vmem:[%s9135_s3 + $0x10] sm:$0xff] }
 0x184   :  { %4209 = vmatprep.subr.bf16.mxu1 %v4208_v16  ;;  %v854_v16 = vld [vmem:[%s9133_s1 + $0x1970] sm:$0xff]  ;;  %v3790_v20 = vpack.c.bf16 %v852_v13, %v848_v10  ;;  %v895_v6 = vld [vmem:[%s9133_s1 + $0x1ab8] sm:$0xff]  ;;  %v2049_v2 = vld [vmem:[%s9135_s3 + $0x68] sm:$0xff] }
 0x185   :  { %1458 = vmatmul.mubr.f32.vlgmr.msra.gmra.mrb[0].mxu0 %v6890_v12  ;;  %v890_v10 = vld [vmem:[%s9133_s1 + $0x1a90] sm:$0xff]  ;;  %v4248_v13 = vpack.c.bf16 %v895_v6, %v891_v5  ;;  %v2051_v6 = vld [vmem:[%s9135_s3 + $0x78] sm:$0xff] }
 0x186   :  { %3771 = vmatpush1.bf16.msra.mxu0 %v3770_v21  ;;  %1955 = vmatmul.mubr.f32.vlgmr.msra.gmra.mrb[0].mxu1 %v6890_v12  ;;  %v830_v12 = vld [vmem:[%s9133_s1 + $0x18b0] sm:$0xff]  ;;  %v4230_v21 = vpack.c.bf16 %v854_v16, %v850_v14  ;;  %v901_v16 = vld [vmem:[%s9133_s1 + $0x1ae8] sm:$0xff] }
 0x187   :  { %4211 = vmatpush1.bf16.msra.mxu1 %v4210_v22  ;;  %3773 = vmatprep.subr.bf16.mxu0 %v3772_v23  ;;  %v4218_v25 = vpack.c.bf16 %v830_v12, %v826_v41  ;;  %v3792_v22 = vpack.c.bf16 %v861_v18, %v857_v17  ;;  %v856_v23 = vld [vmem:[%s9133_s1 + $0x1980] sm:$0xff]  ;;  %v870_v41 = vld [vmem:[%s9133_s1 + $0x19f0] sm:$0xff]  ;;  %v877_v12 = vld [vmem:[%s9133_s1 + $0x1a28] sm:$0xff] }
 0x188   :  { %4213 = vmatprep.subr.bf16.mxu1 %v4212_v29  ;;  %3356 = vmatprep.mubr.msk.f32.mxu0 %vm1022_vm0, %v1008_v33  ;;  %v862_v29 = vld [vmem:[%s9133_s1 + $0x19b0] sm:$0xff]  ;;  %v3794_v34 = vpack.c.bf16 %v860_v26, %v856_v23  ;;  %v4238_v46 = vpack.c.bf16 %v870_v41, %v866_v38  ;;  %v899_v17 = vld [vmem:[%s9133_s1 + $0x1ad8] sm:$0xff]  ;;  %v917_v41 = vld [vmem:[%s9133_s1 + $0x1b68] sm:$0xff] }
 0x189   :  { %3359 = vmatprep.mubr.msk.f32.mxu1 %vm1022_vm0, %v1008_v33  ;;  %v871_v33 = vld [vmem:[%s9133_s1 + $0x19f8] sm:$0xff]  ;;  %v4234_v62 = vpack.c.bf16 %v862_v29, %v858_v27  ;;  %v894_v14 = vld [vmem:[%s9133_s1 + $0x1ab0] sm:$0xff]  ;;  %v909_v29 = vld [vmem:[%s9133_s1 + $0x1b28] sm:$0xff] }
 0x18a   :  { %3775 = vmatpush1.bf16.msra.mxu0 %v3774_v35  ;;  %v3796_v35 = vpack.c.bf16 %v869_v31, %v865_v30  ;;  %v4236_v40 = vpack.c.bf16 %v871_v33, %v867_v32  ;;  %v903_v18 = vld [vmem:[%s9133_s1 + $0x1af8] sm:$0xff]  ;;  %v4250_v19 = vpack.c.bf16 %v894_v14, %v890_v10  ;;  %v898_v23 = vld [vmem:[%s9133_s1 + $0x1ad0] sm:$0xff]  ;;  %v2048_v10 = vld [vmem:[%s9135_s3 + $0x60] sm:$0xff] }
 0x18b   :  { %4215 = vmatpush1.bf16.msra.mxu1 %v4214_v36  ;;  %3777 = vmatprep.subr.bf16.mxu0 %v3776_v37  ;;  %v864_v36 = vld [vmem:[%s9133_s1 + $0x19c0] sm:$0xff]  ;;  %v4252_v26 = vpack.c.bf16 %v903_v18, %v899_v17  ;;  %v902_v27 = vld [vmem:[%s9133_s1 + $0x1af0] sm:$0xff]  ;;  %v907_v30 = vld [vmem:[%s9133_s1 + $0x1b18] sm:$0xff] }
 0x18c   :  { %4217 = vmatprep.subr.bf16.mxu1 %v4216_v42  ;;  %v868_v37 = vld [vmem:[%s9133_s1 + $0x19e0] sm:$0xff]  ;;  %v873_v42 = vld [vmem:[%s9133_s1 + $0x1a08] sm:$0xff]  ;;  %v911_v31 = vld [vmem:[%s9133_s1 + $0x1b38] sm:$0xff]  ;;  %v4254_v33 = vpack.c.bf16 %v902_v27, %v898_v23 }
 0x18d   :  { %v3798_v39 = vpack.c.bf16 %v868_v37, %v864_v36  ;;  %v906_v36 = vld [vmem:[%s9133_s1 + $0x1b10] sm:$0xff]  ;;  %v4256_v37 = vpack.c.bf16 %v911_v31, %v907_v30  ;;  %v2061_v17 = vld [vmem:[%s9135_s3 + $0xc8] sm:$0xff]  ;;  %v2067_v18 = vld [vmem:[%s9135_s3 + $0xf8] sm:$0xff] }
 0x18e   :  { %3779 = vmatpush1.bf16.msra.mxu0 %v3778_v47  ;;  %v3800_v47 = vpack.c.bf16 %v877_v12, %v873_v42  ;;  %v910_v38 = vld [vmem:[%s9133_s1 + $0x1b30] sm:$0xff]  ;;  %v915_v42 = vld [vmem:[%s9133_s1 + $0x1b58] sm:$0xff] }
 0x18f   :  { %4219 = vmatpush1.bf16.msra.mxu1 %v4218_v25  ;;  %3781 = vmatprep.subr.bf16.mxu0 %v3780_v48  ;;  %v872_v25 = vld [vmem:[%s9133_s1 + $0x1a00] sm:$0xff]  ;;  %v919_v12 = vld [vmem:[%s9133_s1 + $0x1b78] sm:$0xff]  ;;  %v4258_v44 = vpack.c.bf16 %v910_v38, %v906_v36  ;;  %v2050_v14 = vld [vmem:[%s9135_s3 + $0x70] sm:$0xff] }
 0x190   :  { %4221 = vmatprep.subr.bf16.mxu1 %v4220_v54  ;;  %v876_v48 = vld [vmem:[%s9133_s1 + $0x1a20] sm:$0xff]  ;;  %v881_v54 = vld [vmem:[%s9133_s1 + $0x1a48] sm:$0xff]  ;;  %v2066_v23 = vld [vmem:[%s9135_s3 + $0xf0] sm:$0xff] }
 0x191   :  { %v3802_v58 = vpack.c.bf16 %v876_v48, %v872_v25  ;;  %v4260_v25 = vpack.c.bf16 %v919_v12, %v915_v42  ;;  %v914_v48 = vld [vmem:[%s9133_s1 + $0x1b50] sm:$0xff]  ;;  %v2079_v30 = vld [vmem:[%s9135_s3 + $0x158] sm:$0xff] }
 0x192   :  { %3783 = vmatpush1.bf16.msra.mxu0 %v3782_v59  ;;  %v3804_v59 = vpack.c.bf16 %v885_v55, %v881_v54  ;;  %v4262_v53 = vpack.c.bf16 %v918_v49, %v914_v48  ;;  %v921_v54 = vld [vmem:[%s9133_s1 + $0x1b88] sm:$0xf]  ;;  %v923_v55 = vld [vmem:[%s9133_s1 + $0x1b98] sm:$0xf]  ;;  %v2078_v36 = vld [vmem:[%s9135_s3 + $0x150] sm:$0xff] }
 0x193   :  { %4223 = vmatpush1.bf16.msra.mxu1 %v4222_v60  ;;  %3785 = vmatprep.subr.bf16.mxu0 %v3784_v63  ;;  %v880_v60 = vld [vmem:[%s9133_s1 + $0x1a40] sm:$0xff]  ;;  %v2075_v31 = vld [vmem:[%s9135_s3 + $0x138] sm:$0xff]  ;;  %v2086_v48 = vld [vmem:[%s9135_s3 + $0x190] sm:$0xff] }
 0x194   :  { %4225 = vmatprep.subr.bf16.mxu1 %v4224_v3  ;;  %v884_v63 = vld [vmem:[%s9133_s1 + $0x1a60] sm:$0xff]  ;;  %v889_v3 = vld [vmem:[%s9133_s1 + $0x1a88] sm:$0xff]  ;;  %v2091_v42 = vld [vmem:[%s9135_s3 + $0x1b8] sm:$0xff] }
 0x195   :  { %v3806_v51 = vpack.c.bf16 %v884_v63, %v880_v60  ;;  %v2036_v60 = vld [vmem:[%s9135_s3] sm:$0xff]  ;;  %v2042_v63 = vld [vmem:[%s9135_s3 + $0x30] sm:$0xff]  ;;  %v2087_v12 = vld [vmem:[%s9135_s3 + $0x198] sm:$0xff] }
 0x196   :  { %3787 = vmatpush1.bf16.msra.mxu0 %v3786_v8  ;;  %v3808_v8 = vpack.c.bf16 %v893_v4, %v889_v3  ;;  %v2055_v3 = vld [vmem:[%s9135_s3 + $0x98] sm:$0xff]  ;;  %v922_v4 = vld [vmem:[%s9133_s1 + $0x1b90] sm:$0xf] }
 0x197   :  { %4227 = vmatpush1.bf16.msra.mxu1 %v4226_v45  ;;  %3789 = vmatprep.subr.bf16.mxu0 %v3788_v9  ;;  %v888_v45 = vld [vmem:[%s9133_s1 + $0x1a80] sm:$0xff] }
 0x198   :  { %4229 = vmatprep.subr.bf16.mxu1 %v4228_v15  ;;  %v892_v9 = vld [vmem:[%s9133_s1 + $0x1aa0] sm:$0xff]  ;;  %v897_v15 = vld [vmem:[%s9133_s1 + $0x1ac8] sm:$0xff] }
 0x199   :  { %v3810_v11 = vpack.c.bf16 %v892_v9, %v888_v45  ;;  %v4268_v9 = vpack.c.bf16 %v2055_v3, %v2049_v2  ;;  %v2109_v2 = vld [vmem:[%s9135_s3 + $0x248] sm:$0xff]  ;;  %v2115_v3 = vld [vmem:[%s9135_s3 + $0x278] sm:$0xff] }
 0x19a   :  { %3791 = vmatpush1.bf16.msra.mxu0 %v3790_v20  ;;  %v3812_v20 = vpack.c.bf16 %v901_v16, %v897_v15  ;;  %v2056_v16 = vld [vmem:[%s9135_s3 + $0xa0] sm:$0xff] }
 0x19b   :  { %4231 = vmatpush1.bf16.msra.mxu1 %v4230_v21  ;;  %3793 = vmatprep.subr.bf16.mxu0 %v3792_v22  ;;  %v896_v21 = vld [vmem:[%s9133_s1 + $0x1ac0] sm:$0xff] }
 0x19c   :  { %4233 = vmatprep.subr.bf16.mxu1 %v4232_v28  ;;  %v900_v22 = vld [vmem:[%s9133_s1 + $0x1ae0] sm:$0xff]  ;;  %v905_v28 = vld [vmem:[%s9133_s1 + $0x1b08] sm:$0xff] }
 0x19d   :  { %v3814_v32 = vpack.c.bf16 %v900_v22, %v896_v21  ;;  %v4366_v21 = vpack.c.bf16 %v2056_v16, %v2050_v14  ;;  %v4272_v22 = vpack.c.bf16 %v2067_v18, %v2061_v17  ;;  %v2121_v14 = vld [vmem:[%s9135_s3 + $0x2a8] sm:$0xff]  ;;  %v2123_v16 = vld [vmem:[%s9135_s3 + $0x2b8] sm:$0xff] }
 0x19e   :  { %3795 = vmatpush1.bf16.msra.mxu0 %v3794_v34  ;;  %v3816_v34 = vpack.c.bf16 %v909_v29, %v905_v28  ;;  %v2068_v28 = vld [vmem:[%s9135_s3 + $0x100] sm:$0xff]  ;;  %v2073_v29 = vld [vmem:[%s9135_s3 + $0x128] sm:$0xff] }
 0x19f   :  { %4235 = vmatpush1.bf16.msra.mxu1 %v4234_v62  ;;  %3797 = vmatprep.subr.bf16.mxu0 %v3796_v35  ;;  %v904_v62 = vld [vmem:[%s9133_s1 + $0x1b00] sm:$0xff]  ;;  %v2129_v17 = vld [vmem:[%s9135_s3 + $0x2e8] sm:$0xff] }
 0x1a0   :  { %4237 = vmatprep.subr.bf16.mxu1 %v4236_v40  ;;  %v908_v35 = vld [vmem:[%s9133_s1 + $0x1b20] sm:$0xff]  ;;  %v913_v40 = vld [vmem:[%s9133_s1 + $0x1b48] sm:$0xff] }
 0x1a1   :  { %v3818_v43 = vpack.c.bf16 %v908_v35, %v904_v62  ;;  %v4276_v62 = vpack.c.bf16 %v2079_v30, %v2073_v29  ;;  %v2072_v35 = vld [vmem:[%s9135_s3 + $0x120] sm:$0xff]  ;;  %v2141_v29 = vld [vmem:[%s9135_s3 + $0x348] sm:$0xff] }
 0x1a2   :  { %3799 = vmatpush1.bf16.msra.mxu0 %v3798_v39  ;;  %v3820_v39 = vpack.c.bf16 %v917_v41, %v913_v40  ;;  %v2080_v40 = vld [vmem:[%s9135_s3 + $0x160] sm:$0xff]  ;;  %v2085_v41 = vld [vmem:[%s9135_s3 + $0x188] sm:$0xff] }
 0x1a3   :  { %4239 = vmatpush1.bf16.msra.mxu1 %v4238_v46  ;;  %3801 = vmatprep.subr.bf16.mxu0 %v3800_v47  ;;  %v912_v46 = vld [vmem:[%s9133_s1 + $0x1b40] sm:$0xff] }
 0x1a4   :  { %4241 = vmatprep.subr.bf16.mxu1 %v4240_v52  ;;  %v916_v47 = vld [vmem:[%s9133_s1 + $0x1b60] sm:$0xff] }
 0x1a5   :  { %v3822_v52 = vpack.c.bf16 %v916_v47, %v912_v46  ;;  %v4280_v46 = vpack.c.bf16 %v2091_v42, %v2085_v41  ;;  %v2084_v47 = vld [vmem:[%s9135_s3 + $0x180] sm:$0xff]  ;;  %v2153_v41 = vld [vmem:[%s9135_s3 + $0x3a8] sm:$0xff] }
 0x1a6   :  { %3803 = vmatpush1.bf16.msra.mxu0 %v3802_v58  ;;  %v2043_v58 = vld [vmem:[%s9135_s3 + $0x38] sm:$0xff] }
 0x1a7   :  { %4243 = vmatpush1.bf16.msra.mxu1 %v4242_v24  ;;  %3805 = vmatprep.subr.bf16.mxu0 %v3804_v59  ;;  %v2039_v24 = vld [vmem:[%s9135_s3 + $0x18] sm:$0xff]  ;;  %v2045_v59 = vld [vmem:[%s9135_s3 + $0x48] sm:$0xff]  ;;  %v4264_v5 = vpack.c.bf16 %v2043_v58, %v2037_v56 }
 0x1a8   :  { %4245 = vmatprep.subr.bf16.mxu1 %v4244_v1  ;;  %v2044_v1 = vld [vmem:[%s9135_s3 + $0x40] sm:$0xff]  ;;  %v2105_v56 = vld [vmem:[%s9135_s3 + $0x228] sm:$0xff] }
 0x1a9   :  { %v4362_v45 = vpack.c.bf16 %v2044_v1, %v2038_v0  ;;  %v2104_v1 = vld [vmem:[%s9135_s3 + $0x220] sm:$0xff] }
 0x1aa   :  { %3807 = vmatpush1.bf16.msra.mxu0 %v3806_v51  ;;  %v2057_v51 = vld [vmem:[%s9135_s3 + $0xa8] sm:$0xff] }
 0x1ab   :  { %4247 = vmatpush1.bf16.msra.mxu1 %v4246_v7  ;;  %3809 = vmatprep.subr.bf16.mxu0 %v3808_v8  ;;  %v4360_v7 = vpack.c.bf16 %v2045_v59, %v2039_v24  ;;  %v4266_v8 = vpack.c.bf16 %v2042_v63, %v2036_v60  ;;  %v4364_v15 = vpack.c.bf16 %v2057_v51, %v2051_v6  ;;  %v2096_v59 = vld [vmem:[%s9135_s3 + $0x1e0] sm:$0xff]  ;;  %v2102_v60 = vld [vmem:[%s9135_s3 + $0x210] sm:$0xff] }
 0x1ac   :  { %4249 = vmatprep.subr.bf16.mxu1 %v4248_v13  ;;  %v2054_v13 = vld [vmem:[%s9135_s3 + $0x90] sm:$0xff]  ;;  %v4286_v6 = vpack.c.bf16 %v2102_v60, %v2096_v59  ;;  %v2164_v60 = vld [vmem:[%s9135_s3 + $0x400] sm:$0xff] }
 0x1ad   :  { %v2098_v63 = vld [vmem:[%s9135_s3 + $0x1f0] sm:$0xff] }
 0x1ae   :  { %3811 = vmatpush1.bf16.msra.mxu0 %v3810_v11  ;;  %v2063_v11 = vld [vmem:[%s9135_s3 + $0xd8] sm:$0xff]  ;;  %v4382_v51 = vpack.c.bf16 %v2104_v1, %v2098_v63  ;;  %v2169_v63 = vld [vmem:[%s9135_s3 + $0x428] sm:$0xff] }
 0x1af   :  { %4251 = vmatpush1.bf16.msra.mxu1 %v4250_v19  ;;  %3813 = vmatprep.subr.bf16.mxu0 %v3812_v20  ;;  %v2069_v19 = vld [vmem:[%s9135_s3 + $0x108] sm:$0xff]  ;;  %v4270_v20 = vpack.c.bf16 %v2054_v13, %v2048_v10  ;;  %v2116_v13 = vld [vmem:[%s9135_s3 + $0x280] sm:$0xff]  ;;  %v2171_v1 = vld [vmem:[%s9135_s3 + $0x438] sm:$0xff] }
 0x1b0   :  { %4253 = vmatprep.subr.bf16.mxu1 %v4252_v26  ;;  %v2062_v26 = vld [vmem:[%s9135_s3 + $0xd0] sm:$0xff]  ;;  %v4368_v27 = vpack.c.bf16 %v2069_v19, %v2063_v11 }
 0x1b2   :  { %3815 = vmatpush1.bf16.msra.mxu0 %v3814_v32  ;;  %v2081_v32 = vld [vmem:[%s9135_s3 + $0x168] sm:$0xff] }
 0x1b3   :  { %4255 = vmatpush1.bf16.msra.mxu1 %v4254_v33  ;;  %3817 = vmatprep.subr.bf16.mxu0 %v3816_v34  ;;  %v4370_v34 = vpack.c.bf16 %v2068_v28, %v2062_v26  ;;  %v4372_v38 = vpack.c.bf16 %v2081_v32, %v2075_v31  ;;  %v2133_v26 = vld [vmem:[%s9135_s3 + $0x308] sm:$0xff]  ;;  %v2135_v28 = vld [vmem:[%s9135_s3 + $0x318] sm:$0xff] }
 0x1b4   :  { %4257 = vmatprep.subr.bf16.mxu1 %v4256_v37  ;;  %v2074_v37 = vld [vmem:[%s9135_s3 + $0x130] sm:$0xff] }
 0x1b6   :  { %3819 = vmatpush1.bf16.msra.mxu0 %v3818_v43  ;;  %v2093_v43 = vld [vmem:[%s9135_s3 + $0x1c8] sm:$0xff] }
 0x1b7   :  { %4259 = vmatpush1.bf16.msra.mxu1 %v4258_v44  ;;  %3821 = vmatprep.subr.bf16.mxu0 %v3820_v39  ;;  %v4278_v44 = vpack.c.bf16 %v2078_v36, %v2072_v35  ;;  %v4374_v39 = vpack.c.bf16 %v2080_v40, %v2074_v37  ;;  %v4376_v49 = vpack.c.bf16 %v2093_v43, %v2087_v12  ;;  %v2140_v36 = vld [vmem:[%s9135_s3 + $0x340] sm:$0xff]  ;;  %v2145_v37 = vld [vmem:[%s9135_s3 + $0x368] sm:$0xff]  ;;  %v2147_v40 = vld [vmem:[%s9135_s3 + $0x378] sm:$0xff] }
 0x1b8   :  { %4261 = vmatprep.subr.bf16.mxu1 %v4260_v25  ;;  %v2090_v25 = vld [vmem:[%s9135_s3 + $0x1b0] sm:$0xff]  ;;  %v4392_v35 = vpack.c.bf16 %v2141_v29, %v2135_v28 }
 0x1ba   :  { %3823 = vmatpush1.bf16.msra.mxu0 %v3822_v52  ;;  %v2092_v52 = vld [vmem:[%s9135_s3 + $0x1c0] sm:$0xff] }
 0x1bb   :  { %4263 = vmatpush1.bf16.msra.mxu1 %v4262_v53  ;;  %3354 = vmatprep.subr.msk.mxu0 %vm1025_vm1, %v921_v54  ;;  %v2097_v53 = vld [vmem:[%s9135_s3 + $0x1e8] sm:$0xff]  ;;  %v2103_v54 = vld [vmem:[%s9135_s3 + $0x218] sm:$0xff]  ;;  %v4378_v58 = vpack.c.bf16 %v2092_v52, %v2086_v48 }
 0x1bc   :  { %3357 = vmatprep.subr.msk.mxu1 %vm1025_vm1, %v923_v55  ;;  %v2099_v55 = vld [vmem:[%s9135_s3 + $0x1f8] sm:$0xff]  ;;  %v4284_v24 = vpack.c.bf16 %v2103_v54, %v2097_v53  ;;  %v2157_v48 = vld [vmem:[%s9135_s3 + $0x3c8] sm:$0xff] }
 0x1bd   :  { %v4380_v0 = vpack.c.bf16 %v2105_v56, %v2099_v55  ;;  %v2159_v52 = vld [vmem:[%s9135_s3 + $0x3d8] sm:$0xff]  ;;  %v2165_v53 = vld [vmem:[%s9135_s3 + $0x408] sm:$0xff] }
 0x1be   :  { %3355 = vmatpush1.msk.msra.mxu0 %vm1025_vm1, %v920_v57  ;;  %v4282_v57 = vpack.c.bf16 %v2090_v25, %v2084_v47  ;;  %v4396_v47 = vpack.c.bf16 %v2153_v41, %v2147_v40  ;;  %v2152_v25 = vld [vmem:[%s9135_s3 + $0x3a0] sm:$0xff]  ;;  %v4400_v59 = vpack.c.bf16 %v2165_v53, %v2159_v52  ;;  %v2225_v53 = vld [vmem:[%s9135_s3 + $0x5e8] sm:$0xff] }
 0x1bf   :  { %3358 = vmatpush1.msk.msra.mxu1 %vm1025_vm1, %v922_v4  ;;  %1529 = vmatmul.mubr.f32.vlgmr.msra.gmra.mrb[0].mxu0 %v7289_v50  ;;  %v2111_v4 = vld [vmem:[%s9135_s3 + $0x258] sm:$0xff] }
 0x1c0   :  { %2026 = vmatmul.mubr.f32.vlgmr.msra.gmra.mrb[0].mxu1 %v7289_v50  ;;  %4265 = vmatprep.subr.bf16.mxu0 %v4264_v5  ;;  %v2060_v50 = vld [vmem:[%s9135_s3 + $0xc0] sm:$0xff]  ;;  %v2117_v5 = vld [vmem:[%s9135_s3 + $0x288] sm:$0xff] }
 0x1c1   :  { %4361 = vmatprep.subr.bf16.mxu1 %v4360_v7  ;;  %4267 = vmatpush1.bf16.msra.mxu0 %v4266_v8  ;;  %v4274_v33 = vpack.c.bf16 %v2066_v23, %v2060_v50  ;;  %v4288_v7 = vpack.c.bf16 %v2115_v3, %v2109_v2  ;;  %v2108_v8 = vld [vmem:[%s9135_s3 + $0x240] sm:$0xff]  ;;  %v4384_v10 = vpack.c.bf16 %v2117_v5, %v2111_v4  ;;  %v2177_v2 = vld [vmem:[%s9135_s3 + $0x468] sm:$0xff] }
 0x1c2   :  { %4363 = vmatpush1.bf16.msra.mxu1 %v4362_v45  ;;  %4269 = vmatprep.subr.bf16.mxu0 %v4268_v9  ;;  %v2114_v45 = vld [vmem:[%s9135_s3 + $0x270] sm:$0xff]  ;;  %v4388_v50 = vpack.c.bf16 %v2129_v17, %v2123_v16  ;;  %v2128_v23 = vld [vmem:[%s9135_s3 + $0x2e0] sm:$0xff] }
 0x1c3   :  { %4365 = vmatprep.subr.bf16.mxu1 %v4364_v15  ;;  %v2110_v9 = vld [vmem:[%s9135_s3 + $0x250] sm:$0xff]  ;;  %v2127_v15 = vld [vmem:[%s9135_s3 + $0x2d8] sm:$0xff]  ;;  %v4290_v18 = vpack.c.bf16 %v2114_v45, %v2108_v8  ;;  %v4404_v8 = vpack.c.bf16 %v2177_v2, %v2171_v1  ;;  %v2176_v45 = vld [vmem:[%s9135_s3 + $0x460] sm:$0xff] }
 0x1c4   :  { %v4386_v11 = vpack.c.bf16 %v2116_v13, %v2110_v9  ;;  %v4292_v19 = vpack.c.bf16 %v2127_v15, %v2121_v14  ;;  %v2181_v9 = vld [vmem:[%s9135_s3 + $0x488] sm:$0xff]  ;;  %v2183_v13 = vld [vmem:[%s9135_s3 + $0x498] sm:$0xff] }
 0x1c5   :  { %4271 = vmatpush1.bf16.msra.mxu0 %v4270_v20  ;;  %v2120_v20 = vld [vmem:[%s9135_s3 + $0x2a0] sm:$0xff]  ;;  %v2189_v14 = vld [vmem:[%s9135_s3 + $0x4c8] sm:$0xff] }
 0x1c6   :  { %4367 = vmatpush1.bf16.msra.mxu1 %v4366_v21  ;;  %4273 = vmatprep.subr.bf16.mxu0 %v4272_v22  ;;  %v2126_v21 = vld [vmem:[%s9135_s3 + $0x2d0] sm:$0xff]  ;;  %v2237_v2 = vld [vmem:[%s9135_s3 + $0x648] sm:$0xff] }
 0x1c7   :  { %4369 = vmatprep.subr.bf16.mxu1 %v4368_v27  ;;  %v2122_v22 = vld [vmem:[%s9135_s3 + $0x2b0] sm:$0xff]  ;;  %v2139_v27 = vld [vmem:[%s9135_s3 + $0x338] sm:$0xff]  ;;  %v4294_v30 = vpack.c.bf16 %v2126_v21, %v2120_v20  ;;  %v4408_v20 = vpack.c.bf16 %v2189_v14, %v2183_v13  ;;  %v2188_v21 = vld [vmem:[%s9135_s3 + $0x4c0] sm:$0xff] }
 0x1c8   :  { %v4390_v31 = vpack.c.bf16 %v2128_v23, %v2122_v22  ;;  %v4296_v32 = vpack.c.bf16 %v2139_v27, %v2133_v26  ;;  %v2193_v22 = vld [vmem:[%s9135_s3 + $0x4e8] sm:$0xff]  ;;  %v2195_v23 = vld [vmem:[%s9135_s3 + $0x4f8] sm:$0xff] }
 0x1c9   :  { %4275 = vmatpush1.bf16.msra.mxu0 %v4274_v33  ;;  %v2132_v33 = vld [vmem:[%s9135_s3 + $0x300] sm:$0xff]  ;;  %v2201_v26 = vld [vmem:[%s9135_s3 + $0x528] sm:$0xff] }
 0x1ca   :  { %4371 = vmatpush1.bf16.msra.mxu1 %v4370_v34  ;;  %4277 = vmatprep.subr.bf16.mxu0 %v4276_v62  ;;  %v2138_v34 = vld [vmem:[%s9135_s3 + $0x330] sm:$0xff] }
 0x1cb   :  { %4373 = vmatprep.subr.bf16.mxu1 %v4372_v38  ;;  %v2134_v62 = vld [vmem:[%s9135_s3 + $0x310] sm:$0xff]  ;;  %v2151_v38 = vld [vmem:[%s9135_s3 + $0x398] sm:$0xff]  ;;  %v4298_v42 = vpack.c.bf16 %v2138_v34, %v2132_v33  ;;  %v4412_v33 = vpack.c.bf16 %v2201_v26, %v2195_v23  ;;  %v2200_v34 = vld [vmem:[%s9135_s3 + $0x520] sm:$0xff] }
 0x1cc   :  { %v4394_v12 = vpack.c.bf16 %v2140_v36, %v2134_v62  ;;  %v4300_v43 = vpack.c.bf16 %v2151_v38, %v2145_v37  ;;  %v2205_v62 = vld [vmem:[%s9135_s3 + $0x548] sm:$0xff]  ;;  %v2207_v36 = vld [vmem:[%s9135_s3 + $0x558] sm:$0xff] }
 0x1cd   :  { %4279 = vmatpush1.bf16.msra.mxu0 %v4278_v44  ;;  %v2144_v44 = vld [vmem:[%s9135_s3 + $0x360] sm:$0xff]  ;;  %v2213_v37 = vld [vmem:[%s9135_s3 + $0x588] sm:$0xff] }
 0x1ce   :  { %4375 = vmatpush1.bf16.msra.mxu1 %v4374_v39  ;;  %4281 = vmatprep.subr.bf16.mxu0 %v4280_v46  ;;  %v2150_v39 = vld [vmem:[%s9135_s3 + $0x390] sm:$0xff]  ;;  %v2249_v23 = vld [vmem:[%s9135_s3 + $0x6a8] sm:$0xff] }
 0x1cf   :  { %4377 = vmatprep.subr.bf16.mxu1 %v4376_v49  ;;  %v2146_v46 = vld [vmem:[%s9135_s3 + $0x370] sm:$0xff]  ;;  %v2163_v49 = vld [vmem:[%s9135_s3 + $0x3f8] sm:$0xff]  ;;  %v4302_v54 = vpack.c.bf16 %v2150_v39, %v2144_v44  ;;  %v2212_v39 = vld [vmem:[%s9135_s3 + $0x580] sm:$0xff] }
 0x1d0   :  { %v4398_v55 = vpack.c.bf16 %v2152_v25, %v2146_v46  ;;  %v4304_v56 = vpack.c.bf16 %v2163_v49, %v2157_v48  ;;  %v2206_v44 = vld [vmem:[%s9135_s3 + $0x550] sm:$0xff]  ;;  %v2217_v25 = vld [vmem:[%s9135_s3 + $0x5a8] sm:$0xff]  ;;  %v2223_v48 = vld [vmem:[%s9135_s3 + $0x5d8] sm:$0xff] }
 0x1d1   :  { %4283 = vmatpush1.bf16.msra.mxu0 %v4282_v57  ;;  %v2156_v57 = vld [vmem:[%s9135_s3 + $0x3c0] sm:$0xff]  ;;  %v2219_v49 = vld [vmem:[%s9135_s3 + $0x5b8] sm:$0xff]  ;;  %v4324_v52 = vpack.c.bf16 %v2223_v48, %v2217_v25  ;;  %v2265_v25 = vld [vmem:[%s9135_s3 + $0x728] sm:$0xff] }
 0x1d2   :  { %4379 = vmatpush1.bf16.msra.mxu1 %v4378_v58  ;;  %4285 = vmatprep.subr.bf16.mxu0 %v4284_v24  ;;  %v2162_v58 = vld [vmem:[%s9135_s3 + $0x3f0] sm:$0xff]  ;;  %v2271_v48 = vld [vmem:[%s9135_s3 + $0x758] sm:$0xff] }
 0x1d3   :  { %4381 = vmatprep.subr.bf16.mxu1 %v4380_v0  ;;  %v2158_v24 = vld [vmem:[%s9135_s3 + $0x3d0] sm:$0xff]  ;;  %v2175_v0 = vld [vmem:[%s9135_s3 + $0x458] sm:$0xff]  ;;  %v4306_v3 = vpack.c.bf16 %v2162_v58, %v2156_v57 }
 0x1d4   :  { %v4402_v4 = vpack.c.bf16 %v2164_v60, %v2158_v24  ;;  %v4308_v5 = vpack.c.bf16 %v2175_v0, %v2169_v63  ;;  %v2218_v58 = vld [vmem:[%s9135_s3 + $0x5b0] sm:$0xff]  ;;  %v2224_v24 = vld [vmem:[%s9135_s3 + $0x5e0] sm:$0xff]  ;;  %v2229_v60 = vld [vmem:[%s9135_s3 + $0x608] sm:$0xff] }
 0x1d5   :  { %4287 = vmatpush1.bf16.msra.mxu0 %v4286_v6  ;;  %v2168_v6 = vld [vmem:[%s9135_s3 + $0x420] sm:$0xff]  ;;  %v2235_v63 = vld [vmem:[%s9135_s3 + $0x638] sm:$0xff] }
 0x1d6   :  { %4383 = vmatpush1.bf16.msra.mxu1 %v4382_v51  ;;  %4289 = vmatprep.subr.bf16.mxu0 %v4288_v7  ;;  %v2174_v51 = vld [vmem:[%s9135_s3 + $0x450] sm:$0xff]  ;;  %v2231_v0 = vld [vmem:[%s9135_s3 + $0x618] sm:$0xff]  ;;  %v4328_v1 = vpack.c.bf16 %v2235_v63, %v2229_v60  ;;  %v2277_v60 = vld [vmem:[%s9135_s3 + $0x788] sm:$0xff] }
 0x1d7   :  { %4385 = vmatprep.subr.bf16.mxu1 %v4384_v10  ;;  %v2170_v7 = vld [vmem:[%s9135_s3 + $0x430] sm:$0xff]  ;;  %v2187_v10 = vld [vmem:[%s9135_s3 + $0x4b8] sm:$0xff]  ;;  %v4310_v15 = vpack.c.bf16 %v2174_v51, %v2168_v6  ;;  %v932_v6 = vsub.s32 1, %v5129_v61  ;;  %v940_v51 = vsub.s32 3, %v5129_v61 }
 0x1d8   :  { %v4406_v16 = vpack.c.bf16 %v2176_v45, %v2170_v7  ;;  %v4312_v17 = vpack.c.bf16 %v2187_v10, %v2181_v9  ;;  %v2228_v10 = vld [vmem:[%s9135_s3 + $0x600] sm:$0xff]  ;;  %v2283_v63 = vld [vmem:[%s9135_s3 + $0x7b8] sm:$0xff] }
 0x1d9   :  { %4291 = vmatpush1.bf16.msra.mxu0 %v4290_v18  ;;  %v2180_v18 = vld [vmem:[%s9135_s3 + $0x480] sm:$0xff] }
 0x1da   :  { %4387 = vmatpush1.bf16.msra.mxu1 %v4386_v11  ;;  %4293 = vmatprep.subr.bf16.mxu0 %v4292_v19  ;;  %v2186_v11 = vld [vmem:[%s9135_s3 + $0x4b0] sm:$0xff] }
 0x1db   :  { %4389 = vmatprep.subr.bf16.mxu1 %v4388_v50  ;;  %v2182_v19 = vld [vmem:[%s9135_s3 + $0x490] sm:$0xff]  ;;  %v2199_v50 = vld [vmem:[%s9135_s3 + $0x518] sm:$0xff]  ;;  %v4314_v27 = vpack.c.bf16 %v2186_v11, %v2180_v18  ;;  %v2236_v18 = vld [vmem:[%s9135_s3 + $0x640] sm:$0xff] }
 0x1dc   :  { %v4410_v28 = vpack.c.bf16 %v2188_v21, %v2182_v19  ;;  %v4316_v29 = vpack.c.bf16 %v2199_v50, %v2193_v22  ;;  %v2247_v22 = vld [vmem:[%s9135_s3 + $0x698] sm:$0xff] }
 0x1dd   :  { %4295 = vmatpush1.bf16.msra.mxu0 %v4294_v30  ;;  %v2192_v30 = vld [vmem:[%s9135_s3 + $0x4e0] sm:$0xff]  ;;  %v2243_v50 = vld [vmem:[%s9135_s3 + $0x678] sm:$0xff] }
 0x1de   :  { %4391 = vmatpush1.bf16.msra.mxu1 %v4390_v31  ;;  %4297 = vmatprep.subr.bf16.mxu0 %v4296_v32  ;;  %v2198_v31 = vld [vmem:[%s9135_s3 + $0x510] sm:$0xff] }
 0x1df   :  { %4393 = vmatprep.subr.bf16.mxu1 %v4392_v35  ;;  %v2194_v32 = vld [vmem:[%s9135_s3 + $0x4f0] sm:$0xff]  ;;  %v2211_v35 = vld [vmem:[%s9135_s3 + $0x578] sm:$0xff]  ;;  %v4318_v38 = vpack.c.bf16 %v2198_v31, %v2192_v30 }
 0x1e0   :  { %v4414_v40 = vpack.c.bf16 %v2200_v34, %v2194_v32  ;;  %v4320_v41 = vpack.c.bf16 %v2211_v35, %v2205_v62  ;;  %v2246_v30 = vld [vmem:[%s9135_s3 + $0x690] sm:$0xff]  ;;  %v2253_v34 = vld [vmem:[%s9135_s3 + $0x6c8] sm:$0xff]  ;;  %v4428_v35 = vpack.c.bf16 %v2249_v23, %v2243_v50  ;;  %v2296_v23 = vld [vmem:[%s9135_s3 + $0x820] sm:$0xff] }
 0x1e1   :  { %4299 = vmatpush1.bf16.msra.mxu0 %v4298_v42  ;;  %v2204_v42 = vld [vmem:[%s9135_s3 + $0x540] sm:$0xff]  ;;  %v2242_v32 = vld [vmem:[%s9135_s3 + $0x670] sm:$0xff] }
 0x1e2   :  { %4395 = vmatpush1.bf16.msra.mxu1 %v4394_v12  ;;  %4301 = vmatprep.subr.bf16.mxu0 %v4300_v43  ;;  %v2210_v12 = vld [vmem:[%s9135_s3 + $0x570] sm:$0xff]  ;;  %v4416_v43 = vpack.c.bf16 %v2213_v37, %v2207_v36  ;;  %v2259_v36 = vld [vmem:[%s9135_s3 + $0x6f8] sm:$0xff] }
 0x1e3   :  { %4397 = vmatprep.subr.bf16.mxu1 %v4396_v47  ;;  %v4322_v46 = vpack.c.bf16 %v2210_v12, %v2204_v42  ;;  %v4418_v47 = vpack.c.bf16 %v2212_v39, %v2206_v44  ;;  %v2255_v37 = vld [vmem:[%s9135_s3 + $0x6d8] sm:$0xff]  ;;  %v2252_v12 = vld [vmem:[%s9135_s3 + $0x6c0] sm:$0xff]  ;;  %v4336_v44 = vpack.c.bf16 %v2259_v36, %v2253_v34  ;;  %v2290_v50 = vld [vmem:[%s9135_s3 + $0x7f0] sm:$0xff] }
 0x1e4   :  { %v2300_v34 = vld [vmem:[%s9135_s3 + $0x840] sm:$0xff] }
 0x1e5   :  { %4303 = vmatpush1.bf16.msra.mxu0 %v4302_v54  ;;  %v2216_v54 = vld [vmem:[%s9135_s3 + $0x5a0] sm:$0xff] }
 0x1e6   :  { %4399 = vmatpush1.bf16.msra.mxu1 %v4398_v55  ;;  %4305 = vmatprep.subr.bf16.mxu0 %v4304_v56  ;;  %v2222_v55 = vld [vmem:[%s9135_s3 + $0x5d0] sm:$0xff]  ;;  %v4420_v56 = vpack.c.bf16 %v2225_v53, %v2219_v49  ;;  %v2267_v49 = vld [vmem:[%s9135_s3 + $0x738] sm:$0xff] }
 0x1e7   :  { %4401 = vmatprep.subr.bf16.mxu1 %v4400_v59  ;;  %v4326_v57 = vpack.c.bf16 %v2222_v55, %v2216_v54  ;;  %v4422_v59 = vpack.c.bf16 %v2224_v24, %v2218_v58  ;;  %v2264_v55 = vld [vmem:[%s9135_s3 + $0x720] sm:$0xff]  ;;  %v2266_v24 = vld [vmem:[%s9135_s3 + $0x730] sm:$0xff] }
 0x1e9   :  { %4307 = vmatpush1.bf16.msra.mxu0 %v4306_v3  ;;  %v4424_v3 = vpack.c.bf16 %v2237_v2, %v2231_v0  ;;  %v2279_v0 = vld [vmem:[%s9135_s3 + $0x798] sm:$0xff] }
 0x1ea   :  { %4403 = vmatpush1.bf16.msra.mxu1 %v4402_v4  ;;  %4309 = vmatprep.subr.bf16.mxu0 %v4308_v5  ;;  %v928_v4 = vsub.s32 0, %v5129_v61  ;;  %v8015_v5 = vld [vmem:[%s9134_s2] sm:$0xf] }
 0x1eb   :  { %4405 = vmatprep.subr.bf16.mxu1 %v4404_v8  ;;  %v933_v8 = vrot.slane %v8015_v5, %v932_v6  ;;  %v941_v45 = vrot.slane %v8015_v5, %v940_v51  ;;  %v2276_v51 = vld [vmem:[%s9135_s3 + $0x780] sm:$0xff] }
 0x1ec   :  { %v929_v7 = vrot.slane %v8015_v5, %v928_v4 }
 0x1ed   :  { %4311 = vmatpush1.bf16.msra.mxu0 %v4310_v15 }
 0x1ee   :  { %4407 = vmatpush1.bf16.msra.mxu1 %v4406_v16  ;;  %4313 = vmatprep.subr.bf16.mxu0 %v4312_v17  ;;  %v2234_v16 = vld [vmem:[%s9135_s3 + $0x630] sm:$0xff] }
 0x1ef   :  { %4409 = vmatprep.subr.bf16.mxu1 %v4408_v20  ;;  %v2230_v17 = vld [vmem:[%s9135_s3 + $0x610] sm:$0xff]  ;;  %v2241_v20 = vld [vmem:[%s9135_s3 + $0x668] sm:$0xff] }
 0x1f0   :  { %v4332_v62 = vpack.c.bf16 %v2247_v22, %v2241_v20  ;;  %v2294_v20 = vld [vmem:[%s9135_s3 + $0x810] sm:$0xff] }
 0x1f1   :  { %4315 = vmatpush1.bf16.msra.mxu0 %v4314_v27  ;;  %v4330_v27 = vpack.c.bf16 %v2234_v16, %v2228_v10  ;;  %v2284_v10 = vld [vmem:[%s9135_s3 + $0x7c0] sm:$0xff]  ;;  %v2291_v16 = vld [vmem:[%s9135_s3 + $0x7f8] sm:$0xff] }
 0x1f2   :  { %4411 = vmatpush1.bf16.msra.mxu1 %v4410_v28  ;;  %4317 = vmatprep.subr.bf16.mxu0 %v4316_v29  ;;  %v4426_v28 = vpack.c.bf16 %v2236_v18, %v2230_v17  ;;  %v2240_v29 = vld [vmem:[%s9135_s3 + $0x660] sm:$0xff]  ;;  %v2297_v17 = vld [vmem:[%s9135_s3 + $0x828] sm:$0xff] }
 0x1f3   :  { %4413 = vmatprep.subr.bf16.mxu1 %v4412_v33  ;;  %v2248_v33 = vld [vmem:[%s9135_s3 + $0x6a0] sm:$0xff]  ;;  %v4444_v22 = vpack.c.bf16 %v2297_v17, %v2291_v16 }
 0x1f4   :  { %v4430_v42 = vpack.c.bf16 %v2248_v33, %v2242_v32  ;;  %v4446_v33 = vpack.c.bf16 %v2296_v23, %v2290_v50  ;;  %v2764_v50 = vld [vmem:[%s9136_s4 + $0x20] sm:$0xff]  ;;  %v2766_v23 = vld [vmem:[%s9136_s4 + $0x30] sm:$0xff] }
 0x1f5   :  { %4319 = vmatpush1.bf16.msra.mxu0 %v4318_v38  ;;  %v2261_v38 = vld [vmem:[%s9135_s3 + $0x708] sm:$0xff] }
 0x1f6   :  { %4415 = vmatpush1.bf16.msra.mxu1 %v4414_v40  ;;  %4321 = vmatprep.subr.bf16.mxu0 %v4320_v41  ;;  %v4334_v41 = vpack.c.bf16 %v2246_v30, %v2240_v29  ;;  %v4432_v39 = vpack.c.bf16 %v2261_v38, %v2255_v37  ;;  %v2303_v29 = vld [vmem:[%s9135_s3 + $0x858] sm:$0xff]  ;;  %v2309_v30 = vld [vmem:[%s9135_s3 + $0x888] sm:$0xff]  ;;  %v2302_v37 = vld [vmem:[%s9135_s3 + $0x850] sm:$0xff] }
 0x1f7   :  { %4417 = vmatprep.subr.bf16.mxu1 %v4416_v43  ;;  %v2258_v43 = vld [vmem:[%s9135_s3 + $0x6f0] sm:$0xff]  ;;  %v4448_v36 = vpack.c.bf16 %v2309_v30, %v2303_v29  ;;  %v2308_v38 = vld [vmem:[%s9135_s3 + $0x880] sm:$0xff] }
 0x1f8   :  { %v4338_v53 = vpack.c.bf16 %v2258_v43, %v2252_v12  ;;  %v2315_v12 = vld [vmem:[%s9135_s3 + $0x8b8] sm:$0xff]  ;;  %v2321_v43 = vld [vmem:[%s9135_s3 + $0x8e8] sm:$0xff] }
 0x1f9   :  { %4323 = vmatpush1.bf16.msra.mxu0 %v4322_v46  ;;  %v2254_v46 = vld [vmem:[%s9135_s3 + $0x6d0] sm:$0xff] }
 0x1fa   :  { %4419 = vmatpush1.bf16.msra.mxu1 %v4418_v47  ;;  %4325 = vmatprep.subr.bf16.mxu0 %v4324_v52  ;;  %v2260_v47 = vld [vmem:[%s9135_s3 + $0x700] sm:$0xff]  ;;  %v2273_v52 = vld [vmem:[%s9135_s3 + $0x768] sm:$0xff] }
 0x1fb   :  { %4421 = vmatprep.subr.bf16.mxu1 %v4420_v56  ;;  %v4434_v54 = vpack.c.bf16 %v2260_v47, %v2254_v46  ;;  %v2270_v56 = vld [vmem:[%s9135_s3 + $0x750] sm:$0xff]  ;;  %v4436_v58 = vpack.c.bf16 %v2273_v52, %v2267_v49  ;;  %v4450_v46 = vpack.c.bf16 %v2308_v38, %v2302_v37  ;;  %v2312_v47 = vld [vmem:[%s9135_s3 + $0x8a0] sm:$0xff]  ;;  %v2773_v38 = vld [vmem:[%s9136_s4 + $0x68] sm:$0xff] }
 0x1fc   :  { %v4342_v2 = vpack.c.bf16 %v2270_v56, %v2264_v55  ;;  %v2318_v49 = vld [vmem:[%s9135_s3 + $0x8d0] sm:$0xff] }
 0x1fd   :  { %4327 = vmatpush1.bf16.msra.mxu0 %v4326_v57  ;;  %v4340_v57 = vpack.c.bf16 %v2271_v48, %v2265_v25  ;;  %v4452_v48 = vpack.c.bf16 %v2321_v43, %v2315_v12  ;;  %v2314_v52 = vld [vmem:[%s9135_s3 + $0x8b0] sm:$0xff]  ;;  %v4358_v55 = vpack.c.bf16 %v2318_v49, %v2312_v47  ;;  %v2076_v43 = vld [vmem:[%s9135_s3 + $0x140] sm:$0xff]  ;;  %v2095_v47 = vld [vmem:[%s9135_s3 + $0x1d8] sm:$0xff] }
 0x1fe   :  { %4423 = vmatpush1.bf16.msra.mxu1 %v4422_v59  ;;  %4329 = vmatprep.subr.bf16.mxu0 %v4328_v1  ;;  %v2272_v59 = vld [vmem:[%s9135_s3 + $0x760] sm:$0xff]  ;;  %v2285_v1 = vld [vmem:[%s9135_s3 + $0x7c8] sm:$0xff]  ;;  %v2770_v37 = vld [vmem:[%s9136_s4 + $0x50] sm:$0xff] }
 0x1ff   :  { %4425 = vmatprep.subr.bf16.mxu1 %v4424_v3  ;;  %v4438_v3 = vpack.c.bf16 %v2272_v59, %v2266_v24  ;;  %v2041_v24 = vld [vmem:[%s9135_s3 + $0x28] sm:$0xff]  ;;  %v2774_v49 = vld [vmem:[%s9136_s4 + $0x70] sm:$0xff] }
 0x292   :  { %v1530_v9 = vpop.f32.mrb[0].mxu0 }
 0x293   :  { %v4745_v13 = vadd.f32 %v1530_v9, %v929_v7  ;;  %v8029_v14 = vpop.f32.mrb[0].mxu1  ;;  %v1532_v15 = vpop.f32.mrb[1].mxu0  ;;  %v2282_v7 = vld [vmem:[%s9135_s3 + $0x7b0] sm:$0xff] }
 0x294   :  { %v4746_v11 = vadd.f32 %v1532_v15, %v933_v8  ;;  %v2029_v19 = vpop.f32.mrb[1].mxu1  ;;  %v4344_v8 = vpack.c.bf16 %v2283_v63, %v2277_v60  ;;  %v2278_v9 = vld [vmem:[%s9135_s3 + $0x790] sm:$0xff]  ;;  %v2295_v15 = vld [vmem:[%s9135_s3 + $0x818] sm:$0xff]  ;;  %v4346_v18 = vpack.c.bf16 %v2282_v7, %v2276_v51  ;;  %v2324_v60 = vld [vmem:[%s9135_s3 + $0x900] sm:$0xff] }
 0x295   :  { %v4748_v21 = vadd.f32 %v2029_v19, %v941_v45  ;;  %v8060_v31 = vmax.f32 %v4745_v13, 0.0  ;;  %v4440_v45 = vpack.c.bf16 %v2285_v1, %v2279_v0  ;;  %v2289_v13 = vld [vmem:[%s9135_s3 + $0x7e8] sm:$0xff]  ;;  %v2288_v19 = vld [vmem:[%s9135_s3 + $0x7e0] sm:$0xff]  ;;  %v2326_v63 = vld [vmem:[%s9135_s3 + $0x910] sm:$0xff] }
 0x296   :  { %v8052_v26 = vmax.f32 %v4746_v11, 0.0  ;;  %v4442_v11 = vpack.c.bf16 %v2284_v10, %v2278_v9  ;;  %v4350_v32 = vpack.c.bf16 %v2294_v20, %v2288_v19  ;;  %v2040_v0 = vld [vmem:[%s9135_s3 + $0x20] sm:$0xff]  ;;  %v2046_v1 = vld [vmem:[%s9135_s3 + $0x50] sm:$0xff]  ;;  %v2059_v51 = vld [vmem:[%s9135_s3 + $0xb8] sm:$0xff] }
 0x297   :  { %v8082_v40 = vmax.f32 %v4748_v21, 0.0  ;;  %v4348_v21 = vpack.c.bf16 %v2295_v15, %v2289_v13  ;;  %v2760_v7 = vld [vmem:[%s9136_s4] sm:$0xff]  ;;  %v2765_v9 = vld [vmem:[%s9136_s4 + $0x28] sm:$0xff]  ;;  %v2767_v10 = vld [vmem:[%s9136_s4 + $0x38] sm:$0xff]  ;;  %v4458_v15 = vpack.c.bf16 %v2046_v1, %v2040_v0 }
 0x298   :  { %2398 = vmatprep.mubr.f32.mxu0 %v8052_v26  ;;  %2540 = vmatprep.mubr.f32.mxu1 %v8052_v26  ;;  %v2065_v19 = vld [vmem:[%s9135_s3 + $0xe8] sm:$0xff]  ;;  %v2783_v1 = vld [vmem:[%s9136_s4 + $0xb8] sm:$0xff] }
 0x299   :  { %2399 = vmatmul.mubr.f32.vlgmr.msra.gmra.mrb[2].mxu0 %v8060_v31  ;;  %2541 = vmatmul.mubr.f32.vlgmr.msra.gmra.mrb[2].mxu1 %v8060_v31  ;;  %v2781_v0 = vld [vmem:[%s9136_s4 + $0xa8] sm:$0xff] }
 0x29a   :  { %4331 = vmatpush1.bf16.msra.mxu0 %v4330_v27  ;;  %4427 = vmatpush1.bf16.msra.mxu1 %v4426_v28  ;;  %v2301_v27 = vld [vmem:[%s9135_s3 + $0x848] sm:$0xff]  ;;  %v2307_v28 = vld [vmem:[%s9135_s3 + $0x878] sm:$0xff] }
 0x29b   :  { %3360 = vmatprep.mubr.msk.f32.mxu0 %vm2330_vm2, %v8082_v40  ;;  %3361 = vmatprep.mubr.msk.f32.mxu1 %vm2330_vm2, %v8082_v40 }
 0x29c   :  { %4333 = vmatprep.subr.bf16.mxu0 %v4332_v62  ;;  %4429 = vmatprep.subr.bf16.mxu1 %v4428_v35  ;;  %v2306_v62 = vld [vmem:[%s9135_s3 + $0x870] sm:$0xff]  ;;  %v4352_v35 = vpack.c.bf16 %v2307_v28, %v2301_v27  ;;  %v2769_v27 = vld [vmem:[%s9136_s4 + $0x48] sm:$0xff]  ;;  %v2771_v28 = vld [vmem:[%s9136_s4 + $0x58] sm:$0xff] }
 0x29e   :  { %4335 = vmatpush1.bf16.msra.mxu0 %v4334_v41  ;;  %4431 = vmatpush1.bf16.msra.mxu1 %v4430_v42  ;;  %v2313_v41 = vld [vmem:[%s9135_s3 + $0x8a8] sm:$0xff]  ;;  %v2319_v42 = vld [vmem:[%s9135_s3 + $0x8d8] sm:$0xff] }
 0x29f   :  { %4337 = vmatprep.subr.bf16.mxu0 %v4336_v44  ;;  %4433 = vmatprep.subr.bf16.mxu1 %v4432_v39  ;;  %v936_v44 = vsub.s32 2, %v5129_v61  ;;  %v4354_v39 = vpack.c.bf16 %v2306_v62, %v2300_v34  ;;  %v4356_v25 = vpack.c.bf16 %v2319_v42, %v2313_v41  ;;  %v4558_v34 = vpack.c.bf16 %v2766_v23, %v2764_v50  ;;  %v2083_v62 = vld [vmem:[%s9135_s3 + $0x178] sm:$0xff]  ;;  %v3254_v61 = vld [vmem:[%s9140_s8 + $0x10] sm:$0xff] }
 0x2a0   :  { %v2775_v41 = vld [vmem:[%s9136_s4 + $0x78] sm:$0xff] }
 0x2a1   :  { %v2131_v50 = vld [vmem:[%s9135_s3 + $0x2f8] sm:$0xff] }
 0x2a2   :  { %4339 = vmatpush1.bf16.msra.mxu0 %v4338_v53  ;;  %4435 = vmatpush1.bf16.msra.mxu1 %v4434_v54  ;;  %v2320_v53 = vld [vmem:[%s9135_s3 + $0x8e0] sm:$0xff]  ;;  %v937_v54 = vrot.slane %v8015_v5, %v936_v44  ;;  %v2047_v5 = vld [vmem:[%s9135_s3 + $0x58] sm:$0xff]  ;;  %v2082_v44 = vld [vmem:[%s9135_s3 + $0x170] sm:$0xff] }
 0x2a3   :  { %4341 = vmatprep.subr.bf16.mxu0 %v4340_v57  ;;  %4437 = vmatprep.subr.bf16.mxu1 %v4436_v58  ;;  %v4454_v56 = vpack.c.bf16 %v2320_v53, %v2314_v52  ;;  %v2325_v57 = vld [vmem:[%s9135_s3 + $0x908] sm:$0xff]  ;;  %v2327_v58 = vld [vmem:[%s9135_s3 + $0x918] sm:$0xff] }
 0x2a4   :  { %v4747_v59 = vadd.f32 %v8029_v14, %v937_v54  ;;  %v2053_v14 = vld [vmem:[%s9135_s3 + $0x88] sm:$0xff]  ;;  %v2779_v53 = vld [vmem:[%s9136_s4 + $0x98] sm:$0xff]  ;;  %v4470_v54 = vpack.c.bf16 %v2082_v44, %v2076_v43 }
 0x2a5   :  { %v4460_v17 = vpack.c.bf16 %v2059_v51, %v2053_v14  ;;  %v2777_v52 = vld [vmem:[%s9136_s4 + $0x88] sm:$0xff]  ;;  %v2106_v51 = vld [vmem:[%s9135_s3 + $0x230] sm:$0xff] }
 0x2a6   :  { %4343 = vmatpush1.bf16.msra.mxu0 %v4342_v2  ;;  %4439 = vmatpush1.bf16.msra.mxu1 %v4438_v3  ;;  %v2761_v2 = vld [vmem:[%s9136_s4 + $0x8] sm:$0xff]  ;;  %v2763_v3 = vld [vmem:[%s9136_s4 + $0x18] sm:$0xff]  ;;  %v8273_v13 = vmax.f32 %v4747_v59, 0.0  ;;  %v4568_v59 = vpack.c.bf16 %v2779_v53, %v2777_v52  ;;  %v2792_v52 = vld [vmem:[%s9136_s4 + $0x100] sm:$0xff] }
 0x2a7   :  { %4345 = vmatprep.subr.bf16.mxu0 %v4344_v8  ;;  %4441 = vmatprep.subr.bf16.mxu1 %v4440_v45  ;;  %v2762_v8 = vld [vmem:[%s9136_s4 + $0x10] sm:$0xff]  ;;  %v4456_v45 = vpack.c.bf16 %v2047_v5, %v2041_v24  ;;  %v4552_v16 = vpack.c.bf16 %v2763_v3, %v2761_v2  ;;  %v2107_v5 = vld [vmem:[%s9135_s3 + $0x238] sm:$0xff]  ;;  %v2100_v3 = vld [vmem:[%s9135_s3 + $0x200] sm:$0xff] }
 0x2a8   :  { %v4554_v20 = vpack.c.bf16 %v2762_v8, %v2760_v7  ;;  %v2113_v7 = vld [vmem:[%s9135_s3 + $0x268] sm:$0xff]  ;;  %v2794_v53 = vld [vmem:[%s9136_s4 + $0x110] sm:$0xff] }
 0x2aa   :  { %4347 = vmatpush1.bf16.msra.mxu0 %v4346_v18  ;;  %4443 = vmatpush1.bf16.msra.mxu1 %v4442_v11  ;;  %v2052_v18 = vld [vmem:[%s9135_s3 + $0x80] sm:$0xff]  ;;  %v2058_v11 = vld [vmem:[%s9135_s3 + $0xb0] sm:$0xff] }
 0x2ab   :  { %4349 = vmatprep.subr.bf16.mxu0 %v4348_v21  ;;  %4445 = vmatprep.subr.bf16.mxu1 %v4444_v22  ;;  %v2071_v21 = vld [vmem:[%s9135_s3 + $0x118] sm:$0xff]  ;;  %v4556_v22 = vpack.c.bf16 %v2767_v10, %v2765_v9  ;;  %v4462_v29 = vpack.c.bf16 %v2058_v11, %v2052_v18  ;;  %v4572_v9 = vpack.c.bf16 %v2783_v1, %v2781_v0  ;;  %v2780_v10 = vld [vmem:[%s9136_s4 + $0xa0] sm:$0xff]  ;;  %v2798_v1 = vld [vmem:[%s9136_s4 + $0x130] sm:$0xff] }
 0x2ac   :  { %v4464_v30 = vpack.c.bf16 %v2071_v21, %v2065_v19  ;;  %v4478_v18 = vpack.c.bf16 %v2106_v51, %v2100_v3  ;;  %v2112_v19 = vld [vmem:[%s9135_s3 + $0x260] sm:$0xff]  ;;  %v2125_v21 = vld [vmem:[%s9135_s3 + $0x2c8] sm:$0xff] }
 0x2ad   :  { %v2796_v0 = vld [vmem:[%s9136_s4 + $0x120] sm:$0xff] }
 0x2ae   :  { %4351 = vmatpush1.bf16.msra.mxu0 %v4350_v32  ;;  %4447 = vmatpush1.bf16.msra.mxu1 %v4446_v33  ;;  %v2064_v32 = vld [vmem:[%s9135_s3 + $0xe0] sm:$0xff]  ;;  %v2077_v33 = vld [vmem:[%s9135_s3 + $0x148] sm:$0xff] }
 0x2af   :  { %4353 = vmatprep.subr.bf16.mxu0 %v4352_v35  ;;  %4449 = vmatprep.subr.bf16.mxu1 %v4448_v36  ;;  %v4560_v35 = vpack.c.bf16 %v2771_v28, %v2769_v27  ;;  %v2768_v36 = vld [vmem:[%s9136_s4 + $0x40] sm:$0xff]  ;;  %v4468_v12 = vpack.c.bf16 %v2083_v62, %v2077_v33  ;;  %v2786_v28 = vld [vmem:[%s9136_s4 + $0xd0] sm:$0xff]  ;;  %v2137_v62 = vld [vmem:[%s9135_s3 + $0x328] sm:$0xff] }
 0x2b0   :  { %v2784_v27 = vld [vmem:[%s9136_s4 + $0xc0] sm:$0xff] }
 0x2b1   :  { %v2124_v33 = vld [vmem:[%s9135_s3 + $0x2c0] sm:$0xff] }
 0x2b2   :  { %4355 = vmatpush1.bf16.msra.mxu0 %v4354_v39  ;;  %4451 = vmatpush1.bf16.msra.mxu1 %v4450_v46  ;;  %v2089_v39 = vld [vmem:[%s9135_s3 + $0x1a8] sm:$0xff]  ;;  %v4562_v46 = vpack.c.bf16 %v2770_v37, %v2768_v36  ;;  %v2143_v36 = vld [vmem:[%s9135_s3 + $0x358] sm:$0xff] }
 0x2b3   :  { %4357 = vmatprep.subr.bf16.mxu0 %v4356_v25  ;;  %4453 = vmatprep.subr.bf16.mxu1 %v4452_v48  ;;  %v4564_v25 = vpack.c.bf16 %v2775_v41, %v2773_v38  ;;  %v2772_v48 = vld [vmem:[%s9136_s4 + $0x60] sm:$0xff]  ;;  %v2790_v41 = vld [vmem:[%s9136_s4 + $0xf0] sm:$0xff]  ;;  %v4488_v44 = vpack.c.bf16 %v2143_v36, %v2137_v62  ;;  %v2197_v36 = vld [vmem:[%s9135_s3 + $0x508] sm:$0xff] }
 0x2b4   :  { %v4566_v24 = vpack.c.bf16 %v2774_v49, %v2772_v48  ;;  %v2788_v38 = vld [vmem:[%s9136_s4 + $0xe0] sm:$0xff]  ;;  %v2155_v48 = vld [vmem:[%s9135_s3 + $0x3b8] sm:$0xff] }
 0x2b5   :  { %v2184_v62 = vld [vmem:[%s9135_s3 + $0x4a0] sm:$0xff] }
 0x2b6   :  { %4359 = vmatpush1.bf16.msra.mxu0 %v4358_v55  ;;  %4455 = vmatpush1.bf16.msra.mxu1 %v4454_v56  ;;  %v4472_v55 = vpack.c.bf16 %v2095_v47, %v2089_v39  ;;  %v2088_v56 = vld [vmem:[%s9135_s3 + $0x1a0] sm:$0xff]  ;;  %v2149_v47 = vld [vmem:[%s9135_s3 + $0x388] sm:$0xff] }
 0x2b7   :  { %2437 = vmatprep.subr.mxu0 %v2325_v57  ;;  %2579 = vmatprep.subr.mxu1 %v2327_v58  ;;  %v2094_v57 = vld [vmem:[%s9135_s3 + $0x1d0] sm:$0xff]  ;;  %v2101_v58 = vld [vmem:[%s9135_s3 + $0x208] sm:$0xff]  ;;  %v2136_v39 = vld [vmem:[%s9135_s3 + $0x320] sm:$0xff] }
 0x2b8   :  { %v4474_v14 = vpack.c.bf16 %v2094_v57, %v2088_v56  ;;  %v4476_v2 = vpack.c.bf16 %v2107_v5, %v2101_v58  ;;  %v4492_v57 = vpack.c.bf16 %v2155_v48, %v2149_v47  ;;  %v2148_v58 = vld [vmem:[%s9135_s3 + $0x380] sm:$0xff]  ;;  %v2161_v5 = vld [vmem:[%s9135_s3 + $0x3e8] sm:$0xff] }
 0x2b9   :  { %v2196_v47 = vld [vmem:[%s9135_s3 + $0x500] sm:$0xff]  ;;  %v2209_v48 = vld [vmem:[%s9135_s3 + $0x568] sm:$0xff] }
 0x2ba   :  { %2438 = vmatpush1.msra.mxu0 %v2324_v60  ;;  %2580 = vmatpush1.msra.mxu1 %v2326_v63  ;;  %v2776_v60 = vld [vmem:[%s9136_s4 + $0x80] sm:$0xff]  ;;  %v2778_v63 = vld [vmem:[%s9136_s4 + $0x90] sm:$0xff] }
 0x2bb   :  { %2470 = vmatmul.mubr.f32.vlgmr.msra.gmra.mrb[2].mxu0 %v8273_v13  ;;  %2612 = vmatmul.mubr.f32.vlgmr.msra.gmra.mrb[2].mxu1 %v8273_v13  ;;  %v4570_v8 = vpack.c.bf16 %v2778_v63, %v2776_v60  ;;  %v2167_v60 = vld [vmem:[%s9135_s3 + $0x418] sm:$0xff] }
 0x2bc   :  { %4457 = vmatprep.subr.bf16.mxu0 %v4456_v45  ;;  %2682 = vmatprep.mubr.f32.mxu0 %v8052_v26  ;;  %v2070_v26 = vld [vmem:[%s9135_s3 + $0x110] sm:$0xff]  ;;  %v2119_v45 = vld [vmem:[%s9135_s3 + $0x298] sm:$0xff]  ;;  %v4496_v51 = vpack.c.bf16 %v2167_v60, %v2161_v5  ;;  %v2208_v5 = vld [vmem:[%s9135_s3 + $0x560] sm:$0xff] }
 0x2bd   :  { %4459 = vmatpush1.bf16.msra.mxu0 %v4458_v15  ;;  %4553 = vmatprep.subr.bf16.mxu1 %v4552_v16  ;;  %v4466_v42 = vpack.c.bf16 %v2070_v26, %v2064_v32  ;;  %v2782_v15 = vld [vmem:[%s9136_s4 + $0xb0] sm:$0xff]  ;;  %v2785_v16 = vld [vmem:[%s9136_s4 + $0xc8] sm:$0xff]  ;;  %v4480_v11 = vpack.c.bf16 %v2119_v45, %v2113_v7  ;;  %v4484_v26 = vpack.c.bf16 %v2131_v50, %v2125_v21  ;;  %v2160_v7 = vld [vmem:[%s9135_s3 + $0x3e0] sm:$0xff] }
 0x2be   :  { %4461 = vmatprep.subr.bf16.mxu0 %v4460_v17  ;;  %4555 = vmatpush1.bf16.msra.mxu1 %v4554_v20  ;;  %v2787_v17 = vld [vmem:[%s9136_s4 + $0xd8] sm:$0xff]  ;;  %v2118_v20 = vld [vmem:[%s9135_s3 + $0x290] sm:$0xff]  ;;  %v2173_v45 = vld [vmem:[%s9135_s3 + $0x448] sm:$0xff] }
 0x2bf   :  { %4557 = vmatprep.subr.bf16.mxu1 %v4556_v22  ;;  %v4574_v22 = vpack.c.bf16 %v2782_v15, %v2780_v10  ;;  %v4576_v23 = vpack.c.bf16 %v2787_v17, %v2785_v16  ;;  %v4482_v32 = vpack.c.bf16 %v2118_v20, %v2112_v19  ;;  %v2179_v10 = vld [vmem:[%s9135_s3 + $0x478] sm:$0xff]  ;;  %v2800_v16 = vld [vmem:[%s9136_s4 + $0x140] sm:$0xff]  ;;  %v2802_v17 = vld [vmem:[%s9136_s4 + $0x150] sm:$0xff] }
 0x2c0   :  { %v4500_v20 = vpack.c.bf16 %v2179_v10, %v2173_v45  ;;  %v2172_v21 = vld [vmem:[%s9135_s3 + $0x440] sm:$0xff]  ;;  %v2185_v50 = vld [vmem:[%s9135_s3 + $0x4a8] sm:$0xff] }
 0x2c1   :  { %4463 = vmatpush1.bf16.msra.mxu0 %v4462_v29  ;;  %v2789_v29 = vld [vmem:[%s9136_s4 + $0xe8] sm:$0xff]  ;;  %v2220_v45 = vld [vmem:[%s9135_s3 + $0x5c0] sm:$0xff] }
 0x2c2   :  { %4465 = vmatprep.subr.bf16.mxu0 %v4464_v30  ;;  %4559 = vmatpush1.bf16.msra.mxu1 %v4558_v34  ;;  %v2791_v30 = vld [vmem:[%s9136_s4 + $0xf8] sm:$0xff]  ;;  %v2130_v34 = vld [vmem:[%s9135_s3 + $0x2f0] sm:$0xff]  ;;  %v2221_v60 = vld [vmem:[%s9135_s3 + $0x5c8] sm:$0xff] }
 0x2c3   :  { %4561 = vmatprep.subr.bf16.mxu1 %v4560_v35  ;;  %v4578_v35 = vpack.c.bf16 %v2786_v28, %v2784_v27  ;;  %v4580_v37 = vpack.c.bf16 %v2791_v30, %v2789_v29  ;;  %v4486_v43 = vpack.c.bf16 %v2130_v34, %v2124_v33  ;;  %v2191_v27 = vld [vmem:[%s9135_s3 + $0x4d8] sm:$0xff]  ;;  %v2804_v29 = vld [vmem:[%s9136_s4 + $0x160] sm:$0xff]  ;;  %v2806_v30 = vld [vmem:[%s9136_s4 + $0x170] sm:$0xff] }
 0x2c4   :  { %v4504_v34 = vpack.c.bf16 %v2191_v27, %v2185_v50  ;;  %v2233_v10 = vld [vmem:[%s9135_s3 + $0x628] sm:$0xff]  ;;  %v2251_v27 = vld [vmem:[%s9135_s3 + $0x6b8] sm:$0xff] }
 0x2c5   :  { %4467 = vmatpush1.bf16.msra.mxu0 %v4466_v42  ;;  %v2793_v42 = vld [vmem:[%s9136_s4 + $0x108] sm:$0xff] }
 0x2c6   :  { %4469 = vmatprep.subr.bf16.mxu0 %v4468_v12  ;;  %4563 = vmatpush1.bf16.msra.mxu1 %v4562_v46  ;;  %v2795_v12 = vld [vmem:[%s9136_s4 + $0x118] sm:$0xff]  ;;  %v2142_v46 = vld [vmem:[%s9135_s3 + $0x350] sm:$0xff] }
 0x2c7   :  { %4565 = vmatprep.subr.bf16.mxu1 %v4564_v25  ;;  %v4582_v25 = vpack.c.bf16 %v2790_v41, %v2788_v38  ;;  %v4584_v49 = vpack.c.bf16 %v2795_v12, %v2793_v42  ;;  %v4490_v56 = vpack.c.bf16 %v2142_v46, %v2136_v39  ;;  %v2203_v38 = vld [vmem:[%s9135_s3 + $0x538] sm:$0xff]  ;;  %v2808_v42 = vld [vmem:[%s9136_s4 + $0x180] sm:$0xff]  ;;  %v2810_v12 = vld [vmem:[%s9136_s4 + $0x190] sm:$0xff] }
 0x2c8   :  { %v4508_v46 = vpack.c.bf16 %v2203_v38, %v2197_v36  ;;  %v2262_v36 = vld [vmem:[%s9135_s3 + $0x710] sm:$0xff] }
 0x2c9   :  { %4471 = vmatpush1.bf16.msra.mxu0 %v4470_v54  ;;  %v2797_v54 = vld [vmem:[%s9136_s4 + $0x128] sm:$0xff] }
 0x2ca   :  { %4473 = vmatprep.subr.bf16.mxu0 %v4472_v55  ;;  %4567 = vmatpush1.bf16.msra.mxu1 %v4566_v24  ;;  %v2799_v55 = vld [vmem:[%s9136_s4 + $0x138] sm:$0xff]  ;;  %v2154_v24 = vld [vmem:[%s9135_s3 + $0x3b0] sm:$0xff] }
 0x2cb   :  { %4569 = vmatprep.subr.bf16.mxu1 %v4568_v59  ;;  %v4586_v59 = vpack.c.bf16 %v2794_v53, %v2792_v52  ;;  %v4588_v63 = vpack.c.bf16 %v2799_v55, %v2797_v54  ;;  %v4494_v3 = vpack.c.bf16 %v2154_v24, %v2148_v58  ;;  %v2215_v52 = vld [vmem:[%s9135_s3 + $0x598] sm:$0xff]  ;;  %v2812_v54 = vld [vmem:[%s9136_s4 + $0x1a0] sm:$0xff]  ;;  %v2814_v55 = vld [vmem:[%s9136_s4 + $0x1b0] sm:$0xff] }
 0x2cc   :  { %v4512_v24 = vpack.c.bf16 %v2215_v52, %v2209_v48  ;;  %v2299_v48 = vld [vmem:[%s9135_s3 + $0x838] sm:$0xff] }
 0x2cd   :  { %4475 = vmatpush1.bf16.msra.mxu0 %v4474_v14  ;;  %v2801_v14 = vld [vmem:[%s9136_s4 + $0x148] sm:$0xff] }
 0x2ce   :  { %4477 = vmatprep.subr.bf16.mxu0 %v4476_v2  ;;  %4571 = vmatpush1.bf16.msra.mxu1 %v4570_v8  ;;  %v2803_v2 = vld [vmem:[%s9136_s4 + $0x158] sm:$0xff]  ;;  %v2166_v8 = vld [vmem:[%s9135_s3 + $0x410] sm:$0xff] }
 0x2cf   :  { %4573 = vmatprep.subr.bf16.mxu1 %v4572_v9  ;;  %v4590_v9 = vpack.c.bf16 %v2798_v1, %v2796_v0  ;;  %v4592_v15 = vpack.c.bf16 %v2803_v2, %v2801_v14  ;;  %v4498_v19 = vpack.c.bf16 %v2166_v8, %v2160_v7  ;;  %v2227_v0 = vld [vmem:[%s9135_s3 + $0x5f8] sm:$0xff]  ;;  %v2816_v14 = vld [vmem:[%s9136_s4 + $0x1c0] sm:$0xff]  ;;  %v2818_v2 = vld [vmem:[%s9136_s4 + $0x1d0] sm:$0xff] }
 0x2d0   :  { %v4516_v8 = vpack.c.bf16 %v2227_v0, %v2221_v60  ;;  %v2827_v60 = vld [vmem:[%s9136_s4 + $0x218] sm:$0xff] }
 0x2d1   :  { %4479 = vmatpush1.bf16.msra.mxu0 %v4478_v18  ;;  %v2805_v18 = vld [vmem:[%s9136_s4 + $0x168] sm:$0xff]  ;;  %v2323_v0 = vld [vmem:[%s9135_s3 + $0x8f8] sm:$0xff] }
 0x2d2   :  { %4481 = vmatprep.subr.bf16.mxu0 %v4480_v11  ;;  %4575 = vmatpush1.bf16.msra.mxu1 %v4574_v22  ;;  %v2807_v11 = vld [vmem:[%s9136_s4 + $0x178] sm:$0xff]  ;;  %v2178_v22 = vld [vmem:[%s9135_s3 + $0x470] sm:$0xff] }
 0x2d3   :  { %4577 = vmatprep.subr.bf16.mxu1 %v4576_v23  ;;  %v4594_v23 = vpack.c.bf16 %v2802_v17, %v2800_v16  ;;  %v4596_v28 = vpack.c.bf16 %v2807_v11, %v2805_v18  ;;  %v4502_v33 = vpack.c.bf16 %v2178_v22, %v2172_v21  ;;  %v2239_v16 = vld [vmem:[%s9135_s3 + $0x658] sm:$0xff]  ;;  %v2820_v18 = vld [vmem:[%s9136_s4 + $0x1e0] sm:$0xff]  ;;  %v2822_v11 = vld [vmem:[%s9136_s4 + $0x1f0] sm:$0xff] }
 0x2d4   :  { %v2232_v21 = vld [vmem:[%s9135_s3 + $0x620] sm:$0xff]  ;;  %v2238_v22 = vld [vmem:[%s9135_s3 + $0x650] sm:$0xff]  ;;  %v4614_v50 = vpack.c.bf16 %v2822_v11, %v2820_v18 }
 0x2d5   :  { %4483 = vmatpush1.bf16.msra.mxu0 %v4482_v32  ;;  %v2809_v32 = vld [vmem:[%s9136_s4 + $0x188] sm:$0xff]  ;;  %v3156_v11 = vld [vmem:[%s9138_s6 + $0x20] sm:$0xff] }
 0x2d6   :  { %4485 = vmatprep.subr.bf16.mxu0 %v4484_v26  ;;  %4579 = vmatpush1.bf16.msra.mxu1 %v4578_v35  ;;  %v2811_v26 = vld [vmem:[%s9136_s4 + $0x198] sm:$0xff]  ;;  %v2190_v35 = vld [vmem:[%s9135_s3 + $0x4d0] sm:$0xff] }
 0x2d7   :  { %4581 = vmatprep.subr.bf16.mxu1 %v4580_v37  ;;  %v4598_v37 = vpack.c.bf16 %v2806_v30, %v2804_v29  ;;  %v4600_v41 = vpack.c.bf16 %v2811_v26, %v2809_v32  ;;  %v4506_v39 = vpack.c.bf16 %v2190_v35, %v2184_v62  ;;  %v2244_v30 = vld [vmem:[%s9135_s3 + $0x680] sm:$0xff]  ;;  %v2250_v32 = vld [vmem:[%s9135_s3 + $0x6b0] sm:$0xff]  ;;  %v2257_v26 = vld [vmem:[%s9135_s3 + $0x6e8] sm:$0xff] }
 0x2d8   :  { %v2256_v35 = vld [vmem:[%s9135_s3 + $0x6e0] sm:$0xff] }
 0x2d9   :  { %4487 = vmatpush1.bf16.msra.mxu0 %v4486_v43  ;;  %v2813_v43 = vld [vmem:[%s9136_s4 + $0x1a8] sm:$0xff] }
 0x2da   :  { %4489 = vmatprep.subr.bf16.mxu0 %v4488_v44  ;;  %4583 = vmatpush1.bf16.msra.mxu1 %v4582_v25  ;;  %v2815_v44 = vld [vmem:[%s9136_s4 + $0x1b8] sm:$0xff]  ;;  %v2202_v25 = vld [vmem:[%s9135_s3 + $0x530] sm:$0xff] }
 0x2db   :  { %4585 = vmatprep.subr.bf16.mxu1 %v4584_v49  ;;  %v4602_v49 = vpack.c.bf16 %v2810_v12, %v2808_v42  ;;  %v4604_v53 = vpack.c.bf16 %v2815_v44, %v2813_v43  ;;  %v4510_v58 = vpack.c.bf16 %v2202_v25, %v2196_v47  ;;  %v2274_v42 = vld [vmem:[%s9135_s3 + $0x770] sm:$0xff]  ;;  %v2281_v12 = vld [vmem:[%s9135_s3 + $0x7a8] sm:$0xff]  ;;  %v2287_v43 = vld [vmem:[%s9135_s3 + $0x7d8] sm:$0xff] }
 0x2dc   :  { %v2286_v47 = vld [vmem:[%s9135_s3 + $0x7d0] sm:$0xff]  ;;  %v2293_v25 = vld [vmem:[%s9135_s3 + $0x808] sm:$0xff] }
 0x2dd   :  { %4491 = vmatpush1.bf16.msra.mxu0 %v4490_v56  ;;  %v2817_v56 = vld [vmem:[%s9136_s4 + $0x1c8] sm:$0xff]  ;;  %v4540_v52 = vpack.c.bf16 %v2299_v48, %v2293_v25  ;;  %v2832_v48 = vld [vmem:[%s9136_s4 + $0x240] sm:$0xff] }
 0x2de   :  { %4493 = vmatprep.subr.bf16.mxu0 %v4492_v57  ;;  %4587 = vmatpush1.bf16.msra.mxu1 %v4586_v59  ;;  %v2819_v57 = vld [vmem:[%s9136_s4 + $0x1d8] sm:$0xff]  ;;  %v2214_v59 = vld [vmem:[%s9135_s3 + $0x590] sm:$0xff] }
 0x2df   :  { %4589 = vmatprep.subr.bf16.mxu1 %v4588_v63  ;;  %v4606_v63 = vpack.c.bf16 %v2814_v55, %v2812_v54  ;;  %v4608_v1 = vpack.c.bf16 %v2819_v57, %v2817_v56  ;;  %v4514_v7 = vpack.c.bf16 %v2214_v59, %v2208_v5  ;;  %v2298_v54 = vld [vmem:[%s9135_s3 + $0x830] sm:$0xff]  ;;  %v2305_v55 = vld [vmem:[%s9135_s3 + $0x868] sm:$0xff]  ;;  %v2311_v56 = vld [vmem:[%s9135_s3 + $0x898] sm:$0xff] }
 0x2e0   :  { %v2310_v5 = vld [vmem:[%s9135_s3 + $0x890] sm:$0xff]  ;;  %v2825_v59 = vld [vmem:[%s9136_s4 + $0x208] sm:$0xff] }
 0x2e1   :  { %4495 = vmatpush1.bf16.msra.mxu0 %v4494_v3  ;;  %v2821_v3 = vld [vmem:[%s9136_s4 + $0x1e8] sm:$0xff] }
 0x2e2   :  { %4497 = vmatprep.subr.bf16.mxu0 %v4496_v51  ;;  %4591 = vmatpush1.bf16.msra.mxu1 %v4590_v9  ;;  %v2823_v51 = vld [vmem:[%s9136_s4 + $0x1f8] sm:$0xff]  ;;  %v2226_v9 = vld [vmem:[%s9135_s3 + $0x5f0] sm:$0xff] }
 0x2e3   :  { %4593 = vmatprep.subr.bf16.mxu1 %v4592_v15  ;;  %v4610_v15 = vpack.c.bf16 %v2818_v2, %v2816_v14  ;;  %v4612_v17 = vpack.c.bf16 %v2823_v51, %v2821_v3  ;;  %v2316_v3 = vld [vmem:[%s9135_s3 + $0x8c0] sm:$0xff]  ;;  %v2322_v51 = vld [vmem:[%s9135_s3 + $0x8f0] sm:$0xff] }
 0x2e5   :  { %4499 = vmatpush1.bf16.msra.mxu0 %v4498_v19  ;;  %v4518_v19 = vpack.c.bf16 %v2226_v9, %v2220_v45  ;;  %v2328_v45 = vld [vmem:[%s9135_s3 + $0x920] sm:$0xff] }
 0x2e6   :  { %4501 = vmatprep.subr.bf16.mxu0 %v4500_v20  ;;  %4595 = vmatpush1.bf16.msra.mxu1 %v4594_v23  ;;  %v4520_v20 = vpack.c.bf16 %v2239_v16, %v2233_v10  ;;  %v2245_v23 = vld [vmem:[%s9135_s3 + $0x688] sm:$0xff]  ;;  %v3152_v9 = vld [vmem:[%s9138_s6] sm:$0xff]  ;;  %v4818_v16 = vmov 0.0|0.0  }
 0x2e7   :  { %4597 = vmatprep.subr.bf16.mxu1 %v4596_v28  ;;  %v4522_v28 = vpack.c.bf16 %v2238_v22, %v2232_v21  ;;  %v4524_v29 = vpack.c.bf16 %v2251_v27, %v2245_v23  ;;  %v3153_v10 = vld [vmem:[%s9138_s6 + $0x8] sm:$0xff]  ;;  %v3158_v21 = vld [vmem:[%s9138_s6 + $0x30] sm:$0xff]  ;;  %v3159_v22 = vld [vmem:[%s9138_s6 + $0x38] sm:$0xff] }
 0x2e8   :  { %v3160_v23 = vld [vmem:[%s9138_s6 + $0x40] sm:$0xff]  ;;  %v3161_v27 = vld [vmem:[%s9138_s6 + $0x48] sm:$0xff] }
 0x2e9   :  { %4503 = vmatpush1.bf16.msra.mxu0 %v4502_v33  ;;  %v2263_v33 = vld [vmem:[%s9135_s3 + $0x718] sm:$0xff] }
 0x2ea   :  { %4505 = vmatprep.subr.bf16.mxu0 %v4504_v34  ;;  %4599 = vmatpush1.bf16.msra.mxu1 %v4598_v37  ;;  %v4526_v34 = vpack.c.bf16 %v2250_v32, %v2244_v30  ;;  %v4528_v62 = vpack.c.bf16 %v2263_v33, %v2257_v26  ;;  %v2269_v37 = vld [vmem:[%s9135_s3 + $0x748] sm:$0xff]  ;;  %v3163_v30 = vld [vmem:[%s9138_s6 + $0x58] sm:$0xff]  ;;  %v3164_v26 = vld [vmem:[%s9138_s6 + $0x60] sm:$0xff] }
 0x2eb   :  { %4601 = vmatprep.subr.bf16.mxu1 %v4600_v41  ;;  %v2268_v41 = vld [vmem:[%s9135_s3 + $0x740] sm:$0xff]  ;;  %v3165_v33 = vld [vmem:[%s9138_s6 + $0x68] sm:$0xff] }
 0x2ec   :  { %v4534_v44 = vpack.c.bf16 %v2274_v42, %v2268_v41 }
 0x2ed   :  { %4507 = vmatpush1.bf16.msra.mxu0 %v4506_v39  ;;  %v4536_v39 = vpack.c.bf16 %v2287_v43, %v2281_v12  ;;  %v2828_v43 = vld [vmem:[%s9136_s4 + $0x220] sm:$0xff] }
 0x2ee   :  { %4509 = vmatprep.subr.bf16.mxu0 %v4508_v46  ;;  %4603 = vmatpush1.bf16.msra.mxu1 %v4602_v49  ;;  %v2280_v46 = vld [vmem:[%s9135_s3 + $0x7a0] sm:$0xff] }
 0x2ef   :  { %4605 = vmatprep.subr.bf16.mxu1 %v4604_v53  ;;  %v4538_v49 = vpack.c.bf16 %v2286_v47, %v2280_v46  ;;  %v2292_v53 = vld [vmem:[%s9135_s3 + $0x800] sm:$0xff]  ;;  %v2835_v46 = vld [vmem:[%s9136_s4 + $0x258] sm:$0xff] }
 0x2f0   :  { %v4542_v57 = vpack.c.bf16 %v2298_v54, %v2292_v53  ;;  %v2839_v53 = vld [vmem:[%s9136_s4 + $0x278] sm:$0xff] }
 0x2f1   :  { %4511 = vmatpush1.bf16.msra.mxu0 %v4510_v58  ;;  %v2304_v58 = vld [vmem:[%s9135_s3 + $0x860] sm:$0xff] }
 0x2f2   :  { %4513 = vmatprep.subr.bf16.mxu0 %v4512_v24  ;;  %4607 = vmatpush1.bf16.msra.mxu1 %v4606_v63  ;;  %v4544_v24 = vpack.c.bf16 %v2311_v56, %v2305_v55  ;;  %v2317_v63 = vld [vmem:[%s9135_s3 + $0x8c8] sm:$0xff]  ;;  %v4546_v14 = vpack.c.bf16 %v2310_v5, %v2304_v58  ;;  %v2836_v56 = vld [vmem:[%s9136_s4 + $0x260] sm:$0xff] }
 0x2f3   :  { %4609 = vmatprep.subr.bf16.mxu1 %v4608_v1  ;;  %v4616_v1 = vpack.c.bf16 %v2827_v60, %v2825_v59  ;;  %v4548_v2 = vpack.c.bf16 %v2323_v0, %v2317_v63  ;;  %v2841_v58 = vld [vmem:[%s9136_s4 + $0x288] sm:$0xff]  ;;  %v2840_v60 = vld [vmem:[%s9136_s4 + $0x280] sm:$0xff]  ;;  %v2842_v63 = vld [vmem:[%s9136_s4 + $0x290] sm:$0xff] }
 0x2f4   :  { %v2845_v0 = vld [vmem:[%s9136_s4 + $0x2a8] sm:$0xff] }
 0x2f5   :  { %4515 = vmatpush1.bf16.msra.mxu0 %v4514_v7  ;;  %v4550_v7 = vpack.c.bf16 %v2322_v51, %v2316_v3  ;;  %v2844_v3 = vld [vmem:[%s9136_s4 + $0x2a0] sm:$0xff]  ;;  %v2846_v51 = vld [vmem:[%s9136_s4 + $0x2b0] sm:$0xff] }
 0x2f6   :  { %4517 = vmatprep.subr.bf16.mxu0 %v4516_v8  ;;  %4611 = vmatpush1.bf16.msra.mxu1 %v4610_v15  ;;  %v2329_v8 = vld [vmem:[%s9135_s3 + $0x928] sm:$0xff]  ;;  %v3154_v15 = vld [vmem:[%s9138_s6 + $0x10] sm:$0xff] }
 0x2f7   :  { %4613 = vmatprep.subr.bf16.mxu1 %v4612_v17  ;;  %v4713_v17 = vpack.c.bf16 %v3153_v10, %v3152_v9  ;;  %v2848_v10 = vld [vmem:[%s9136_s4 + $0x2c0] sm:$0xff] }
 0x2f9   :  { %4519 = vmatpush1.bf16.msra.mxu0 %v4518_v19  ;;  %v3157_v19 = vld [vmem:[%s9138_s6 + $0x28] sm:$0xff] }
 0x2fa   :  { %4521 = vmatprep.subr.bf16.mxu0 %v4520_v20  ;;  %4615 = vmatpush1.bf16.msra.mxu1 %v4614_v50  ;;  %v4719_v20 = vpack.c.bf16 %v3157_v19, %v3156_v11  ;;  %v4722_v50 = vpack.c.bf16 %v3159_v22, %v3158_v21  ;;  %v2852_v19 = vld [vmem:[%s9136_s4 + $0x2e0] sm:$0xff]  ;;  %v2857_v21 = vld [vmem:[%s9136_s4 + $0x308] sm:$0xff]  ;;  %v2859_v22 = vld [vmem:[%s9136_s4 + $0x318] sm:$0xff] }
 0x2fb   :  { %4617 = vmatprep.subr.bf16.mxu1 %v4616_v1  ;;  %v2847_v1 = vld [vmem:[%s9136_s4 + $0x2b8] sm:$0xff] }
 0x2fc   :  { %2683 = vmatmul.mubr.f32.vlgmr.msra.gmra.mrb[4].mxu0 %v8060_v31  ;;  %v2275_v31 = vld [vmem:[%s9135_s3 + $0x778] sm:$0xff] }
 0x2fd   :  { %4523 = vmatpush1.bf16.msra.mxu0 %v4522_v28  ;;  %3362 = vmatprep.mubr.msk.f32.mxu0 %vm2330_vm2, %v8082_v40  ;;  %v4530_v40 = vpack.c.bf16 %v2262_v36, %v2256_v35  ;;  %v4532_v38 = vpack.c.bf16 %v2275_v31, %v2269_v37  ;;  %v4725_v28 = vpack.c.bf16 %v3161_v27, %v3160_v23  ;;  %v2829_v36 = vld [vmem:[%s9136_s4 + $0x228] sm:$0xff]  ;;  %v2831_v37 = vld [vmem:[%s9136_s4 + $0x238] sm:$0xff]  ;;  %v2856_v27 = vld [vmem:[%s9136_s4 + $0x300] sm:$0xff] }
 0x2fe   :  { %4525 = vmatprep.subr.bf16.mxu0 %v4524_v29  ;;  %v3162_v29 = vld [vmem:[%s9138_s6 + $0x50] sm:$0xff]  ;;  %v4731_v35 = vpack.c.bf16 %v3165_v33, %v3164_v26  ;;  %v4620_v12 = vpack.c.bf16 %v2831_v37, %v2829_v36  ;;  %v4648_v23 = vpack.c.bf16 %v2859_v22, %v2857_v21  ;;  %v2860_v33 = vld [vmem:[%s9136_s4 + $0x320] sm:$0xff]  ;;  %v2897_v22 = vld [vmem:[%s9136_s4 + $0x448] sm:$0xff] }
 0x2ff   :  { %v4728_v32 = vpack.c.bf16 %v3163_v30, %v3162_v29  ;;  %v2861_v29 = vld [vmem:[%s9136_s4 + $0x328] sm:$0xff]  ;;  %v2863_v30 = vld [vmem:[%s9136_s4 + $0x338] sm:$0xff]  ;;  %v2894_v21 = vld [vmem:[%s9136_s4 + $0x430] sm:$0xff] }
 0x300   :  { %v4652_v26 = vpack.c.bf16 %v2863_v30, %v2861_v29  ;;  %v2898_v29 = vld [vmem:[%s9136_s4 + $0x450] sm:$0xff]  ;;  %v2901_v30 = vld [vmem:[%s9136_s4 + $0x468] sm:$0xff] }
 0x301   :  { %4527 = vmatpush1.bf16.msra.mxu0 %v4526_v34  ;;  %v2824_v34 = vld [vmem:[%s9136_s4 + $0x200] sm:$0xff] }
 0x302   :  { %4529 = vmatprep.subr.bf16.mxu0 %v4528_v62  ;;  %v2826_v62 = vld [vmem:[%s9136_s4 + $0x210] sm:$0xff] }
 0x305   :  { %4531 = vmatpush1.bf16.msra.mxu0 %v4530_v40 }
 0x306   :  { %4533 = vmatprep.subr.bf16.mxu0 %v4532_v38  ;;  %v4618_v38 = vpack.c.bf16 %v2826_v62, %v2824_v34  ;;  %v2862_v34 = vld [vmem:[%s9136_s4 + $0x330] sm:$0xff]  ;;  %v2865_v62 = vld [vmem:[%s9136_s4 + $0x348] sm:$0xff] }
 0x307   :  { %v4654_v36 = vpack.c.bf16 %v2862_v34, %v2860_v33  ;;  %v2900_v33 = vld [vmem:[%s9136_s4 + $0x460] sm:$0xff]  ;;  %v2902_v34 = vld [vmem:[%s9136_s4 + $0x470] sm:$0xff] }
 0x309   :  { %4535 = vmatpush1.bf16.msra.mxu0 %v4534_v44  ;;  %v2830_v44 = vld [vmem:[%s9136_s4 + $0x230] sm:$0xff] }
 0x30a   :  { %4537 = vmatprep.subr.bf16.mxu0 %v4536_v39  ;;  %v2833_v39 = vld [vmem:[%s9136_s4 + $0x248] sm:$0xff]  ;;  %v4622_v47 = vpack.c.bf16 %v2830_v44, %v2828_v43  ;;  %v2868_v44 = vld [vmem:[%s9136_s4 + $0x360] sm:$0xff] }
 0x30b   :  { %v4624_v25 = vpack.c.bf16 %v2835_v46, %v2833_v39  ;;  %v2870_v39 = vld [vmem:[%s9136_s4 + $0x370] sm:$0xff]  ;;  %v2873_v46 = vld [vmem:[%s9136_s4 + $0x388] sm:$0xff] }
 0x30d   :  { %4539 = vmatpush1.bf16.msra.mxu0 %v4538_v49  ;;  %v2834_v49 = vld [vmem:[%s9136_s4 + $0x250] sm:$0xff] }
 0x30e   :  { %4541 = vmatprep.subr.bf16.mxu0 %v4540_v52  ;;  %v2837_v52 = vld [vmem:[%s9136_s4 + $0x268] sm:$0xff]  ;;  %v4626_v54 = vpack.c.bf16 %v2834_v49, %v2832_v48  ;;  %v2872_v49 = vld [vmem:[%s9136_s4 + $0x380] sm:$0xff] }
 0x30f   :  { %v4628_v55 = vpack.c.bf16 %v2839_v53, %v2837_v52  ;;  %v2874_v52 = vld [vmem:[%s9136_s4 + $0x390] sm:$0xff]  ;;  %v2877_v53 = vld [vmem:[%s9136_s4 + $0x3a8] sm:$0xff] }
 0x311   :  { %4543 = vmatpush1.bf16.msra.mxu0 %v4542_v57  ;;  %v2838_v57 = vld [vmem:[%s9136_s4 + $0x270] sm:$0xff] }
 0x312   :  { %4545 = vmatprep.subr.bf16.mxu0 %v4544_v24  ;;  %v2843_v24 = vld [vmem:[%s9136_s4 + $0x298] sm:$0xff]  ;;  %v4630_v5 = vpack.c.bf16 %v2838_v57, %v2836_v56  ;;  %v2876_v57 = vld [vmem:[%s9136_s4 + $0x3a0] sm:$0xff] }
 0x313   :  { %v4632_v59 = vpack.c.bf16 %v2843_v24, %v2841_v58  ;;  %v2878_v58 = vld [vmem:[%s9136_s4 + $0x3b0] sm:$0xff]  ;;  %v2881_v24 = vld [vmem:[%s9136_s4 + $0x3c8] sm:$0xff] }
 0x315   :  { %4547 = vmatpush1.bf16.msra.mxu0 %v4546_v14  ;;  %v4634_v14 = vpack.c.bf16 %v2842_v63, %v2840_v60  ;;  %v2880_v63 = vld [vmem:[%s9136_s4 + $0x3c0] sm:$0xff] }
 0x316   :  { %4549 = vmatprep.subr.bf16.mxu0 %v4548_v2  ;;  %v4636_v2 = vpack.c.bf16 %v2847_v1, %v2845_v0  ;;  %v2882_v0 = vld [vmem:[%s9136_s4 + $0x3d0] sm:$0xff]  ;;  %v2885_v1 = vld [vmem:[%s9136_s4 + $0x3e8] sm:$0xff] }
 0x319   :  { %4551 = vmatpush1.bf16.msra.mxu0 %v4550_v7  ;;  %v2849_v7 = vld [vmem:[%s9136_s4 + $0x2c8] sm:$0xff] }
 0x31a   :  { %2721 = vmatprep.subr.mxu0 %v2329_v8  ;;  %v2851_v8 = vld [vmem:[%s9136_s4 + $0x2d8] sm:$0xff] }
 0x31b   :  { %v4640_v9 = vpack.c.bf16 %v2851_v8, %v2849_v7  ;;  %v2886_v7 = vld [vmem:[%s9136_s4 + $0x3f0] sm:$0xff]  ;;  %v2889_v8 = vld [vmem:[%s9136_s4 + $0x408] sm:$0xff] }
 0x31d   :  { %2722 = vmatpush1.msra.mxu0 %v2328_v45  ;;  %v4638_v45 = vpack.c.bf16 %v2846_v51, %v2844_v3  ;;  %v2884_v51 = vld [vmem:[%s9136_s4 + $0x3e0] sm:$0xff] }
 0x31e   :  { %2754 = vmatmul.mubr.f32.vlgmr.msra.gmra.mrb[4].mxu0 %v8273_v13  ;;  %4712 = vmatprep.subr.bf16.mxu0 %v4818_v16  ;;  %v3155_v13 = vld [vmem:[%s9138_s6 + $0x18] sm:$0xff] }
 0x31f   :  { %4714 = vmatpush1.bf16.msra.mxu0 %v4713_v17  ;;  %v4716_v18 = vpack.c.bf16 %v3155_v13, %v3154_v15  ;;  %v2850_v15 = vld [vmem:[%s9136_s4 + $0x2d0] sm:$0xff]  ;;  %v2853_v17 = vld [vmem:[%s9136_s4 + $0x2e8] sm:$0xff]  ;;  %v2855_v13 = vld [vmem:[%s9136_s4 + $0x2f8] sm:$0xff] }
 0x320   :  { %4715 = vmatprep.subr.bf16.mxu0 %v4818_v16  ;;  %v4644_v11 = vpack.c.bf16 %v2855_v13, %v2853_v17  ;;  %v2890_v17 = vld [vmem:[%s9136_s4 + $0x410] sm:$0xff]  ;;  %v2893_v13 = vld [vmem:[%s9136_s4 + $0x428] sm:$0xff] }
 0x323   :  { %4717 = vmatpush1.bf16.msra.mxu0 %v4716_v18  ;;  %v4642_v18 = vpack.c.bf16 %v2850_v15, %v2848_v10  ;;  %v2888_v15 = vld [vmem:[%s9136_s4 + $0x400] sm:$0xff] }
 0x324   :  { %4718 = vmatprep.subr.bf16.mxu0 %v4818_v16 }
 0x327   :  { %4720 = vmatpush1.bf16.msra.mxu0 %v4719_v20  ;;  %v2854_v20 = vld [vmem:[%s9136_s4 + $0x2f0] sm:$0xff] }
 0x328   :  { %4721 = vmatprep.subr.bf16.mxu0 %v4818_v16 }
 0x32b   :  { %4723 = vmatpush1.bf16.msra.mxu0 %v4722_v50  ;;  %v4646_v50 = vpack.c.bf16 %v2854_v20, %v2852_v19  ;;  %v2892_v20 = vld [vmem:[%s9136_s4 + $0x420] sm:$0xff] }
 0x32c   :  { %4724 = vmatprep.subr.bf16.mxu0 %v4818_v16 }
 0x32f   :  { %4726 = vmatpush1.bf16.msra.mxu0 %v4725_v28  ;;  %v2858_v28 = vld [vmem:[%s9136_s4 + $0x310] sm:$0xff] }
 0x330   :  { %4727 = vmatprep.subr.bf16.mxu0 %v4818_v16 }
 0x333   :  { %4729 = vmatpush1.bf16.msra.mxu0 %v4728_v32  ;;  %v4650_v32 = vpack.c.bf16 %v2858_v28, %v2856_v27  ;;  %v2896_v28 = vld [vmem:[%s9136_s4 + $0x440] sm:$0xff] }
 0x334   :  { %4730 = vmatprep.subr.bf16.mxu0 %v4818_v16 }
 0x337   :  { %4732 = vmatpush1.bf16.msra.mxu0 %v4731_v35  ;;  %v2867_v35 = vld [vmem:[%s9136_s4 + $0x358] sm:$0xff] }
 0x338   :  { %4733 = vmatprep.subr.bf16.mxu0 %v4818_v16  ;;  %v4656_v37 = vpack.c.bf16 %v2867_v35, %v2865_v62  ;;  %v2905_v62 = vld [vmem:[%s9136_s4 + $0x488] sm:$0xff]  ;;  %v2907_v35 = vld [vmem:[%s9136_s4 + $0x498] sm:$0xff] }
 0x38e   :  { %v2471_v31 = vpop.f32.mrb[2].mxu0  ;;  %v8799_v40 = vpop.f32.mrb[2].mxu1 }
 0x38f   :  { %v2473_v41 = vpop.f32.mrb[3].mxu0  ;;  %v2615_v42 = vpop.f32.mrb[3].mxu1 }
 0x390   :  { %3001 = vmatprep.mubr.f32.mxu1 %v2473_v41  ;;  %v2869_v41 = vld [vmem:[%s9136_s4 + $0x368] sm:$0xff] }
 0x391   :  { %3002 = vmatmul.mubr.f32.vlgmr.msra.gmra.mrb[4].mxu1 %v2471_v31  ;;  %v2864_v31 = vld [vmem:[%s9136_s4 + $0x340] sm:$0xff] }
 0x392   :  { %4619 = vmatpush1.bf16.msra.mxu1 %v4618_v38  ;;  %3072 = vmatprep.mubr.f32.mxu1 %v2615_v42  ;;  %v2866_v38 = vld [vmem:[%s9136_s4 + $0x350] sm:$0xff]  ;;  %v2871_v42 = vld [vmem:[%s9136_s4 + $0x378] sm:$0xff] }
 0x393   :  { %4621 = vmatprep.subr.bf16.mxu1 %v4620_v12  ;;  %v4658_v12 = vpack.c.bf16 %v2866_v38, %v2864_v31  ;;  %v4660_v43 = vpack.c.bf16 %v2871_v42, %v2869_v41  ;;  %v2904_v31 = vld [vmem:[%s9136_s4 + $0x480] sm:$0xff]  ;;  %v2906_v38 = vld [vmem:[%s9136_s4 + $0x490] sm:$0xff]  ;;  %v2909_v41 = vld [vmem:[%s9136_s4 + $0x4a8] sm:$0xff] }
 0x394   :  { %v2911_v42 = vld [vmem:[%s9136_s4 + $0x4b8] sm:$0xff] }
 0x396   :  { %4623 = vmatpush1.bf16.msra.mxu1 %v4622_v47  ;;  %v2875_v47 = vld [vmem:[%s9136_s4 + $0x398] sm:$0xff] }
 0x397   :  { %4625 = vmatprep.subr.bf16.mxu1 %v4624_v25  ;;  %v4662_v25 = vpack.c.bf16 %v2870_v39, %v2868_v44  ;;  %v4664_v48 = vpack.c.bf16 %v2875_v47, %v2873_v46  ;;  %v2908_v44 = vld [vmem:[%s9136_s4 + $0x4a0] sm:$0xff]  ;;  %v2910_v39 = vld [vmem:[%s9136_s4 + $0x4b0] sm:$0xff]  ;;  %v2913_v46 = vld [vmem:[%s9136_s4 + $0x4c8] sm:$0xff] }
 0x398   :  { %v2915_v47 = vld [vmem:[%s9136_s4 + $0x4d8] sm:$0xff] }
 0x39a   :  { %4627 = vmatpush1.bf16.msra.mxu1 %v4626_v54  ;;  %v2879_v54 = vld [vmem:[%s9136_s4 + $0x3b8] sm:$0xff] }
 0x39b   :  { %4629 = vmatprep.subr.bf16.mxu1 %v4628_v55  ;;  %v4666_v55 = vpack.c.bf16 %v2874_v52, %v2872_v49  ;;  %v4668_v56 = vpack.c.bf16 %v2879_v54, %v2877_v53  ;;  %v2912_v49 = vld [vmem:[%s9136_s4 + $0x4c0] sm:$0xff]  ;;  %v2914_v52 = vld [vmem:[%s9136_s4 + $0x4d0] sm:$0xff]  ;;  %v2917_v53 = vld [vmem:[%s9136_s4 + $0x4e8] sm:$0xff] }
 0x39c   :  { %v2919_v54 = vld [vmem:[%s9136_s4 + $0x4f8] sm:$0xff] }
 0x39e   :  { %4631 = vmatpush1.bf16.msra.mxu1 %v4630_v5  ;;  %v2883_v5 = vld [vmem:[%s9136_s4 + $0x3d8] sm:$0xff] }
 0x39f   :  { %4633 = vmatprep.subr.bf16.mxu1 %v4632_v59  ;;  %v4670_v59 = vpack.c.bf16 %v2878_v58, %v2876_v57  ;;  %v4672_v60 = vpack.c.bf16 %v2883_v5, %v2881_v24  ;;  %v2916_v57 = vld [vmem:[%s9136_s4 + $0x4e0] sm:$0xff]  ;;  %v2918_v58 = vld [vmem:[%s9136_s4 + $0x4f0] sm:$0xff]  ;;  %v2921_v5 = vld [vmem:[%s9136_s4 + $0x508] sm:$0xff] }
 0x3a0   :  { %v4710_v24 = vpack.c.bf16 %v2918_v58, %v2916_v57 }
 0x3a2   :  { %4635 = vmatpush1.bf16.msra.mxu1 %v4634_v14  ;;  %v2887_v14 = vld [vmem:[%s9136_s4 + $0x3f8] sm:$0xff] }
 0x3a3   :  { %4637 = vmatprep.subr.bf16.mxu1 %v4636_v2  ;;  %v4674_v2 = vpack.c.bf16 %v2882_v0, %v2880_v63  ;;  %v4676_v3 = vpack.c.bf16 %v2887_v14, %v2885_v1  ;;  %v3166_v0 = vld [vmem:[%s9138_s6 + $0x70] sm:$0xff]  ;;  %v3167_v1 = vld [vmem:[%s9138_s6 + $0x78] sm:$0xff] }
 0x3a4   :  { %v4734_v14 = vpack.c.bf16 %v3167_v1, %v3166_v0 }
 0x3a6   :  { %4639 = vmatpush1.bf16.msra.mxu1 %v4638_v45  ;;  %v2891_v45 = vld [vmem:[%s9136_s4 + $0x418] sm:$0xff]  ;;  %4735 = vmatpush1.bf16.msra.mxu0 %v4734_v14 }
 0x3a7   :  { %4641 = vmatprep.subr.bf16.mxu1 %v4640_v9  ;;  %v4678_v9 = vpack.c.bf16 %v2886_v7, %v2884_v51  ;;  %v4680_v10 = vpack.c.bf16 %v2891_v45, %v2889_v8  ;;  %4736 = vmatprep.subr.bf16.mxu0 %v4818_v16  ;;  %v2922_v7 = vld [vmem:[%s9137_s5] sm:$0x3] }
 0x3a8   :  { %v2927_v8 = vrot.slane %v2922_v7, %v928_v4  ;;  %v2931_v45 = vrot.slane %v2922_v7, %v932_v6  ;;  %v3255_v4 = vld [vmem:[%s9140_s8 + $0x18] sm:$0xff] }
 0x3a9   :  { %v4743_v6 = vpack.c.bf16 %v3255_v4, %v3254_v61 }
 0x3aa   :  { %4643 = vmatpush1.bf16.msra.mxu1 %v4642_v18  ;;  %v2895_v18 = vld [vmem:[%s9136_s4 + $0x438] sm:$0xff] }
 0x3ab   :  { %4645 = vmatprep.subr.bf16.mxu1 %v4644_v11  ;;  %v4682_v11 = vpack.c.bf16 %v2890_v17, %v2888_v15  ;;  %v4684_v19 = vpack.c.bf16 %v2895_v18, %v2893_v13  ;;  %v3252_v17 = vld [vmem:[%s9140_s8] sm:$0xff]  ;;  %v3253_v13 = vld [vmem:[%s9140_s8 + $0x8] sm:$0xff]  ;;  %s4821_s8 = smov [#allocation2]  }
 0x3ac   :  { %s3345_s17 = sshll.u32 %s4821_s8, 4  ;;  %s3346_s17 = int_to_ptr.vmem [resolvable:$true] %s3345_s17 }
 0x3ad   :  { %s4793_s18 = scalar_lea.vmem %s3346_s17, 32  ;;  %p4798_p1 = scmp.lt.s32.totalorder %s3346_s17, %s3346_s17 }
 0x3ae   :  { %4647 = vmatpush1.bf16.msra.mxu1 %v4646_v50  ;;  %v2899_v50 = vld [vmem:[%s9136_s4 + $0x458] sm:$0xff]  ;;  %p4794_p0 = scmp.ne.s32.totalorder %s3346_s17, %s4793_s18  ;;  %p4799_p2 = scmp.lt.s32.totalorder %s4793_s18, %s4793_s18 }
 0x3af   :  { %4649 = vmatprep.subr.bf16.mxu1 %v4648_v23  ;;  %v4686_v23 = vpack.c.bf16 %v2894_v21, %v2892_v20  ;;  %v4688_v27 = vpack.c.bf16 %v2899_v50, %v2897_v22  ;;  %v4820_v21 = vmov 0.0   ;;  %v3364_v22 = vld [vmem:[%s9139_s7] ss:$0 sm:$0xff] }
 0x3b0   :  { %p4800_p3 = por %p4799_p2, %p4798_p1 }
 0x3b2   :  { %4651 = vmatpush1.bf16.msra.mxu1 %v4650_v32  ;;  %v4690_v32 = vpack.c.bf16 %v2898_v29, %v2896_v28  ;;  %v3366_v28 = vld [vmem:[%s9141_s9] ss:$0 sm:$0xff]  ;;  %p4801_p4 = pnand %p4800_p3, %p4794_p0 }
 0x3b3   :  { %4653 = vmatprep.subr.bf16.mxu1 %v4652_v26 }
 0x3b6   :  { %4655 = vmatpush1.bf16.msra.mxu1 %v4654_v36  ;;  %v4694_v36 = vpack.c.bf16 %v2902_v34, %v2900_v33 }
 0x3b7   :  { %4657 = vmatprep.subr.bf16.mxu1 %v4656_v37  ;;  %v4696_v37 = vpack.c.bf16 %v2907_v35, %v2905_v62 }
 0x3ba   :  { %4659 = vmatpush1.bf16.msra.mxu1 %v4658_v12  ;;  %v4698_v12 = vpack.c.bf16 %v2906_v38, %v2904_v31 }
 0x3bb   :  { %4661 = vmatprep.subr.bf16.mxu1 %v4660_v43  ;;  %v4700_v43 = vpack.c.bf16 %v2911_v42, %v2909_v41 }
 0x3be   :  { %4663 = vmatpush1.bf16.msra.mxu1 %v4662_v25  ;;  %v4702_v25 = vpack.c.bf16 %v2910_v39, %v2908_v44 }
 0x3bf   :  { %4665 = vmatprep.subr.bf16.mxu1 %v4664_v48  ;;  %v4704_v48 = vpack.c.bf16 %v2915_v47, %v2913_v46 }
 0x3c2   :  { %4667 = vmatpush1.bf16.msra.mxu1 %v4666_v55  ;;  %v4706_v55 = vpack.c.bf16 %v2914_v52, %v2912_v49 }
 0x3c3   :  { %4669 = vmatprep.subr.bf16.mxu1 %v4668_v56  ;;  %v4708_v56 = vpack.c.bf16 %v2919_v54, %v2917_v53 }
 0x3c6   :  { %4671 = vmatpush1.bf16.msra.mxu1 %v4670_v59  ;;  %v2920_v59 = vld [vmem:[%s9136_s4 + $0x500] sm:$0xff] }
 0x3c7   :  { %4673 = vmatprep.subr.bf16.mxu1 %v4672_v60 }
 0x3ca   :  { %4675 = vmatpush1.bf16.msra.mxu1 %v4674_v2  ;;  %v3168_v2 = vld [vmem:[%s9138_s6 + $0x80] sm:$0xff] }
 0x3cb   :  { %4677 = vmatprep.subr.bf16.mxu1 %v4676_v3  ;;  %v3169_v3 = vld [vmem:[%s9138_s6 + $0x88] sm:$0xff] }
 0x3cc   :  { %v4737_v51 = vpack.c.bf16 %v3169_v3, %v3168_v2 }
 0x3ce   :  { %4679 = vmatpush1.bf16.msra.mxu1 %v4678_v9  ;;  %4738 = vmatpush1.bf16.msra.mxu0 %v4737_v51 }
 0x3cf   :  { %4681 = vmatprep.subr.bf16.mxu1 %v4680_v10  ;;  %4739 = vmatprep.subr.bf16.mxu0 %v4818_v16 }
 0x3d1   :  { %3073 = vmatmul.mubr.f32.vlgmr.msra.gmra.mrb[4].mxu1 %v8799_v40  ;;  %v2903_v40 = vld [vmem:[%s9136_s4 + $0x478] sm:$0xff] }
 0x3d2   :  { %4683 = vmatpush1.bf16.msra.mxu1 %v4682_v11  ;;  %v4692_v26 = vpack.c.bf16 %v2903_v40, %v2901_v30 }
 0x3d3   :  { %4685 = vmatprep.subr.bf16.mxu1 %v4684_v19  ;;  %v4740_v19 = vpack.c.bf16 %v3253_v13, %v3252_v17 }
 0x3d6   :  { %4687 = vmatpush1.bf16.msra.mxu1 %v4686_v23 }
 0x3d7   :  { %4689 = vmatprep.subr.bf16.mxu1 %v4688_v27 }
 0x3da   :  { %4691 = vmatpush1.bf16.msra.mxu1 %v4690_v32 }
 0x3db   :  { %4693 = vmatprep.subr.bf16.mxu1 %v4692_v26 }
 0x3de   :  { %4695 = vmatpush1.bf16.msra.mxu1 %v4694_v36 }
 0x3df   :  { %4697 = vmatprep.subr.bf16.mxu1 %v4696_v37 }
 0x3e2   :  { %4699 = vmatpush1.bf16.msra.mxu1 %v4698_v12 }
 0x3e3   :  { %4701 = vmatprep.subr.bf16.mxu1 %v4700_v43 }
 0x3e6   :  { %4703 = vmatpush1.bf16.msra.mxu1 %v4702_v25 }
 0x3e7   :  { %4705 = vmatprep.subr.bf16.mxu1 %v4704_v48 }
 0x3ea   :  { %4707 = vmatpush1.bf16.msra.mxu1 %v4706_v55 }
 0x3eb   :  { %4709 = vmatprep.subr.bf16.mxu1 %v4708_v56 }
 0x3ee   :  { %4711 = vmatpush1.bf16.msra.mxu1 %v4710_v24 }
 0x3ef   :  { %3111 = vmatprep.subr.mxu1 %v2921_v5 }
 0x3f1   :  { %v2755_v60 = vpop.f32.mrb[4].mxu0 }
 0x3f2   :  { %v2757_v63 = vpop.f32.mrb[5].mxu0  ;;  %3112 = vmatpush1.msra.mxu1 %v2920_v59 }
 0x3f3   :  { %3363 = vmatprep.mubr.msk.f32.mxu1 %vm2330_vm2, %v2757_v63 }
 0x3f4   :  { %3144 = vmatmul.mubr.f32.vlgmr.msra.gmra.mrb[4].mxu1 %v2755_v60 }
 0x4c7   :  { %v3145_v9 = vpop.f32.mrb[4].mxu1 }
 0x4c8   :  { %v4749_v10 = vadd.f32 %v3145_v9, %v2927_v8  ;;  %v3147_v15 = vpop.f32.mrb[5].mxu1 }
 0x4c9   :  { %v4750_v18 = vadd.f32 %v3147_v15, %v2931_v45 }
 0x4ca   :  { %v3150_v20 = vmax.f32 %v4749_v10, 0.0 }
 0x4cb   :  { %v3151_v11 = vmax.f32 %v4750_v18, 0.0 }
 0x4cd   :  { %3365 = vmatprep.mubr.msk.f32.mxu0 %vm3177_vm3, %v3151_v11 }
 0x4ce   :  { %3246 = vmatmul.mubr.f32.vlgmr.msra.gmra.mrb[6].mxu0 %v3150_v20 }
 0x4cf   :  { %4741 = vmatpush3.bf16.msra.mxu0 %v4740_v19  ;;  %3381 = vmatprep.mubr.msk.f32.mxu0 %vm4819_vm4, %v4820_v21 }
 0x4d0   :  { %4742 = vmatprep.subr.bf16.mxu0 %v4818_v16 }
 0x4d3   :  { %4744 = vmatpush3.bf16.msra.mxu0 %v4743_v6 }
 0x5a1   :  { %v3247_v50 = vpop.f32.mrb[6].mxu0 }
 0x5a2   :  { %v3248_v23 = vadd.f32 %v3364_v22, %v3247_v50  ;;  %v3249_v16 = vpop.f32.mrb[7].mxu0 }
 0x5a4   :  { %v3251_v27 = vmax.f32 %v3248_v23, 0.0 }
 0x5a6   :  { %3382 = vmatmul.mubr.msk.f32.vlgmr.msra.gmra.mrb[8].mxu0 %vm3263_vm5, %v3251_v27 }
 0x679   :  { %v3333_v29 = vpop.f32.mrb[8].mxu0 }
 0x67a   :  { %v3334_v30 = vadd.f32 %v3366_v28, %v3333_v29  ;;  %v3383_v40 = vpop.f32.mrb[9].mxu0 }
 0x67c   :  { %3338 = vst.msk [vmem:[#allocation2] sm:$0x3] %vm3337_vm6, %v3334_v30 }
 0x67d   :  { %4804 = shalt.err (!%p4801_p4)
}
 0x67e   :  { %s4805_s20 = scalar_lea.hbm %s9142_s10, 32 }
 0x67f   :  { %p4806_p5 = scmp.ne.s32.totalorder %s9142_s10, %s4805_s20  ;;  %p4809_p6 = scmp.lt.u32.totalorder %s4805_s20, %s9142_s10 }
 0x681   :  { %p4811_p7 = pnand %p4809_p6, %p4806_p5 }
 0x683   :  { %4814 = shalt.err (!%p4811_p7)
}
 0x684   :  { %3348 = dma.vmem_to_hbm [thread:$0]  %s3346_s17, 32, %s9142_s10, [#allocation3]  }
 0x685   :  { %4815 = dma.done.wait [#allocation3], 32  }
 0x686   :  { %4816 = vsyncadd [#allocation3], 4294967264 }
 0x687   :  { %3352 = vsyncpa [#allocation3], 1 }

</bundles_post_ra>
